<compile_context>
chip_gen: v6e
topology: v6e:2x2x1
jax: 0.10.0
libtpu: 0.0.40
codegen_flags: <defaults>
</compile_context>

<pallas_src>
import math

import numpy as np
import jax
import jax.numpy as jnp
from jax import lax
from jax.experimental import pallas as pl
from jax.experimental.pallas import tpu as pltpu

# --------------------------------------------------------------------------- #
# Constants / model dims
# --------------------------------------------------------------------------- #
TILE = 1024                 # square weight tile: K-tile == N-tile (lane-aligned)
NSLOT = 2                   # activation slots per ping-pong buffer (2048 / TILE)
F_KFIRST, F_KLAST, F_OUT = 1, 2, 4

ACTOR_DIMS = [(576, 1024), (1024, 2048), (2048, 2048), (2048, 2048),
              (2048, 2048), (2048, 2048), (2048, 256)]
VALUE_DIMS = [(320, 1024), (1024, 2048), (2048, 2048), (2048, 2048),
              (2048, 2048), (2048, 512), (512, 1)]
ACTOR_OUT = 256
VALUE_HID = 512             # width fed into the tiny final 512 -> 1 projection


def _ceil_to(x, m):
    return ((x + m - 1) // m) * m


def _gelu_exact(x):
    # PyTorch default nn.GELU(): 0.5 * x * (1 + erf(x / sqrt(2)))
    return 0.5 * x * (1.0 + lax.erf(x * (1.0 / math.sqrt(2.0))))


# --------------------------------------------------------------------------- #
# Fused multi-layer MLP kernel (both heads, schedule-driven)
# --------------------------------------------------------------------------- #
def _read_slot(act_ref, idx):
    """Select activation slot `idx` using only static ref indices."""
    val = act_ref[0]
    for s in range(1, act_ref.shape[0]):
        val = jnp.where(idx == s, act_ref[s], val)
    return val


def _write_slot(act_ref, idx, val, enable):
    """Store `val` into activation slot `idx` (static ref indices, gated)."""
    for s in range(act_ref.shape[0]):
        @pl.when(jnp.logical_and(enable, idx == s))
        def _(s=s):
            act_ref[s] = val


def _fused_mlp_kernel(widx_r, bidx_r, src_r, dst_r, flg_r,   # scalar prefetch (SMEM)
                      w_ref, b_ref, x_ref,                   # VMEM inputs
                      o_ref,                                  # VMEM output
                      act_ref, acc_ref):                      # VMEM scratch
    h = pl.program_id(0)   # head: 0 = actor, 1 = value
    t = pl.program_id(1)   # schedule step within the head

    # Stage this head's (zero-padded) input activations into slot 0, once per head.
    @pl.when(t == 0)
    def _():
        act_ref[0] = x_ref[0]

    f = flg_r[h, t]
    k_first = (f & F_KFIRST) != 0
    k_last = (f & F_KLAST) != 0
    is_out = (f & F_OUT) != 0

    # Activations kept f32 in VMEM, cast to bf16 at the MXU; weights stream as bf16;
    # accumulation stays f32.
    x_in = _read_slot(act_ref, src_r[h, t])                  # (BP, TILE) f32
    y = jnp.dot(x_in.astype(jnp.bfloat16), w_ref[0],
                preferred_element_type=jnp.float32)          # (BP, TILE) f32

    @pl.when(k_first)
    def _():
        acc_ref[...] = y

    @pl.when(jnp.logical_not(k_first))
    def _():
        acc_ref[...] = acc_ref[...] + y

    # Bias + exact-erf GELU epilogue (cheap VPU/EUP work, hidden under the weight DMA).
    z = _gelu_exact(acc_ref[...] + b_ref[0])

    _write_slot(act_ref, dst_r[h, t], z,
                jnp.logical_and(k_last, jnp.logical_not(is_out)))

    @pl.when(jnp.logical_and(k_last, is_out))
    def _():
        o_ref[0] = z.astype(o_ref.dtype)


# --------------------------------------------------------------------------- #
# Parameters + host-side packing into tile-major bf16 weights & a schedule
# --------------------------------------------------------------------------- #
def init_params(key):
    """PyTorch-default-style uniform init; weights stored (K, N) = torch (out,in).T."""
    def make_layer(k, fan_in, fan_out):
        kw, kb = jax.random.split(k)
        bound = 1.0 / math.sqrt(fan_in)
        w = jax.random.uniform(kw, (fan_in, fan_out), jnp.float32, -bound, bound)
        b = jax.random.uniform(kb, (fan_out,), jnp.float32, -bound, bound)
        return w, b

    keys = jax.random.split(key, len(ACTOR_DIMS) + len(VALUE_DIMS))
    actor = [make_layer(keys[i], fi, fo) for i, (fi, fo) in enumerate(ACTOR_DIMS)]
    value = [make_layer(keys[len(ACTOR_DIMS) + i], fi, fo)
             for i, (fi, fo) in enumerate(VALUE_DIMS)]
    return {"actor": actor, "value": value}


def _pack_head(layers):
    """Split one head's Linear stack into TILE x TILE weight tiles + a schedule."""
    w_tiles, b_tiles, steps = [], [], []
    n_layers = len(layers)
    for l, (w, b) in enumerate(layers):
        w = np.asarray(w, np.float32)
        b = np.asarray(b, np.float32)
        K, N = w.shape
        Kp, Np = _ceil_to(K, TILE), _ceil_to(N, TILE)
        wp = np.zeros((Kp, Np), np.float32)
        wp[:K, :N] = w
        bp = np.zeros((Np,), np.float32)
        bp[:N] = b
        nk, nj = Kp // TILE, Np // TILE
        assert nk <= NSLOT and nj <= NSLOT
        last = l == n_layers - 1
        assert (not last) or nj == 1, "fused head must end in a single output tile"
        src_base = (l % 2) * NSLOT
        dst_base = ((l + 1) % 2) * NSLOT
        for j in range(nj):
            b_tiles.append(bp[j * TILE:(j + 1) * TILE])
            b_id = len(b_tiles) - 1
            for kt in range(nk):
                w_tiles.append(wp[kt * TILE:(kt + 1) * TILE, j * TILE:(j + 1) * TILE])
                flags = F_KFIRST if kt == 0 else 0
                if kt == nk - 1:
                    flags |= F_KLAST
                    if last:
                        flags |= F_OUT
                steps.append((len(w_tiles) - 1, b_id, src_base + kt, dst_base + j, flags))
    return w_tiles, b_tiles, steps


def pack_params(params):
    """Pack both heads: bf16 tile-major weights, f32 bias tiles, int32 schedules."""
    aw, ab, asteps = _pack_head(params["actor"])          # all 7 actor layers
    vw, vb, vsteps = _pack_head(params["value"][:-1])     # value layers 0..5
    woff, boff = len(aw), len(ab)
    vsteps = [(w + woff, b + boff, s, d, f) for (w, b, s, d, f) in vsteps]

    T = max(len(asteps), len(vsteps))

    def pad(steps):
        steps = list(steps)
        while len(steps) < T:
            w, b = steps[-1][0], steps[-1][1]
            # no-op step: revisits previous weight/bias tile (no extra DMA),
            # never sets K_LAST so it stores nothing.
            steps.append((w, b, 0, 0, F_KFIRST))
        return steps

    meta = np.asarray([pad(asteps), pad(vsteps)], dtype=np.int32)   # (2, T, 5)

    w_pack = jnp.asarray(np.stack(aw + vw, axis=0)).astype(jnp.bfloat16)
    b_pack = jnp.asarray(np.stack(ab + vb, axis=0)[:, None, :])     # (TB, 1, TILE) f32

    return {
        "w_pack": w_pack,
        "b_pack": b_pack,
        "widx": jnp.asarray(meta[:, :, 0]),
        "bidx": jnp.asarray(meta[:, :, 1]),
        "src": jnp.asarray(meta[:, :, 2]),
        "dst": jnp.asarray(meta[:, :, 3]),
        "flags": jnp.asarray(meta[:, :, 4]),
        "w_vlast": params["value"][-1][0],   # (512, 1) f32, applied in plain jnp
        "b_vlast": params["value"][-1][1],   # (1,)    f32
    }


# --------------------------------------------------------------------------- #
# ACmodel forward
# --------------------------------------------------------------------------- #
def acmodel_forward(packed, grid_in, memory):
    B = grid_in.shape[0]
    BP = _ceil_to(max(B, 8), 8)               # pad batch to a full sublane multiple
    T = packed["widx"].shape[1]
    TB = packed["b_pack"].shape[0]

    # tanh(grid / 100), row-major flatten (== nn.Flatten on NCHW) -- plain jnp.
    g = jnp.tanh(grid_in.reshape(B, -1).astype(jnp.float32) / 100.0)      # (B, 320)
    mem = memory.astype(jnp.float32)
    x_actor = jnp.concatenate([g, mem], axis=1)                            # (B, 576)

    def pad_input(x):
        return jnp.pad(x, ((0, BP - B), (0, TILE - x.shape[1])))
    xcat = jnp.stack([pad_input(x_actor), pad_input(g)])                   # (2, BP, TILE)

    heads = pl.pallas_call(
        _fused_mlp_kernel,
        out_shape=jax.ShapeDtypeStruct((2, BP, TILE), jnp.float32),
        grid_spec=pltpu.PrefetchScalarGridSpec(
            num_scalar_prefetch=5,
            grid=(2, T),
            in_specs=[
                # packed bf16 weight tiles: one contiguous 2 MiB tile per step
                pl.BlockSpec((1, TILE, TILE),
                             lambda h, t, widx, *_: (widx[h, t], 0, 0)),
                # bias tile for the current output column block
                pl.BlockSpec((1, 1, TILE),
                             lambda h, t, widx, bidx, *_: (bidx[h, t], 0, 0)),
                # per-head (zero-padded) input activations, fetched once per head
                pl.BlockSpec((1, BP, TILE), lambda h, t, *_: (h, 0, 0)),
            ],
            out_specs=pl.BlockSpec((1, BP, TILE), lambda h, t, *_: (h, 0, 0)),
            scratch_shapes=[
                pltpu.VMEM((2 * NSLOT, BP, TILE), jnp.float32),  # act ping-pong slots
                pltpu.VMEM((BP, TILE), jnp.float32),             # f32 accumulator
            ],
        ),
        compiler_params=pltpu.CompilerParams(
            dimension_semantics=("parallel", "arbitrary"),
            vmem_limit_bytes=32 * 1024 * 1024,
        ),
    )(packed["widx"], packed["bidx"], packed["src"], packed["dst"], packed["flags"],
      packed["w_pack"], packed["b_pack"], xcat)

    actor_out = heads[0, :B, :ACTOR_OUT]                                    # (B, 256)
    v = heads[1, :B, :VALUE_HID]                                            # (B, 512)
    # Tiny final Value layer (512 -> 1) + 10*tanh in plain jnp (below launch cost).
    value_out = 10.0 * jnp.tanh(v @ packed["w_vlast"] + packed["b_vlast"])  # (B, 1)
    return actor_out, value_out


# --------------------------------------------------------------------------- #
# Plain-jnp reference (same bf16 weight quantization, f32 accumulation)
# --------------------------------------------------------------------------- #
def _reference_forward(params, grid_in, memory):
    def mlp(x, layers):
        for w, b in layers:
            y = jnp.dot(x.astype(jnp.bfloat16), w.astype(jnp.bfloat16),
                        preferred_element_type=jnp.float32) + b
            x = _gelu_exact(y)
        return x

    B = grid_in.shape[0]
    g = jnp.tanh(grid_in.reshape(B, -1).astype(jnp.float32) / 100.0)
    a = mlp(jnp.concatenate([g, memory.astype(jnp.float32)], axis=1), params["actor"])
    v = mlp(g, params["value"][:-1])
    wl, bl = params["value"][-1]
    return a, 10.0 * jnp.tanh(v @ wl + bl)


# --------------------------------------------------------------------------- #
# Driver
# --------------------------------------------------------------------------- #
if __name__ == "__main__":
    key = jax.random.PRNGKey(0)
    k_params, k_grid, k_mem = jax.random.split(key, 3)

    params = init_params(k_params)
    packed = pack_params(params)

    B = 2
    grid_in = jax.random.normal(k_grid, (B, 5, 8, 8), jnp.float32) * 50.0  # -> (B, 320)
    memory = jax.random.normal(k_mem, (B, 256), jnp.float32)

    fwd = jax.jit(acmodel_forward)
    actor_out, value_out = fwd(packed, grid_in, memory)
    jax.block_until_ready((actor_out, value_out))

    assert actor_out.shape == (B, 256)
    assert value_out.shape == (B, 1)

    ref_actor, ref_value = _reference_forward(params, grid_in, memory)
    np.testing.assert_allclose(np.asarray(actor_out), np.asarray(ref_actor),
                               atol=5e-2, rtol=5e-2)
    np.testing.assert_allclose(np.asarray(value_out), np.asarray(ref_value),
                               atol=5e-2, rtol=5e-2)

    print("KERNEL_OK")
</pallas_src>

<mosaic_0001>
module attributes {stable_mosaic.version = 11 : i64} {
  func.func @_fused_mlp_kernel(%arg0: i32, %arg1: i32, %arg2: memref<2x21xi32, #tpu.memory_space<smem>>, %arg3: memref<2x21xi32, #tpu.memory_space<smem>>, %arg4: memref<2x21xi32, #tpu.memory_space<smem>>, %arg5: memref<2x21xi32, #tpu.memory_space<smem>>, %arg6: memref<2x21xi32, #tpu.memory_space<smem>>, %arg7: memref<1x1024x1024xbf16, #tpu.memory_space<vmem>>, %arg8: memref<1x1x1024xf32, #tpu.memory_space<vmem>>, %arg9: memref<1x8x1024xf32, #tpu.memory_space<vmem>>, %arg10: memref<1x8x1024xf32, #tpu.memory_space<vmem>>, %arg11: memref<4x8x1024xf32, #tpu.memory_space<vmem>>, %arg12: memref<8x1024xf32, #tpu.memory_space<vmem>>) attributes {dimension_semantics = [#tpu.dimension_semantics<parallel>, #tpu.dimension_semantics<arbitrary>], iteration_bounds = array<i64: 2, 21>, scalar_prefetch = 5 : i64, scratch_operands = 2 : i64, tpu.core_type = #tpu.core_type<tc>, window_params = [{transform_indices = @transform_0, window_bounds = array<i64: 1, 1024, 1024>}, {transform_indices = @transform_1, window_bounds = array<i64: 1, 1, 1024>}, {transform_indices = @transform_2, window_bounds = array<i64: 1, 8, 1024>}, {transform_indices = @transform_3, window_bounds = array<i64: 1, 8, 1024>}]} {
    %c0_i32 = arith.constant 0 : i32
    %0 = arith.cmpi eq, %arg1, %c0_i32 : i32
    %1 = arith.extui %0 : i1 to i32
    %c0_i32_0 = arith.constant 0 : i32
    %2 = arith.cmpi ne, %1, %c0_i32_0 : i32
    scf.if %2 {
      %c0_37 = arith.constant 0 : index
      %c0_38 = arith.constant 0 : index
      %c0_39 = arith.constant 0 : index
      %75 = vector.load %arg9[%c0_37, %c0_38, %c0_39] : memref<1x8x1024xf32, #tpu.memory_space<vmem>>, vector<1x8x1024xf32>
      %76 = vector.shape_cast %75 : vector<1x8x1024xf32> to vector<8x1024xf32>
      %c0_40 = arith.constant 0 : index
      %c0_41 = arith.constant 0 : index
      %c0_42 = arith.constant 0 : index
      %77 = vector.load %arg11[%c0_40, %c0_41, %c0_42] : memref<4x8x1024xf32, #tpu.memory_space<vmem>>, vector<1x8x1024xf32>
      %78 = vector.shape_cast %77 : vector<1x8x1024xf32> to vector<8x1024xf32>
      %79 = vector.shape_cast %76 : vector<8x1024xf32> to vector<1x8x1024xf32>
      tpu.vector_store %arg11[%c0_40, %c0_41, %c0_42], %79 {strides = array<i32>} : memref<4x8x1024xf32, #tpu.memory_space<vmem>>, vector<1x8x1024xf32>,
    } else {
    }
    %3 = arith.index_cast %arg0 : i32 to index
    %4 = arith.index_cast %arg1 : i32 to index
    %5 = memref.load %arg6[%3, %4] : memref<2x21xi32, #tpu.memory_space<smem>>
    %c1_i32 = arith.constant 1 : i32
    %6 = arith.andi %5, %c1_i32 : i32
    %c0_i32_1 = arith.constant 0 : i32
    %7 = arith.cmpi ne, %6, %c0_i32_1 : i32
    %c2_i32 = arith.constant 2 : i32
    %8 = arith.andi %5, %c2_i32 : i32
    %c0_i32_2 = arith.constant 0 : i32
    %9 = arith.cmpi ne, %8, %c0_i32_2 : i32
    %c4_i32 = arith.constant 4 : i32
    %10 = arith.andi %5, %c4_i32 : i32
    %c0_i32_3 = arith.constant 0 : i32
    %11 = arith.cmpi ne, %10, %c0_i32_3 : i32
    %12 = arith.index_cast %arg0 : i32 to index
    %13 = arith.index_cast %arg1 : i32 to index
    %14 = memref.load %arg4[%12, %13] : memref<2x21xi32, #tpu.memory_space<smem>>
    %c0 = arith.constant 0 : index
    %c0_4 = arith.constant 0 : index
    %c0_5 = arith.constant 0 : index
    %15 = vector.load %arg11[%c0, %c0_4, %c0_5] : memref<4x8x1024xf32, #tpu.memory_space<vmem>>, vector<1x8x1024xf32>
    %16 = vector.shape_cast %15 : vector<1x8x1024xf32> to vector<8x1024xf32>
    %c1_i32_6 = arith.constant 1 : i32
    %17 = arith.cmpi eq, %14, %c1_i32_6 : i32
    %c1 = arith.constant 1 : index
    %c0_7 = arith.constant 0 : index
    %c0_8 = arith.constant 0 : index
    %18 = vector.load %arg11[%c1, %c0_7, %c0_8] : memref<4x8x1024xf32, #tpu.memory_space<vmem>>, vector<1x8x1024xf32>
    %19 = vector.shape_cast %18 : vector<1x8x1024xf32> to vector<8x1024xf32>
    %20 = arith.select %17, %19, %16 : vector<8x1024xf32>
    %c2_i32_9 = arith.constant 2 : i32
    %21 = arith.cmpi eq, %14, %c2_i32_9 : i32
    %c2 = arith.constant 2 : index
    %c0_10 = arith.constant 0 : index
    %c0_11 = arith.constant 0 : index
    %22 = vector.load %arg11[%c2, %c0_10, %c0_11] : memref<4x8x1024xf32, #tpu.memory_space<vmem>>, vector<1x8x1024xf32>
    %23 = vector.shape_cast %22 : vector<1x8x1024xf32> to vector<8x1024xf32>
    %24 = arith.select %21, %23, %20 : vector<8x1024xf32>
    %c3_i32 = arith.constant 3 : i32
    %25 = arith.cmpi eq, %14, %c3_i32 : i32
    %c3 = arith.constant 3 : index
    %c0_12 = arith.constant 0 : index
    %c0_13 = arith.constant 0 : index
    %26 = vector.load %arg11[%c3, %c0_12, %c0_13] : memref<4x8x1024xf32, #tpu.memory_space<vmem>>, vector<1x8x1024xf32>
    %27 = vector.shape_cast %26 : vector<1x8x1024xf32> to vector<8x1024xf32>
    %28 = arith.select %25, %27, %24 : vector<8x1024xf32>
    %29 = arith.truncf %28 : vector<8x1024xf32> to vector<8x1024xbf16>
    %c0_14 = arith.constant 0 : index
    %c0_15 = arith.constant 0 : index
    %c0_16 = arith.constant 0 : index
    %30 = vector.load %arg7[%c0_14, %c0_15, %c0_16] : memref<1x1024x1024xbf16, #tpu.memory_space<vmem>>, vector<1x1024x1024xbf16>
    %31 = vector.shape_cast %30 : vector<1x1024x1024xbf16> to vector<1024x1024xbf16>
    %cst = arith.constant dense<0.000000e+00> : vector<8x1024xf32>
    %32 = tpu.matmul %29, %31, %cst {dimension_numbers = #tpu.dot_dimension_numbers<[1], [0], [0], [1], [0, 0, 1, 1], [], []>} : vector<8x1024xbf16>, vector<1024x1024xbf16>, vector<8x1024xf32> -> vector<8x1024xf32>
    %33 = arith.extui %7 : i1 to i32
    %c0_i32_17 = arith.constant 0 : i32
    %34 = arith.cmpi ne, %33, %c0_i32_17 : i32
    scf.if %34 {
      %c0_37 = arith.constant 0 : index
      %c0_38 = arith.constant 0 : index
      %75 = vector.load %arg12[%c0_37, %c0_38] : memref<8x1024xf32, #tpu.memory_space<vmem>>, vector<8x1024xf32>
      tpu.vector_store %arg12[%c0_37, %c0_38], %32 {strides = array<i32>} : memref<8x1024xf32, #tpu.memory_space<vmem>>, vector<8x1024xf32>,
    } else {
    }
    %true = arith.constant true
    %35 = arith.xori %7, %true : i1
    %36 = arith.extui %35 : i1 to i32
    %c0_i32_18 = arith.constant 0 : i32
    %37 = arith.cmpi ne, %36, %c0_i32_18 : i32
    scf.if %37 {
      %c0_37 = arith.constant 0 : index
      %c0_38 = arith.constant 0 : index
      %75 = vector.load %arg12[%c0_37, %c0_38] : memref<8x1024xf32, #tpu.memory_space<vmem>>, vector<8x1024xf32>
      %76 = arith.addf %75, %32 : vector<8x1024xf32>
      %c0_39 = arith.constant 0 : index
      %c0_40 = arith.constant 0 : index
      %77 = vector.load %arg12[%c0_39, %c0_40] : memref<8x1024xf32, #tpu.memory_space<vmem>>, vector<8x1024xf32>
      tpu.vector_store %arg12[%c0_39, %c0_40], %76 {strides = array<i32>} : memref<8x1024xf32, #tpu.memory_space<vmem>>, vector<8x1024xf32>,
    } else {
    }
    %c0_19 = arith.constant 0 : index
    %c0_20 = arith.constant 0 : index
    %38 = vector.load %arg12[%c0_19, %c0_20] : memref<8x1024xf32, #tpu.memory_space<vmem>>, vector<8x1024xf32>
    %c0_21 = arith.constant 0 : index
    %c0_22 = arith.constant 0 : index
    %c0_23 = arith.constant 0 : index
    %39 = vector.load %arg8[%c0_21, %c0_22, %c0_23] : memref<1x1x1024xf32, #tpu.memory_space<vmem>>, vector<1x1x1024xf32>
    %40 = vector.shape_cast %39 : vector<1x1x1024xf32> to vector<1x1024xf32>
    %41 = vector.broadcast %40 : vector<1x1024xf32> to vector<8x1024xf32>
    %42 = arith.addf %38, %41 : vector<8x1024xf32>
    %cst_24 = arith.constant 5.000000e-01 : f32
    %43 = vector.broadcast %cst_24 : f32 to vector<8x1024xf32>
    %44 = arith.mulf %43, %42 : vector<8x1024xf32>
    %cst_25 = arith.constant 0.707106769 : f32
    %45 = vector.broadcast %cst_25 : f32 to vector<8x1024xf32>
    %46 = arith.mulf %42, %45 : vector<8x1024xf32>
    %47 = math.erf %46 : vector<8x1024xf32>
    %cst_26 = arith.constant 1.000000e+00 : f32
    %48 = vector.broadcast %cst_26 : f32 to vector<8x1024xf32>
    %49 = arith.addf %48, %47 : vector<8x1024xf32>
    %50 = arith.mulf %44, %49 : vector<8x1024xf32>
    %51 = arith.index_cast %arg0 : i32 to index
    %52 = arith.index_cast %arg1 : i32 to index
    %53 = memref.load %arg5[%51, %52] : memref<2x21xi32, #tpu.memory_space<smem>>
    %true_27 = arith.constant true
    %54 = arith.xori %11, %true_27 : i1
    %55 = arith.andi %9, %54 : i1
    %c0_i32_28 = arith.constant 0 : i32
    %56 = arith.cmpi eq, %53, %c0_i32_28 : i32
    %57 = arith.andi %55, %56 : i1
    %58 = arith.extui %57 : i1 to i32
    %c0_i32_29 = arith.constant 0 : i32
    %59 = arith.cmpi ne, %58, %c0_i32_29 : i32
    scf.if %59 {
      %c0_37 = arith.constant 0 : index
      %c0_38 = arith.constant 0 : index
      %c0_39 = arith.constant 0 : index
      %75 = vector.load %arg11[%c0_37, %c0_38, %c0_39] : memref<4x8x1024xf32, #tpu.memory_space<vmem>>, vector<1x8x1024xf32>
      %76 = vector.shape_cast %75 : vector<1x8x1024xf32> to vector<8x1024xf32>
      %77 = vector.shape_cast %50 : vector<8x1024xf32> to vector<1x8x1024xf32>
      tpu.vector_store %arg11[%c0_37, %c0_38, %c0_39], %77 {strides = array<i32>} : memref<4x8x1024xf32, #tpu.memory_space<vmem>>, vector<1x8x1024xf32>,
    } else {
    }
    %c1_i32_30 = arith.constant 1 : i32
    %60 = arith.cmpi eq, %53, %c1_i32_30 : i32
    %61 = arith.andi %55, %60 : i1
    %62 = arith.extui %61 : i1 to i32
    %c0_i32_31 = arith.constant 0 : i32
    %63 = arith.cmpi ne, %62, %c0_i32_31 : i32
    scf.if %63 {
      %c1_37 = arith.constant 1 : index
      %c0_38 = arith.constant 0 : index
      %c0_39 = arith.constant 0 : index
      %75 = vector.load %arg11[%c1_37, %c0_38, %c0_39] : memref<4x8x1024xf32, #tpu.memory_space<vmem>>, vector<1x8x1024xf32>
      %76 = vector.shape_cast %75 : vector<1x8x1024xf32> to vector<8x1024xf32>
      %77 = vector.shape_cast %50 : vector<8x1024xf32> to vector<1x8x1024xf32>
      tpu.vector_store %arg11[%c1_37, %c0_38, %c0_39], %77 {strides = array<i32>} : memref<4x8x1024xf32, #tpu.memory_space<vmem>>, vector<1x8x1024xf32>,
    } else {
    }
    %c2_i32_32 = arith.constant 2 : i32
    %64 = arith.cmpi eq, %53, %c2_i32_32 : i32
    %65 = arith.andi %55, %64 : i1
    %66 = arith.extui %65 : i1 to i32
    %c0_i32_33 = arith.constant 0 : i32
    %67 = arith.cmpi ne, %66, %c0_i32_33 : i32
    scf.if %67 {
      %c2_37 = arith.constant 2 : index
      %c0_38 = arith.constant 0 : index
      %c0_39 = arith.constant 0 : index
      %75 = vector.load %arg11[%c2_37, %c0_38, %c0_39] : memref<4x8x1024xf32, #tpu.memory_space<vmem>>, vector<1x8x1024xf32>
      %76 = vector.shape_cast %75 : vector<1x8x1024xf32> to vector<8x1024xf32>
      %77 = vector.shape_cast %50 : vector<8x1024xf32> to vector<1x8x1024xf32>
      tpu.vector_store %arg11[%c2_37, %c0_38, %c0_39], %77 {strides = array<i32>} : memref<4x8x1024xf32, #tpu.memory_space<vmem>>, vector<1x8x1024xf32>,
    } else {
    }
    %c3_i32_34 = arith.constant 3 : i32
    %68 = arith.cmpi eq, %53, %c3_i32_34 : i32
    %69 = arith.andi %55, %68 : i1
    %70 = arith.extui %69 : i1 to i32
    %c0_i32_35 = arith.constant 0 : i32
    %71 = arith.cmpi ne, %70, %c0_i32_35 : i32
    scf.if %71 {
      %c3_37 = arith.constant 3 : index
      %c0_38 = arith.constant 0 : index
      %c0_39 = arith.constant 0 : index
      %75 = vector.load %arg11[%c3_37, %c0_38, %c0_39] : memref<4x8x1024xf32, #tpu.memory_space<vmem>>, vector<1x8x1024xf32>
      %76 = vector.shape_cast %75 : vector<1x8x1024xf32> to vector<8x1024xf32>
      %77 = vector.shape_cast %50 : vector<8x1024xf32> to vector<1x8x1024xf32>
      tpu.vector_store %arg11[%c3_37, %c0_38, %c0_39], %77 {strides = array<i32>} : memref<4x8x1024xf32, #tpu.memory_space<vmem>>, vector<1x8x1024xf32>,
    } else {
    }
    %72 = arith.andi %9, %11 : i1
    %73 = arith.extui %72 : i1 to i32
    %c0_i32_36 = arith.constant 0 : i32
    %74 = arith.cmpi ne, %73, %c0_i32_36 : i32
    scf.if %74 {
      %c0_37 = arith.constant 0 : index
      %c0_38 = arith.constant 0 : index
      %c0_39 = arith.constant 0 : index
      %75 = vector.load %arg10[%c0_37, %c0_38, %c0_39] : memref<1x8x1024xf32, #tpu.memory_space<vmem>>, vector<1x8x1024xf32>
      %76 = vector.shape_cast %75 : vector<1x8x1024xf32> to vector<8x1024xf32>
      %77 = vector.shape_cast %50 : vector<8x1024xf32> to vector<1x8x1024xf32>
      tpu.vector_store %arg10[%c0_37, %c0_38, %c0_39], %77 {strides = array<i32>} : memref<1x8x1024xf32, #tpu.memory_space<vmem>>, vector<1x8x1024xf32>,
    } else {
    }
    return
  }
  func.func @transform_0(%arg0: i32, %arg1: i32, %arg2: memref<2x21xi32, #tpu.memory_space<smem>>, %arg3: memref<2x21xi32, #tpu.memory_space<smem>>, %arg4: memref<2x21xi32, #tpu.memory_space<smem>>, %arg5: memref<2x21xi32, #tpu.memory_space<smem>>, %arg6: memref<2x21xi32, #tpu.memory_space<smem>>) -> (i32, i32, i32) {
    %0 = arith.index_cast %arg0 : i32 to index
    %1 = arith.index_cast %arg1 : i32 to index
    %2 = memref.load %arg2[%0, %1] : memref<2x21xi32, #tpu.memory_space<smem>>
    %c0_i32 = arith.constant 0 : i32
    %c0_i32_0 = arith.constant 0 : i32
    %c0_i32_1 = arith.constant 0 : i32
    return %2, %c0_i32, %c0_i32_0 : i32, i32, i32
  }
  func.func @transform_1(%arg0: i32, %arg1: i32, %arg2: memref<2x21xi32, #tpu.memory_space<smem>>, %arg3: memref<2x21xi32, #tpu.memory_space<smem>>, %arg4: memref<2x21xi32, #tpu.memory_space<smem>>, %arg5: memref<2x21xi32, #tpu.memory_space<smem>>, %arg6: memref<2x21xi32, #tpu.memory_space<smem>>) -> (i32, i32, i32) {
    %0 = arith.index_cast %arg0 : i32 to index
    %1 = arith.index_cast %arg1 : i32 to index
    %2 = memref.load %arg3[%0, %1] : memref<2x21xi32, #tpu.memory_space<smem>>
    %c0_i32 = arith.constant 0 : i32
    %c0_i32_0 = arith.constant 0 : i32
    %c0_i32_1 = arith.constant 0 : i32
    return %2, %c0_i32, %c0_i32_0 : i32, i32, i32
  }
  func.func @transform_2(%arg0: i32, %arg1: i32, %arg2: memref<2x21xi32, #tpu.memory_space<smem>>, %arg3: memref<2x21xi32, #tpu.memory_space<smem>>, %arg4: memref<2x21xi32, #tpu.memory_space<smem>>, %arg5: memref<2x21xi32, #tpu.memory_space<smem>>, %arg6: memref<2x21xi32, #tpu.memory_space<smem>>) -> (i32, i32, i32) {
    %c0_i32 = arith.constant 0 : i32
    %c0_i32_0 = arith.constant 0 : i32
    %c0_i32_1 = arith.constant 0 : i32
    return %arg0, %c0_i32, %c0_i32_0 : i32, i32, i32
  }
  func.func @transform_3(%arg0: i32, %arg1: i32, %arg2: memref<2x21xi32, #tpu.memory_space<smem>>, %arg3: memref<2x21xi32, #tpu.memory_space<smem>>, %arg4: memref<2x21xi32, #tpu.memory_space<smem>>, %arg5: memref<2x21xi32, #tpu.memory_space<smem>>, %arg6: memref<2x21xi32, #tpu.memory_space<smem>>) -> (i32, i32, i32) {
    %c0_i32 = arith.constant 0 : i32
    %c0_i32_0 = arith.constant 0 : i32
    %c0_i32_1 = arith.constant 0 : i32
    return %arg0, %c0_i32, %c0_i32_0 : i32, i32, i32
  }
}

</mosaic_0001>

<bundles_post_ra>
// kernel: acmodel_forward.1
= control target key start
LH: loop header
LB: loop body
LE: loop exit
PB: predicated region body
PF: predicated region fallthrough
CT: control target
= control target key end

     0   :  { %s5372_s27 = smov [#allocation5]   ;;  %s5373_s30 = smov [#allocation6]   ;;  %s6485_s0 = inlined_call_operand.hbm [shape: s32[2,21], index: 0, kind: input, shape index: {}]   ;;  %s6486_s5 = inlined_call_operand.hbm [shape: bf16[38,1024,1024], index: 5, kind: input, shape index: {}]   ;;  %s6487_s6 = inlined_call_operand.hbm [shape: f32[22,1,1024], index: 6, kind: input, shape index: {}]   ;;  %s6488_s7 = inlined_call_operand.vmem [shape: f32[2,8,1024], index: 7, kind: input, shape index: {}]   ;;  %s6489_s8 = inlined_call_operand.vmem [shape: f32[2,8,1024], index: 8, kind: output, shape index: {}]   ;;  %s6490_s1 = inlined_call_operand.hbm [shape: s32[2,21], index: 1, kind: input, shape index: {}]   ;;  %s6491_s2 = inlined_call_operand.hbm [shape: s32[2,21], index: 2, kind: input, shape index: {}]   ;;  %s6492_s3 = inlined_call_operand.hbm [shape: s32[2,21], index: 3, kind: input, shape index: {}]   ;;  %s6493_s4 = inlined_call_operand.hbm [shape: s32[2,21], index: 4, kind: input, shape index: {}]  }
   0x1   :  { %14 = dma.hbm_to_smem %s6485_s0, 32, %s5372_s27, [#allocation4] }
   0x2   :  { %16 = dma.hbm_to_smem %s6490_s1, 32, %s5373_s30, [#allocation4] }
   0x3   :  { %s5374_s11 = smov [#allocation7]   ;;  %s5375_s14 = smov [#allocation8]  }
   0x4   :  { %18 = dma.hbm_to_smem %s6491_s2, 32, %s5374_s11, [#allocation4] }
   0x5   :  { %20 = dma.hbm_to_smem %s6492_s3, 32, %s5375_s14, [#allocation4] }
   0x6   :  { %s5376_s17 = smov [#allocation9]  }
   0x7   :  { %22 = dma.hbm_to_smem %s6493_s4, 32, %s5376_s17, [#allocation4] }
   0x8   :  { %5318 = dma.done.wait [#allocation4], 160 }
   0x9   :  { %5319 = vsyncadd [#allocation4], 4294967136 }
   0xa   :  { %24 = sfence }
   0xb   :  { %25 = vsyncpa [#allocation11], 0 }
   0xc   :  { %27 = vsyncpa [#allocation11 + $0x1], 0 }
   0xd   :  { %28 = vsyncpa [#allocation13], 0 }
   0xe   :  { %30 = vsyncpa [#allocation13 + $0x1], 0  ;;  %s5441_s0 = smov 0   ;;  %s5443_s1 = smov 0  }
   0xf   :  { %s5445_s2 = smov 0   ;;  %s5447_s20 = smov 0  }
  0x10   :  { %s5449_s3 = smov 0   ;;  %s5451_s21 = smov 0  }
  0x11   :  { %s5453_s4 = smov 0   ;;  %s5455_s22 = smov 0  }
  0x12   :  { %s5457_s23 = smov 0   ;;  %s5459_s24 = smov 0  }
  0x13   :  { %s5461_s25 = smov 0  }
  0x14 LB: > { %6504 = sst [smem:[#allocation21_spill]] %s5350_s21  ;;  %s45_s26 = sadd.s32 1, %s5362_s23  ;;  %s5370_s25 = sphi %s5461_s25, %s36_s25   ;;  %s5366_s24 = sphi %s5459_s24, %s6541_s24   ;;  %s5362_s23 = sphi %s5457_s23, %s6547_s23   ;;  %s5358_s22 = sphi %s5455_s22, %s6539_s22   ;;  %s5354_s4 = sphi %s5453_s4, %s6538_s4   ;;  %s5350_s21 = sphi %s5451_s21, %s6537_s21   ;;  %s5346_s3 = sphi %s5449_s3, %s6546_s3   ;;  %s5342_s20 = sphi %s5447_s20, %s6545_s20   ;;  %s5338_s2 = sphi %s5445_s2, %s6544_s2   ;;  %s5334_s1 = sphi %s5443_s1, %s6543_s1   ;;  %s5330_s0 = sphi %s5441_s0, %s6542_s0  }
  0x15   : > { %6505 = sst [smem:[#allocation22_spill]] %s5362_s23  ;;  %s48_s27 = sadd.s32 1, %s5366_s24 }
  0x16   : > { %6506 = sst [smem:[#allocation23_spill]] %s5366_s24  ;;  %p46_p0 = scmp.ge.s32.totalorder %s45_s26, 21 }
  0x17   : > { %s52_s28 = sshra.s32 %s5362_s23, 7  ;;  %s57_s30 = sand.u32 127, %s5362_s23 }
  0x18   : > { %s54_s29 = sadd.s32 %s5366_s24, %s52_s28  ;;  %s6549_s26 = smov (%p46_p0, %s45_s26), 0 }
  0x19   : > { %6507 = sst [smem:[#allocation24_spill]] %s6549_s26  ;;  %s6551_s27 = smov (!%p46_p0, %s48_s27), %s5366_s24 }
  0x1a   : > { %s4504_s9 = sshll.u32 %s54_s29, 7  ;;  %s60_s10 = sshra.s32 %s6549_s26, 7 }
  0x1b   : > { %p50_p1 = scmp.ge.s32.totalorder %s6551_s27, 2  ;;  %s5505_s11 = sadd.s32 %s4504_s9, %s57_s30 }
  0x1c   : > { %s59_s12 = sld [smem:[#allocation5 + %s5505_s11]]  ;;  %s65_s13 = sand.u32 127, %s6549_s26 }
  0x1d   : > { %s6553_s27 = smov (%p50_p1, %s6551_s27), 0  ;;  %s71_s14 = sadd.s32 1, %s5350_s21 }
  0x1e   : > { %6508 = sst [smem:[#allocation25_spill]] %s6553_s27  ;;  %p78_p2 = scmp.ne.s32.totalorder %s5350_s21, %s5346_s3 }
  0x1f   : > { %s62_s15 = sadd.s32 %s60_s10, %s6553_s27  ;;  %p6500_p3 = scmp.eq.s32.totalorder %s5370_s25, 0 }
  0x20   : > { %s4505_s16 = sshll.u32 %s62_s15, 7  ;;  %s5525_s28 = sld [smem:[#allocation6 + %s5505_s11]] }
  0x21   : > { %s66_s17 = sadd.s32 %s4505_s16, %s65_s13  ;;  %p5520_p5 = por %p6500_p3, %p78_p2 }
  0x22   : > { %s67_s19 = sld [smem:[#allocation5 + %s66_s17]]  ;;  %p6499_p6 = scmp.lt.s32.totalorder %s5370_s25, 42 }
  0x23   : > { %s202_s29 = sand.u32 1, %s5350_s21   ;;  %p4518_p9 = scmp.ge.s32.totalorder %s5370_s25, 1 }
  0x24   : > { %s4510_s30 = sshll.u32 %s202_s29, 12  ;;  %p5533_p7 = pnand %p6499_p6, %p5520_p5 }
  0x25   : > { %s5047_s10 = scalar_select %p5520_p5, [#allocation5], [#allocation14] }
  0x26   : > { %s206_s15 = scalar_lea.vmem [#allocation10], %s4510_s30  ;;  %p264_p10 = scmp.lt.s32.totalorder %s5370_s25, 43 }
  0x27   : > { %s221_s16 = sshll.u32 %s206_s15, 4  ;;  %s6555_s10 = smov (!%p6499_p6, %s5047_s10), [#allocation16]  ;;  %s5539_s16 = int_to_ptr.vmem [resolvable:$true] %s221_s16 }
  0x28   : > { %s68_s13 = ssub.s32 %s59_s12, %s67_s19  ;;  %p5553_p11 = pnand %p4518_p9, %p264_p10 }
  0x29   : > { %p69_p8 = scmp.eq.s32.totalorder %s68_s13, 0  ;;  %s4502_s19 = sadd.s32 4294967295, %s5370_s25  }
  0x2a   : > { %s5048_s27 = scalar_select %p5520_p5, %s5505_s11, 0 }
  0x2b   : > { %s5545_s26 = scalar_select %p69_p8, %s5350_s21, %s71_s14  }
  0x2c   : > { %s6557_s27 = smov (!%p6499_p6, %s5048_s27), 0  ;;  %s5558_s30 = sld [smem:[#allocation6 + %s66_s17]] }
  0x2d   : > { %6511 = sst [smem:[#allocation26_spill]] %s5545_s26  ;;  %p5560_p12 = scmp.eq.s32.totalorder %s4502_s19, 0 }
  0x2e   : > { %s214_s24 = sld [smem:[%s6555_s10 + %s6557_s27]]  ;;  %s113_s27 = sadd.s32 1, %s5338_s2 }
  0x2f   : > { %s6512_s12 = scalar_select %p5553_p11, 1, 0 }
  0x30   : > { %s6513_s18 = scalar_select %p5560_p12, 1, 0 }
  0x31   : > { %s5570_s10 = scalar_lea.sflag [#allocation11], %s202_s29  ;;  %p5220_p0 = pneg %p5533_p7 }
  0x32   : > { %s5223_s19 = scalar_lea.hbm %s6486_s5, 2490368 }
  0x34   : > { %s5043_s13 = sshll.u32 %s214_s24, 16 }
  0x35   : > { %s5567_s23 = scalar_lea.hbm %s6486_s5, %s5043_s13 }
  0x36   : > { %s5218_s26 = scalar_lea.hbm %s5567_s23, 65536  ;;  %p5224_p5 = scmp.lt.s32.totalorder %s5567_s23, %s6486_s5 }
  0x37   : > { %p5219_p13 = scmp.ne.s32.totalorder %s5567_s23, %s5218_s26  ;;  %p5225_p8 = scmp.lt.s32.totalorder %s5223_s19, %s5218_s26 }
  0x39   : > { %p5221_p1 = pnand %p5220_p0, %p5219_p13  ;;  %p5226_p9 = por %p5225_p8, %p5224_p5 }
  0x3b   : > { %p5222_p2 = pneg %p5221_p1 }
  0x3d   : > { %p5227_p10 = pnand %p5226_p9, %p5222_p2 }
  0x3f   : > { %5230 = shalt.err (!%p5227_p10)
}
  0x40   : > { %s5231_s29 = scalar_lea.vmem %s5539_s16, 65536  ;;  %s5377_s13 = smov [#allocation10]  }
  0x41   : > { %p5232_p6 = scmp.ne.s32.totalorder %s5539_s16, %s5231_s29  ;;  %s5236_s15 = sshll.u32 %s5377_s13, 4  ;;  %s5237_s15 = int_to_ptr.vmem [resolvable:$false] %s5236_s15 }
  0x42   : > { %s5238_s24 = scalar_lea.vmem %s5237_s15, 131072  ;;  %p5239_p1 = scmp.lt.s32.totalorder %s5539_s16, %s5237_s15 }
  0x43   : > { %p5234_p3 = pnand %p5232_p6, %p5220_p0  ;;  %p5240_p4 = scmp.lt.s32.totalorder %s5238_s24, %s5231_s29 }
  0x45   : > { %p5235_p13 = pneg %p5234_p3  ;;  %p5241_p11 = por %p5240_p4, %p5239_p1 }
  0x47   : > { %p5242_p12 = pnand %p5241_p11, %p5235_p13 }
  0x49   : > { %5245 = shalt.err (!%p5242_p12)
}
  0x4a   : > { %s5378_s21 = smov 512   ;;  %s5379_s26 = smov 32  }
  0x4b   : > { %5060 = dma.hbm_to_vmem [thread:$0]  (!%p5533_p7), %s5567_s23, 65536, %s5539_s16, %s5570_s10, %s5378_s21, %s5378_s21, %s5379_s26  }
  0x4c   : > { %p6514_p3 = scmp.ne.s32.totalorder %s5346_s3, %s5342_s20  ;;  %p6515_p4 = scmp.ne.s32.totalorder %s6513_s18, 0 }
  0x4d   : > { %p120_p11 = scmp.ne.s32.totalorder %s5338_s2, %s5334_s1  ;;  %p126_p12 = scmp.ne.s32.totalorder %s5334_s1, %s5330_s0 }
  0x4e   : > { %p5596_p6 = por %p6515_p4, %p6514_p3  ;;  %s231_s19 = sand.u32 1, %s5338_s2  }
  0x4f   : > { %s110_s14 = ssub.s32 %s5525_s28, %s5558_s30  ;;  %p6517_p0 = scmp.eq.s32.totalorder %s5370_s25, 0 }
  0x50   : > { %s6516_s17 = scalar_select %p5596_p6, 1, 0 }
  0x51   : > { %p122_p2 = por %p120_p11, %p6517_p0  ;;  %p111_p5 = scmp.eq.s32.totalorder %s110_s14, 0 }
  0x52   : > { %p5611_p8 = por %p126_p12, %p6515_p4  ;;  %s4514_s20 = sshll.u32 %s231_s19, 3 }
  0x53   : > { %s5618_s23 = scalar_select %p111_p5, %s5338_s2, %s113_s27  }
  0x54   : > { %s6518_s29 = scalar_select %p5611_p8, 1, 0 }
  0x55   : > { %p6519_p7 = scmp.lt.s32.totalorder %s5370_s25, 42  ;;  %s6559_s11 = smov (!%p122_p2, %s5505_s11), 0 }
  0x56   : > { %s5050_s0 = scalar_select %p122_p2, [#allocation6], [#allocation15] }
  0x57   : > { %p5622_p9 = pnand %p6519_p7, %p122_p2  ;;  %p6521_p10 = pmov %p6519_p7 }
  0x58   : > { %p6522_p13 = pmov %p6519_p7  ;;  %s235_s16 = scalar_lea.vmem [#allocation12], %s4514_s20 }
  0x59   : > { %s6561_s0 = smov (!%p6521_p10, %s5050_s0), [#allocation17]  ;;  %s251_s30 = sshll.u32 %s235_s16, 4  ;;  %s5631_s30 = int_to_ptr.vmem [resolvable:$true] %s251_s30 }
  0x5a   : > { %s6563_s11 = smov (!%p6522_p13, %s6559_s11), 0  ;;  %s232_s15 = scalar_lea.sflag [#allocation13], %s231_s19 }
  0x5b   : > { %s243_s28 = sld [smem:[%s6561_s0 + %s6563_s11]]  ;;  %p5248_p3 = pneg %p5622_p9 }
  0x5c   : > { %s5251_s11 = scalar_lea.hbm %s6487_s6, 2816 }
  0x61   : > { %s5044_s18 = sshll.u32 %s243_s28, 7 }
  0x62   : > { %s249_s13 = scalar_lea.hbm %s6487_s6, %s5044_s18 }
  0x63   : > { %s5246_s24 = scalar_lea.hbm %s249_s13, 128  ;;  %p5252_p12 = scmp.lt.s32.totalorder %s249_s13, %s6487_s6 }
  0x64   : > { %p5247_p1 = scmp.ne.s32.totalorder %s249_s13, %s5246_s24  ;;  %p5253_p0 = scmp.lt.s32.totalorder %s5251_s11, %s5246_s24 }
  0x66   : > { %p5249_p4 = pnand %p5248_p3, %p5247_p1  ;;  %p5254_p2 = por %p5253_p0, %p5252_p12 }
  0x68   : > { %p5250_p11 = pneg %p5249_p4 }
  0x6a   : > { %p5255_p5 = pnand %p5254_p2, %p5250_p11 }
  0x6c   : > { %5258 = shalt.err (!%p5255_p5)
}
  0x6d   : > { %s5259_s19 = scalar_lea.vmem %s5631_s30, 128  ;;  %s5380_s0 = smov [#allocation12]  }
  0x6e   : > { %p5260_p7 = scmp.ne.s32.totalorder %s5631_s30, %s5259_s19  ;;  %s5264_s28 = sshll.u32 %s5380_s0, 4  ;;  %s5265_s28 = int_to_ptr.vmem [resolvable:$false] %s5264_s28 }
  0x6f   : > { %s5266_s16 = scalar_lea.vmem %s5265_s28, 256  ;;  %p5267_p1 = scmp.lt.s32.totalorder %s5631_s30, %s5265_s28 }
  0x70   : > { %p5262_p10 = pnand %p5260_p7, %p5248_p3  ;;  %p5268_p4 = scmp.lt.s32.totalorder %s5266_s16, %s5259_s19 }
  0x72   : > { %p5263_p13 = pneg %p5262_p10  ;;  %p5269_p8 = por %p5268_p4, %p5267_p1 }
  0x74   : > { %p5270_p6 = pnand %p5269_p8, %p5263_p13 }
  0x76   : > { %5273 = shalt.err (!%p5270_p6)
}
  0x77   : > { %5065 = dma.hbm_to_vmem [thread:$0]  (!%p5622_p9), %s249_s13, 128, %s5631_s30, %s232_s15  }
  0x78   : > { %p6523_p11 = scmp.ne.s32.totalorder %s6512_s12, 0 }
  0x79   : > { %s270_s18 = sand.u32 (!%p6523_p11), 1, %s5346_s3   ;;  %p6524_p3 = scmp.ne.s32.totalorder (!%p6523_p11), %s6516_s17, 0 }
  0x7a   : > { %268 = sbr.rel (%p6523_p11) target bundleno = 978 (0x3d2), region = 32  ;;  %s4519_s27 = sshll.u32 (!%p6523_p11), %s270_s18, 12 }
  0x7b   : > { %s271_s10 = scalar_lea.sflag (!%p6523_p11), [#allocation11], %s270_s18  ;;  %s5653_s24 = scalar_lea.vmem (!%p6523_p11), [#allocation10], %s4519_s27 }
  0x7f   : > { %5321 = dma.done.wait (%p6524_p3), %s271_s10, 65536  }
  0x80   : > { %5323 = vsyncadd (%p6524_p3), %s271_s10, 4294901760  ;;  %s279_s9 = sand.u32 1, %s5334_s1   ;;  %p6525_p6 = scmp.ne.s32.totalorder %s6518_s29, 0 }
  0x81   : > { %s5660_s21 = sshll.u32 %s279_s9, 3  ;;  %s280_s12 = scalar_lea.sflag [#allocation13], %s279_s9 }
  0x82   : > { %s283_s30 = scalar_lea.vmem [#allocation12], %s5660_s21 }
  0x83   : > { %5325 = dma.done.wait (%p6525_p6), %s280_s12, 128  }
  0x84   : > { %5327 = vsyncadd (%p6525_p6), %s280_s12, 4294967168  ;;  %p332_p8 = scmp.lt.s32.totalorder %s5358_s22, 1  ;;  %p4525_p9 = scmp.ne.s32.totalorder %s5354_s4, 0 }
  0x86   : > { %s333_s13 = scalar_select %p332_p8, %s5358_s22, 1 }
  0x87   : > { %345 = sbr.rel (%p4525_p9) target bundleno = 145 (0x91), region = 44 }
  0x88   : > { %s5045_s15 = sshll.u32 %s333_s13, 6 }
  0x89   : > { %s336_s11 = scalar_lea.vmem %s6488_s7, %s5045_s15  ;;  %s5675_s19 = scalar_lea.vmem %s6489_s8, %s5045_s15 }
  0x8c   : > { %v346_v0 = vld [vmem:[%s336_s11] sm:$0xff]  ;;  %v347_v1 = vld [vmem:[%s336_s11 + $0x8] sm:$0xff]  ;;  %v348_v2 = vld [vmem:[%s336_s11 + $0x10] sm:$0xff] }
  0x8d   : > { %354 = vst [vmem:[#allocation2 + $0xb0] sm:$0xff] %v346_v0  ;;  %355 = vst [vmem:[#allocation2] sm:$0xff] %v347_v1  ;;  %v349_v3 = vld [vmem:[%s336_s11 + $0x18] sm:$0xff]  ;;  %v350_v4 = vld [vmem:[%s336_s11 + $0x20] sm:$0xff] }
  0x8e   : > { %356 = vst [vmem:[#allocation2 + $0xd8] sm:$0xff] %v348_v2  ;;  %v351_v5 = vld [vmem:[%s336_s11 + $0x28] sm:$0xff]  ;;  %357 = vst [vmem:[#allocation2 + $0x18] sm:$0xff] %v349_v3  ;;  %v352_v6 = vld [vmem:[%s336_s11 + $0x30] sm:$0xff] }
  0x8f   : > { %358 = vst [vmem:[#allocation2 + $0x50] sm:$0xff] %v350_v4  ;;  %359 = vst [vmem:[#allocation2 + $0x68] sm:$0xff] %v351_v5  ;;  %v353_v7 = vld [vmem:[%s336_s11 + $0x38] sm:$0xff] }
  0x90   : > { %360 = vst [vmem:[#allocation2 + $0x30] sm:$0xff] %v352_v6  ;;  %361 = vst [vmem:[#allocation2 + $0x48] sm:$0xff] %v353_v7 }
  0x91 PF: > { %v512_v8 = vld [vmem:[%s5653_s24 + $0x1c0] sm:$0xff]  ;;  %s362_s29 = sshra.s32 %s5354_s4, 7  ;;  %s367_s0 = sand.u32 127, %s5354_s4  ;;  %v388_v5 = vld [vmem:[#allocation2 + $0x88] sm:$0xff] }
  0x92   : > { %v516_v9 = vld [vmem:[%s5653_s24 + $0x1e0] sm:$0xff]  ;;  %s364_s28 = sadd.s32 %s5358_s22, %s362_s29 }
  0x93   : > { %v640_v10 = vld [vmem:[%s5653_s24 + $0x5c0] sm:$0xff]  ;;  %v4584_v11 = vcombine.high %v512_v8, %v516_v9  ;;  %v4583_v13 = vcombine.low %v512_v8, %v516_v9  ;;  %s4526_s16 = sshll.u32 %s364_s28, 7 }
  0x94   : > { %v644_v12 = vld [vmem:[%s5653_s24 + $0x5e0] sm:$0xff]  ;;  %s5693_s4 = sadd.s32 %s4526_s16, %s367_s0 }
  0x95   : > { %v504_v14 = vld [vmem:[%s5653_s24 + $0x180] sm:$0xff]  ;;  %v4712_v16 = vcombine.high %v640_v10, %v644_v12  ;;  %v4711_v17 = vcombine.low %v640_v10, %v644_v12  ;;  %3528 = vmatprep.subr.bf16.mxu0 %v4584_v11  ;;  %s5696_s22 = sld [smem:[#allocation9 + %s5693_s4]]  ;;  %v409_v10 = vld [vmem:[#allocation2 + $0x58] sm:$0xff]  ;;  %v430_v11 = vld [vmem:[#allocation2 + $0xd0] sm:$0xff] }
  0x96   : > { %v508_v15 = vld [vmem:[%s5653_s24 + $0x1a0] sm:$0xff]  ;;  %3529 = vmatpush1.bf16.msra.mxu0 %v4583_v13  ;;  %s5699_s18 = sld [smem:[#allocation7 + %s5693_s4]]  ;;  %v380_v13 = vld [vmem:[#allocation2 + $0x18] sm:$0xff] }
  0x97   : > { %v4576_v18 = vcombine.high %v504_v14, %v508_v15  ;;  %v632_v19 = vld [vmem:[%s5653_s24 + $0x580] sm:$0xff]  ;;  %3569 = vmatprep.subr.bf16.mxu1 %v4712_v16  ;;  %v4575_v26 = vcombine.low %v504_v14, %v508_v15  ;;  %v390_v15 = vld [vmem:[#allocation2 + $0xb8] sm:$0xff]  ;;  %v411_v16 = vld [vmem:[#allocation2 + $0xc8] sm:$0xff] }
  0x98   : > { %v636_v20 = vld [vmem:[%s5653_s24 + $0x5a0] sm:$0xff]  ;;  %3570 = vmatpush1.bf16.msra.mxu1 %v4711_v17  ;;  %v432_v17 = vld [vmem:[#allocation2 + $0x28] sm:$0xff] }
  0x99   : > { %v496_v21 = vld [vmem:[%s5653_s24 + $0x140] sm:$0xff]  ;;  %v4704_v22 = vcombine.high %v632_v19, %v636_v20  ;;  %3530 = vmatprep.subr.bf16.mxu0 %v4576_v18  ;;  %v4703_v27 = vcombine.low %v632_v19, %v636_v20 }
  0x9a   : > { %v500_v23 = vld [vmem:[%s5653_s24 + $0x160] sm:$0xff]  ;;  %3531 = vmatpush1.bf16.msra.mxu0 %v4575_v26 }
  0x9b   : > { %v624_v24 = vld [vmem:[%s5653_s24 + $0x540] sm:$0xff]  ;;  %v4568_v28 = vcombine.high %v496_v21, %v500_v23  ;;  %3571 = vmatprep.subr.bf16.mxu1 %v4704_v22  ;;  %v4567_v34 = vcombine.low %v496_v21, %v500_v23  ;;  %s370_s27 = sand.u32 1, %s5696_s22  ;;  %s372_s10 = sand.u32 2, %s5696_s22 }
  0x9c   : > { %v628_v25 = vld [vmem:[%s5653_s24 + $0x560] sm:$0xff]  ;;  %3572 = vmatpush1.bf16.msra.mxu1 %v4703_v27  ;;  %p5711_p12 = scmp.ne.s32.totalorder %s372_s10, 0  ;;  %s374_s12 = sand.u32 4, %s5696_s22 }
  0x9d   : > { %v4696_v29 = vcombine.high %v624_v24, %v628_v25  ;;  %v488_v30 = vld [vmem:[%s5653_s24 + $0x100] sm:$0xff]  ;;  %3532 = vmatprep.subr.bf16.mxu0 %v4568_v28  ;;  %v4695_v35 = vcombine.low %v624_v24, %v628_v25  ;;  %p5718_p0 = scmp.ne.s32.totalorder %s374_s12, 0  ;;  %p385_p2 = scmp.eq.s32.totalorder %s5699_s18, 1 }
  0x9e   : > { %v492_v31 = vld [vmem:[%s5653_s24 + $0x120] sm:$0xff]  ;;  %3533 = vmatpush1.bf16.msra.mxu0 %v4567_v34  ;;  %p406_p5 = scmp.eq.s32.totalorder %s5699_s18, 2  ;;  %p427_p7 = scmp.eq.s32.totalorder %s5699_s18, 3 }
  0x9f   : > { %v616_v32 = vld [vmem:[%s5653_s24 + $0x500] sm:$0xff]  ;;  %v4560_v36 = vcombine.high %v488_v30, %v492_v31  ;;  %3573 = vmatprep.subr.bf16.mxu1 %v4696_v29  ;;  %v4559_v42 = vcombine.low %v488_v30, %v492_v31  ;;  %s395_s15 = scalar_select %p385_p2, 1, 0 }
  0xa0   : > { %v620_v33 = vld [vmem:[%s5653_s24 + $0x520] sm:$0xff]  ;;  %3574 = vmatpush1.bf16.msra.mxu1 %v4695_v35  ;;  %s416_s17 = scalar_select %p406_p5, 1, 0 }
  0xa1   : > { %v4688_v37 = vcombine.high %v616_v32, %v620_v33  ;;  %v480_v38 = vld [vmem:[%s5653_s24 + $0xc0] sm:$0xff]  ;;  %3534 = vmatprep.subr.bf16.mxu0 %v4560_v36  ;;  %v4687_v43 = vcombine.low %v616_v32, %v620_v33  ;;  %v396_v53 = vstv %s395_s15  ;;  %s437_s26 = scalar_select %p427_p7, 1, 0 }
  0xa2   : > { %v484_v39 = vld [vmem:[%s5653_s24 + $0xe0] sm:$0xff]  ;;  %3535 = vmatpush1.bf16.msra.mxu0 %v4559_v42  ;;  %vm5735_vm0 = vcmp.eq.s32.totalorder %v396_v53, 1  ;;  %v417_v60 = vstv %s416_s17  ;;  %p5039_p10 = scmp.eq.s32.totalorder %s370_s27, 0 }
  0xa3   : > { %v608_v40 = vld [vmem:[%s5653_s24 + $0x4c0] sm:$0xff]  ;;  %v4552_v44 = vcombine.high %v480_v38, %v484_v39  ;;  %3575 = vmatprep.subr.bf16.mxu1 %v4688_v37  ;;  %v4551_v50 = vcombine.low %v480_v38, %v484_v39  ;;  %vm5743_vm1 = vcmp.eq.s32.totalorder %v417_v60, 1  ;;  %v438_v7 = vstv %s437_s26 }
  0xa4   : > { %v612_v41 = vld [vmem:[%s5653_s24 + $0x4e0] sm:$0xff]  ;;  %3576 = vmatpush1.bf16.msra.mxu1 %v4687_v43  ;;  %vm5749_vm2 = vcmp.eq.s32.totalorder %v438_v7, 1  ;;  %v401_v21 = vsel %vm5735_vm0, %v390_v15, %v380_v13 }
  0xa5   : > { %v4680_v45 = vcombine.high %v608_v40, %v612_v41  ;;  %v472_v46 = vld [vmem:[%s5653_s24 + $0x80] sm:$0xff]  ;;  %3536 = vmatprep.subr.bf16.mxu0 %v4552_v44  ;;  %v4679_v51 = vcombine.low %v608_v40, %v612_v41  ;;  %v422_v24 = vsel %vm5743_vm1, %v411_v16, %v401_v21  ;;  %v379_v21 = vld [vmem:[#allocation2 + $0xd8] sm:$0xff] }
  0xa6   : > { %v476_v47 = vld [vmem:[%s5653_s24 + $0xa0] sm:$0xff]  ;;  %3537 = vmatpush1.bf16.msra.mxu0 %v4551_v50  ;;  %v443_v28 = vsel %vm5749_vm2, %v432_v17, %v422_v24  ;;  %v381_v24 = vld [vmem:[#allocation2 + $0x50] sm:$0xff] }
  0xa7   : > { %v600_v48 = vld [vmem:[%s5653_s24 + $0x480] sm:$0xff]  ;;  %v4544_v52 = vcombine.high %v472_v46, %v476_v47  ;;  %3577 = vmatprep.subr.bf16.mxu1 %v4680_v45  ;;  %v4543_v61 = vcombine.low %v472_v46, %v476_v47  ;;  %v5770_v31 = vpack.c.bf16 %v443_v28, %v443_v28 }
  0xa8   : > { %v604_v49 = vld [vmem:[%s5653_s24 + $0x4a0] sm:$0xff]  ;;  %3578 = vmatpush1.bf16.msra.mxu1 %v4679_v51 }
  0xa9   : > { %v4672_v54 = vcombine.high %v600_v48, %v604_v49  ;;  %v464_v55 = vld [vmem:[%s5653_s24 + $0x40] sm:$0xff]  ;;  %3538 = vmatprep.subr.bf16.mxu0 %v4544_v52  ;;  %v4671_v0 = vcombine.low %v600_v48, %v604_v49  ;;  %3601 = vmatprep.mubr.bf16.mxu1 %v5770_v31 }
  0xaa   : > { %v468_v56 = vld [vmem:[%s5653_s24 + $0x60] sm:$0xff]  ;;  %3539 = vmatpush1.bf16.msra.mxu0 %v4543_v61 }
  0xab   : > { %v592_v57 = vld [vmem:[%s5653_s24 + $0x440] sm:$0xff]  ;;  %v4536_v1 = vcombine.high %v464_v55, %v468_v56  ;;  %3579 = vmatprep.subr.bf16.mxu1 %v4672_v54  ;;  %v4535_v18 = vcombine.low %v464_v55, %v468_v56 }
  0xac   : > { %v596_v58 = vld [vmem:[%s5653_s24 + $0x460] sm:$0xff]  ;;  %3580 = vmatpush1.bf16.msra.mxu1 %v4671_v0 }
  0xad   : > { %v456_v62 = vld [vmem:[%s5653_s24] sm:$0xff]  ;;  %v4664_v8 = vcombine.high %v592_v57, %v596_v58  ;;  %v4663_v19 = vcombine.low %v592_v57, %v596_v58  ;;  %3540 = vmatprep.subr.bf16.mxu0 %v4536_v1 }
  0xae   : > { %v460_v63 = vld [vmem:[%s5653_s24 + $0x20] sm:$0xff]  ;;  %3541 = vmatpush1.bf16.msra.mxu0 %v4535_v18  ;;  %v377_v18 = vld [vmem:[#allocation2 + $0xb0] sm:$0xff] }
  0xaf   : > { %v584_v2 = vld [vmem:[%s5653_s24 + $0x400] sm:$0xff]  ;;  %v4528_v22 = vcombine.high %v456_v62, %v460_v63  ;;  %3581 = vmatprep.subr.bf16.mxu1 %v4664_v8  ;;  %v4527_v32 = vcombine.low %v456_v62, %v460_v63 }
  0xb0   : > { %v588_v3 = vld [vmem:[%s5653_s24 + $0x420] sm:$0xff]  ;;  %3582 = vmatpush1.bf16.msra.mxu1 %v4663_v19 }
  0xb1   : > { %v378_v4 = vld [vmem:[#allocation2] sm:$0xff]  ;;  %v4656_v25 = vcombine.high %v584_v2, %v588_v3  ;;  %3542 = vmatprep.subr.bf16.mxu0 %v4528_v22  ;;  %v4655_v33 = vcombine.low %v584_v2, %v588_v3  ;;  %v389_v22 = vld [vmem:[#allocation2 + $0xe8] sm:$0xff] }
  0xb2   : > { %v399_v9 = vsel %vm5735_vm0, %v388_v5, %v378_v4  ;;  %v576_v26 = vld [vmem:[%s5653_s24 + $0x3c0] sm:$0xff]  ;;  %3543 = vmatpush1.bf16.msra.mxu0 %v4527_v32 }
  0xb3   : > { %v420_v14 = vsel %vm5743_vm1, %v409_v10, %v399_v9  ;;  %v580_v27 = vld [vmem:[%s5653_s24 + $0x3e0] sm:$0xff]  ;;  %3583 = vmatprep.subr.bf16.mxu1 %v4656_v25 }
  0xb4   : > { %v441_v20 = vsel %vm5749_vm2, %v430_v11, %v420_v14  ;;  %v704_v29 = vld [vmem:[%s5653_s24 + $0x7c0] sm:$0xff]  ;;  %v4648_v34 = vcombine.high %v576_v26, %v580_v27  ;;  %v4647_v40 = vcombine.low %v576_v26, %v580_v27  ;;  %3584 = vmatpush1.bf16.msra.mxu1 %v4655_v33 }
  0xb5   : > { %v5759_v23 = vpack.c.bf16 %v441_v20, %v441_v20  ;;  %v708_v30 = vld [vmem:[%s5653_s24 + $0x7e0] sm:$0xff] }
  0xb6   : > { %v4776_v35 = vcombine.high %v704_v29, %v708_v30  ;;  %v568_v36 = vld [vmem:[%s5653_s24 + $0x380] sm:$0xff]  ;;  %3544 = vmatprep.subr.bf16.mxu0 %v4648_v34  ;;  %v4775_v41 = vcombine.low %v704_v29, %v708_v30  ;;  %v383_v34 = vld [vmem:[#allocation2 + $0x30] sm:$0xff] }
  0xb7   : > { %3560 = vmatprep.mubr.bf16.mxu0 %v5759_v23  ;;  %v572_v37 = vld [vmem:[%s5653_s24 + $0x3a0] sm:$0xff]  ;;  %3545 = vmatpush2.bf16.msra.mxu0 %v4647_v40 }
  0xb8   : > { %v696_v38 = vld [vmem:[%s5653_s24 + $0x780] sm:$0xff]  ;;  %v4640_v42 = vcombine.high %v568_v36, %v572_v37  ;;  %3585 = vmatprep.subr.bf16.mxu1 %v4776_v35  ;;  %v4639_v48 = vcombine.low %v568_v36, %v572_v37  ;;  %v393_v35 = vld [vmem:[#allocation2 + $0x8] sm:$0xff]  ;;  %v414_v36 = vld [vmem:[#allocation2 + $0x70] sm:$0xff] }
  0xb9   : > { %v700_v39 = vld [vmem:[%s5653_s24 + $0x7a0] sm:$0xff]  ;;  %3586 = vmatpush2.bf16.msra.mxu1 %v4775_v41  ;;  %v404_v41 = vsel %vm5735_vm0, %v393_v35, %v383_v34 }
  0xba   : > { %v4768_v43 = vcombine.high %v696_v38, %v700_v39  ;;  %v560_v44 = vld [vmem:[%s5653_s24 + $0x340] sm:$0xff]  ;;  %3546 = vmatprep.subr.bf16.mxu0 %v4640_v42  ;;  %v4767_v49 = vcombine.low %v696_v38, %v700_v39 }
  0xbb   : > { %v564_v45 = vld [vmem:[%s5653_s24 + $0x360] sm:$0xff]  ;;  %3547 = vmatpush2.bf16.msra.mxu0 %v4639_v48 }
  0xbc   : > { %v688_v46 = vld [vmem:[%s5653_s24 + $0x740] sm:$0xff]  ;;  %v4632_v50 = vcombine.high %v560_v44, %v564_v45  ;;  %3587 = vmatprep.subr.bf16.mxu1 %v4768_v43  ;;  %v4631_v56 = vcombine.low %v560_v44, %v564_v45  ;;  %v408_v45 = vld [vmem:[#allocation2 + $0x38] sm:$0xff] }
  0xbd   : > { %v692_v47 = vld [vmem:[%s5653_s24 + $0x760] sm:$0xff]  ;;  %3588 = vmatpush2.bf16.msra.mxu1 %v4767_v49  ;;  %v425_v49 = vsel %vm5743_vm1, %v414_v36, %v404_v41 }
  0xbe   : > { %v4760_v51 = vcombine.high %v688_v46, %v692_v47  ;;  %v552_v52 = vld [vmem:[%s5653_s24 + $0x300] sm:$0xff]  ;;  %3548 = vmatprep.subr.bf16.mxu0 %v4632_v50  ;;  %v4759_v57 = vcombine.low %v688_v46, %v692_v47  ;;  %v382_v46 = vld [vmem:[#allocation2 + $0x68] sm:$0xff]  ;;  %v392_v47 = vld [vmem:[#allocation2 + $0xf0] sm:$0xff]  ;;  %v400_v50 = vsel %vm5735_vm0, %v389_v22, %v379_v21 }
  0xbf   : > { %v556_v53 = vld [vmem:[%s5653_s24 + $0x320] sm:$0xff]  ;;  %3549 = vmatpush2.bf16.msra.mxu0 %v4631_v56 }
  0xc0   : > { %v680_v54 = vld [vmem:[%s5653_s24 + $0x700] sm:$0xff]  ;;  %v4624_v58 = vcombine.high %v552_v52, %v556_v53  ;;  %3589 = vmatprep.subr.bf16.mxu1 %v4760_v51  ;;  %v4623_v1 = vcombine.low %v552_v52, %v556_v53  ;;  %v384_v52 = vld [vmem:[#allocation2 + $0x48] sm:$0xff]  ;;  %v394_v53 = vld [vmem:[#allocation2 + $0x78] sm:$0xff] }
  0xc1   : > { %v684_v55 = vld [vmem:[%s5653_s24 + $0x720] sm:$0xff]  ;;  %3590 = vmatpush2.bf16.msra.mxu1 %v4759_v57 }
  0xc2   : > { %v4752_v60 = vcombine.high %v680_v54, %v684_v55  ;;  %v544_v61 = vld [vmem:[%s5653_s24 + $0x2c0] sm:$0xff]  ;;  %3550 = vmatprep.subr.bf16.mxu0 %v4624_v58  ;;  %v4751_v2 = vcombine.low %v680_v54, %v684_v55 }
  0xc3   : > { %v548_v62 = vld [vmem:[%s5653_s24 + $0x2e0] sm:$0xff]  ;;  %3551 = vmatpush2.bf16.msra.mxu0 %v4623_v1 }
  0xc4   : > { %v672_v63 = vld [vmem:[%s5653_s24 + $0x6c0] sm:$0xff]  ;;  %v4616_v3 = vcombine.high %v544_v61, %v548_v62  ;;  %3591 = vmatprep.subr.bf16.mxu1 %v4752_v60  ;;  %v4615_v10 = vcombine.low %v544_v61, %v548_v62  ;;  %v429_v60 = vld [vmem:[#allocation2 + $0xa8] sm:$0xff]  ;;  %v431_v61 = vld [vmem:[#allocation2 + $0x10] sm:$0xff]  ;;  %v403_v62 = vsel %vm5735_vm0, %v392_v47, %v382_v46 }
  0xc5   : > { %v676_v0 = vld [vmem:[%s5653_s24 + $0x6e0] sm:$0xff]  ;;  %3592 = vmatpush2.bf16.msra.mxu1 %v4751_v2 }
  0xc6   : > { %v4744_v4 = vcombine.high %v672_v63, %v676_v0  ;;  %v536_v5 = vld [vmem:[%s5653_s24 + $0x280] sm:$0xff]  ;;  %3552 = vmatprep.subr.bf16.mxu0 %v4616_v3  ;;  %v4743_v14 = vcombine.low %v672_v63, %v676_v0  ;;  %v413_v63 = vld [vmem:[#allocation2 + $0x90] sm:$0xff] }
  0xc7   : > { %v540_v7 = vld [vmem:[%s5653_s24 + $0x2a0] sm:$0xff]  ;;  %3553 = vmatpush2.bf16.msra.mxu0 %v4615_v10  ;;  %v424_v59 = vsel %vm5743_vm1, %v413_v63, %v403_v62 }
  0xc8   : > { %v664_v8 = vld [vmem:[%s5653_s24 + $0x680] sm:$0xff]  ;;  %v4608_v15 = vcombine.high %v536_v5, %v540_v7  ;;  %3593 = vmatprep.subr.bf16.mxu1 %v4744_v4  ;;  %v4607_v28 = vcombine.low %v536_v5, %v540_v7  ;;  %v405_v4 = vsel %vm5735_vm0, %v394_v53, %v384_v52 }
  0xc9   : > { %v668_v9 = vld [vmem:[%s5653_s24 + $0x6a0] sm:$0xff]  ;;  %3594 = vmatpush2.bf16.msra.mxu1 %v4743_v14 }
  0xca   : > { %v5794_v11 = vld [vmem:[%s5653_s24 + $0x240] sm:$0xff]  ;;  %v4736_v20 = vcombine.high %v664_v8, %v668_v9  ;;  %v4735_v29 = vcombine.low %v664_v8, %v668_v9  ;;  %3554 = vmatprep.subr.bf16.mxu0 %v4608_v15 }
  0xcb   : > { %v5797_v13 = vld [vmem:[%s5653_s24 + $0x260] sm:$0xff]  ;;  %3555 = vmatpush2.bf16.msra.mxu0 %v4607_v28 }
  0xcc   : > { %v5800_v16 = vld [vmem:[%s5653_s24 + $0x640] sm:$0xff]  ;;  %v4600_v37 = vcombine.high %v5794_v11, %v5797_v13  ;;  %3595 = vmatprep.subr.bf16.mxu1 %v4736_v20  ;;  %v4599_v55 = vcombine.low %v5794_v11, %v5797_v13  ;;  %v434_v13 = vld [vmem:[#allocation2 + $0xf8] sm:$0xff] }
  0xcd   : > { %v5803_v17 = vld [vmem:[%s5653_s24 + $0x660] sm:$0xff]  ;;  %3596 = vmatpush2.bf16.msra.mxu1 %v4735_v29 }
  0xce   : > { %v387_v19 = vld [vmem:[#allocation2 + $0x80] sm:$0xff]  ;;  %v4728_v43 = vcombine.high %v5800_v16, %v5803_v17  ;;  %v4727_v56 = vcombine.low %v5800_v16, %v5803_v17  ;;  %3556 = vmatprep.subr.bf16.mxu0 %v4600_v37  ;;  %v436_v17 = vld [vmem:[#allocation2 + $0x98] sm:$0xff] }
  0xcf   : > { %v391_v25 = vld [vmem:[#allocation2 + $0x60] sm:$0xff]  ;;  %v398_v44 = vsel %vm5735_vm0, %v387_v19, %v377_v18  ;;  %3557 = vmatpush2.bf16.msra.mxu0 %v4599_v55 }
  0xd0   : > { %v412_v26 = vld [vmem:[#allocation2 + $0xe0] sm:$0xff]  ;;  %v402_v33 = vsel %vm5735_vm0, %v391_v25, %v381_v24  ;;  %v419_v58 = vsel %vm5743_vm1, %v408_v45, %v398_v44  ;;  %3597 = vmatprep.subr.bf16.mxu1 %v4728_v43  ;;  %v445_v25 = vsel %vm5749_vm2, %v434_v13, %v424_v59 }
  0xd1   : > { %v433_v27 = vld [vmem:[#allocation2 + $0xa0] sm:$0xff]  ;;  %v423_v40 = vsel %vm5743_vm1, %v412_v26, %v402_v33  ;;  %v440_v11 = vsel %vm5749_vm2, %v429_v60, %v419_v58  ;;  %3598 = vmatpush2.bf16.msra.mxu1 %v4727_v56  ;;  %v5883_v34 = vpack.c.bf16 %v445_v25, %v445_v25 }
  0xd2   : > { %v5806_v30 = vld [vmem:[%s5653_s24 + $0x200] sm:$0xff]  ;;  %v5829_v48 = vsel %vm5749_vm2, %v433_v27, %v423_v40  ;;  %v5871_v21 = vpack.c.bf16 %v440_v11, %v440_v11 }
  0xd3   : > { %v5809_v32 = vld [vmem:[%s5653_s24 + $0x220] sm:$0xff] }
  0xd4   : > { %v5816_v38 = vld [vmem:[%s5653_s24 + $0x600] sm:$0xff]  ;;  %v4592_v57 = vcombine.high %v5806_v30, %v5809_v32  ;;  %v4591_v9 = vcombine.low %v5806_v30, %v5809_v32 }
  0xd5   : > { %v652_v39 = vld [vmem:[%s5653_s24 + $0x620] sm:$0xff] }
  0xd6   : > { %v435_v42 = vld [vmem:[#allocation2 + $0x20] sm:$0xff]  ;;  %v4720_v0 = vcombine.high %v5816_v38, %v652_v39  ;;  %v4719_v10 = vcombine.low %v5816_v38, %v652_v39  ;;  %3558 = vmatprep.subr.bf16.mxu0 %v4592_v57 }
  0xd7   : > { %v410_v51 = vld [vmem:[#allocation2 + $0x40] sm:$0xff]  ;;  %v5837_v54 = vsel %vm5749_vm2, %v435_v42, %v425_v49  ;;  %3559 = vmatpush2.bf16.msra.mxu0 %v4591_v9 }
  0xd8   : > { %v421_v1 = vsel %vm5743_vm1, %v410_v51, %v400_v50  ;;  %v768_v2 = vld [vmem:[%s5653_s24 + $0x9c0] sm:$0xff]  ;;  %3599 = vmatprep.subr.bf16.mxu1 %v4720_v0 }
  0xd9   : > { %v772_v3 = vld [vmem:[%s5653_s24 + $0x9e0] sm:$0xff]  ;;  %v442_v14 = vsel %vm5749_vm2, %v431_v61, %v421_v1  ;;  %3600 = vmatpush2.bf16.msra.mxu1 %v4719_v10 }
  0xda   : > { %v415_v5 = vld [vmem:[#allocation2 + $0xc0] sm:$0xff]  ;;  %v4840_v15 = vcombine.high %v768_v2, %v772_v3  ;;  %v5877_v26 = vpack.c.bf16 %v442_v14, %v442_v14  ;;  %v4839_v6 = vcombine.low %v768_v2, %v772_v3  ;;  %3561 = vmatmul.mubr.bf16.vlgmr.msra.gmra.mxu0 %v5871_v21 }
  0xdb   : > { %v896_v7 = vld [vmem:[%s5653_s24 + $0xdc0] sm:$0xff]  ;;  %v426_v16 = vsel %vm5743_vm1, %v415_v5, %v405_v4  ;;  %3642 = vmatprep.mubr.bf16.mxu0 %v5883_v34 }
  0xdc   : > { %v900_v8 = vld [vmem:[%s5653_s24 + $0xde0] sm:$0xff]  ;;  %v447_v27 = vsel %vm5749_vm2, %v436_v17, %v426_v16  ;;  %3610 = vmatprep.subr.bf16.mxu0 %v4840_v15  ;;  %3602 = vmatmul.mubr.bf16.vlgmr.msra.gmra.mxu1 %v5877_v26 }
  0xdd   : > { %v4968_v18 = vcombine.high %v896_v7, %v900_v8  ;;  %v760_v19 = vld [vmem:[%s5653_s24 + $0x980] sm:$0xff]  ;;  %v4967_v28 = vcombine.low %v896_v7, %v900_v8  ;;  %v5888_v12 = vpack.c.bf16 %v447_v27, %v447_v27  ;;  %3611 = vmatpush1.bf16.msra.mxu0 %v4839_v6 }
  0xde   : > { %v764_v20 = vld [vmem:[%s5653_s24 + $0x9a0] sm:$0xff] }
  0xdf   : > { %v888_v22 = vld [vmem:[%s5653_s24 + $0xd80] sm:$0xff]  ;;  %v4832_v29 = vcombine.high %v760_v19, %v764_v20  ;;  %3651 = vmatprep.subr.bf16.mxu1 %v4968_v18  ;;  %v4831_v37 = vcombine.low %v760_v19, %v764_v20  ;;  %3683 = vmatprep.mubr.bf16.mxu1 %v5888_v12 }
  0xe0   : > { %v892_v24 = vld [vmem:[%s5653_s24 + $0xda0] sm:$0xff]  ;;  %3652 = vmatpush1.bf16.msra.mxu1 %v4967_v28 }
  0xe1   : > { %v4960_v30 = vcombine.high %v888_v22, %v892_v24  ;;  %v752_v32 = vld [vmem:[%s5653_s24 + $0x940] sm:$0xff]  ;;  %3612 = vmatprep.subr.bf16.mxu0 %v4832_v29  ;;  %v4959_v38 = vcombine.low %v888_v22, %v892_v24 }
  0xe2   : > { %v756_v33 = vld [vmem:[%s5653_s24 + $0x960] sm:$0xff]  ;;  %3613 = vmatpush1.bf16.msra.mxu0 %v4831_v37 }
  0xe3   : > { %v880_v35 = vld [vmem:[%s5653_s24 + $0xd40] sm:$0xff]  ;;  %v4824_v39 = vcombine.high %v752_v32, %v756_v33  ;;  %3653 = vmatprep.subr.bf16.mxu1 %v4960_v30  ;;  %v4823_v45 = vcombine.low %v752_v32, %v756_v33 }
  0xe4   : > { %v884_v36 = vld [vmem:[%s5653_s24 + $0xd60] sm:$0xff]  ;;  %3654 = vmatpush1.bf16.msra.mxu1 %v4959_v38 }
  0xe5   : > { %v4952_v40 = vcombine.high %v880_v35, %v884_v36  ;;  %v744_v41 = vld [vmem:[%s5653_s24 + $0x900] sm:$0xff]  ;;  %3614 = vmatprep.subr.bf16.mxu0 %v4824_v39  ;;  %v4951_v46 = vcombine.low %v880_v35, %v884_v36 }
  0xe6   : > { %v748_v42 = vld [vmem:[%s5653_s24 + $0x920] sm:$0xff]  ;;  %3615 = vmatpush1.bf16.msra.mxu0 %v4823_v45 }
  0xe7   : > { %v872_v43 = vld [vmem:[%s5653_s24 + $0xd00] sm:$0xff]  ;;  %v4816_v47 = vcombine.high %v744_v41, %v748_v42  ;;  %3655 = vmatprep.subr.bf16.mxu1 %v4952_v40  ;;  %v4815_v55 = vcombine.low %v744_v41, %v748_v42 }
  0xe8   : > { %v876_v44 = vld [vmem:[%s5653_s24 + $0xd20] sm:$0xff]  ;;  %3656 = vmatpush1.bf16.msra.mxu1 %v4951_v46 }
  0xe9   : > { %v4944_v49 = vcombine.high %v872_v43, %v876_v44  ;;  %v736_v50 = vld [vmem:[%s5653_s24 + $0x8c0] sm:$0xff]  ;;  %3616 = vmatprep.subr.bf16.mxu0 %v4816_v47  ;;  %v4943_v56 = vcombine.low %v872_v43, %v876_v44 }
  0xea   : > { %v740_v51 = vld [vmem:[%s5653_s24 + $0x8e0] sm:$0xff]  ;;  %3617 = vmatpush1.bf16.msra.mxu0 %v4815_v55 }
  0xeb   : > { %v864_v52 = vld [vmem:[%s5653_s24 + $0xcc0] sm:$0xff]  ;;  %v4808_v57 = vcombine.high %v736_v50, %v740_v51  ;;  %3657 = vmatprep.subr.bf16.mxu1 %v4944_v49  ;;  %v4807_v0 = vcombine.low %v736_v50, %v740_v51 }
  0xec   : > { %v868_v53 = vld [vmem:[%s5653_s24 + $0xce0] sm:$0xff]  ;;  %3658 = vmatpush1.bf16.msra.mxu1 %v4943_v56 }
  0xed   : > { %v4936_v58 = vcombine.high %v864_v52, %v868_v53  ;;  %v728_v60 = vld [vmem:[%s5653_s24 + $0x880] sm:$0xff]  ;;  %3618 = vmatprep.subr.bf16.mxu0 %v4808_v57  ;;  %v4935_v1 = vcombine.low %v864_v52, %v868_v53 }
  0xee   : > { %v732_v61 = vld [vmem:[%s5653_s24 + $0x8a0] sm:$0xff]  ;;  %3619 = vmatpush1.bf16.msra.mxu0 %v4807_v0 }
  0xef   : > { %v856_v62 = vld [vmem:[%s5653_s24 + $0xc80] sm:$0xff]  ;;  %v4800_v2 = vcombine.high %v728_v60, %v732_v61  ;;  %3659 = vmatprep.subr.bf16.mxu1 %v4936_v58  ;;  %v4799_v9 = vcombine.low %v728_v60, %v732_v61 }
  0xf0   : > { %v860_v63 = vld [vmem:[%s5653_s24 + $0xca0] sm:$0xff]  ;;  %3660 = vmatpush1.bf16.msra.mxu1 %v4935_v1 }
  0xf1   : > { %v4928_v3 = vcombine.high %v856_v62, %v860_v63  ;;  %v720_v4 = vld [vmem:[%s5653_s24 + $0x840] sm:$0xff]  ;;  %3620 = vmatprep.subr.bf16.mxu0 %v4800_v2  ;;  %v4927_v10 = vcombine.low %v856_v62, %v860_v63 }
  0xf2   : > { %v724_v5 = vld [vmem:[%s5653_s24 + $0x860] sm:$0xff]  ;;  %3621 = vmatpush1.bf16.msra.mxu0 %v4799_v9 }
  0xf3   : > { %v848_v7 = vld [vmem:[%s5653_s24 + $0xc40] sm:$0xff]  ;;  %v4792_v11 = vcombine.high %v720_v4, %v724_v5  ;;  %3661 = vmatprep.subr.bf16.mxu1 %v4928_v3  ;;  %v4791_v17 = vcombine.low %v720_v4, %v724_v5 }
  0xf4   : > { %v852_v8 = vld [vmem:[%s5653_s24 + $0xc60] sm:$0xff]  ;;  %3662 = vmatpush1.bf16.msra.mxu1 %v4927_v10 }
  0xf5   : > { %v4920_v59 = vcombine.high %v848_v7, %v852_v8  ;;  %v712_v13 = vld [vmem:[%s5653_s24 + $0x800] sm:$0xff]  ;;  %3622 = vmatprep.subr.bf16.mxu0 %v4792_v11  ;;  %v4919_v18 = vcombine.low %v848_v7, %v852_v8 }
  0xf6   : > { %v716_v14 = vld [vmem:[%s5653_s24 + $0x820] sm:$0xff]  ;;  %3623 = vmatpush1.bf16.msra.mxu0 %v4791_v17 }
  0xf7   : > { %v840_v15 = vld [vmem:[%s5653_s24 + $0xc00] sm:$0xff]  ;;  %v4784_v19 = vcombine.high %v712_v13, %v716_v14  ;;  %3663 = vmatprep.subr.bf16.mxu1 %v4920_v59  ;;  %v4783_v27 = vcombine.low %v712_v13, %v716_v14 }
  0xf8   : > { %v844_v16 = vld [vmem:[%s5653_s24 + $0xc20] sm:$0xff]  ;;  %3664 = vmatpush1.bf16.msra.mxu1 %v4919_v18 }
  0xf9   : > { %v4912_v20 = vcombine.high %v840_v15, %v844_v16  ;;  %v832_v22 = vld [vmem:[%s5653_s24 + $0xbc0] sm:$0xff]  ;;  %3624 = vmatprep.subr.bf16.mxu0 %v4784_v19  ;;  %v4911_v28 = vcombine.low %v840_v15, %v844_v16 }
  0xfa   : > { %v836_v24 = vld [vmem:[%s5653_s24 + $0xbe0] sm:$0xff]  ;;  %3625 = vmatpush1.bf16.msra.mxu0 %v4783_v27 }
  0xfb   : > { %v960_v25 = vld [vmem:[%s5653_s24 + $0xfc0] sm:$0xff]  ;;  %v4904_v29 = vcombine.high %v832_v22, %v836_v24  ;;  %3665 = vmatprep.subr.bf16.mxu1 %v4912_v20  ;;  %v4903_v37 = vcombine.low %v832_v22, %v836_v24 }
  0xfc   : > { %v964_v6 = vld [vmem:[%s5653_s24 + $0xfe0] sm:$0xff]  ;;  %3666 = vmatpush1.bf16.msra.mxu1 %v4911_v28 }
  0xfd   : > { %v5032_v30 = vcombine.high %v960_v25, %v964_v6  ;;  %v824_v32 = vld [vmem:[%s5653_s24 + $0xb80] sm:$0xff]  ;;  %3626 = vmatprep.subr.bf16.mxu0 %v4904_v29  ;;  %v5031_v38 = vcombine.low %v960_v25, %v964_v6 }
  0xfe   : > { %v828_v33 = vld [vmem:[%s5653_s24 + $0xba0] sm:$0xff]  ;;  %3627 = vmatpush2.bf16.msra.mxu0 %v4903_v37 }
  0xff   : > { %v952_v35 = vld [vmem:[%s5653_s24 + $0xf80] sm:$0xff]  ;;  %v4896_v39 = vcombine.high %v824_v32, %v828_v33  ;;  %3667 = vmatprep.subr.bf16.mxu1 %v5032_v30  ;;  %v4895_v45 = vcombine.low %v824_v32, %v828_v33  ;;  %v513_v32 = vld [vmem:[%s5653_s24 + $0x1c8] sm:$0xff] }
 0x100   : > { %v956_v36 = vld [vmem:[%s5653_s24 + $0xfa0] sm:$0xff]  ;;  %3668 = vmatpush2.bf16.msra.mxu1 %v5031_v38  ;;  %v517_v33 = vld [vmem:[%s5653_s24 + $0x1e8] sm:$0xff] }
 0x101   : > { %v5024_v40 = vcombine.high %v952_v35, %v956_v36  ;;  %v816_v41 = vld [vmem:[%s5653_s24 + $0xb40] sm:$0xff]  ;;  %3628 = vmatprep.subr.bf16.mxu0 %v4896_v39  ;;  %v5023_v46 = vcombine.low %v952_v35, %v956_v36  ;;  %v641_v35 = vld [vmem:[%s5653_s24 + $0x5c8] sm:$0xff]  ;;  %v4586_v39 = vcombine.high %v513_v32, %v517_v33 }
 0x102   : > { %v820_v42 = vld [vmem:[%s5653_s24 + $0xb60] sm:$0xff]  ;;  %3629 = vmatpush2.bf16.msra.mxu0 %v4895_v45  ;;  %v645_v36 = vld [vmem:[%s5653_s24 + $0x5e8] sm:$0xff] }
 0x103   : > { %v944_v43 = vld [vmem:[%s5653_s24 + $0xf40] sm:$0xff]  ;;  %v4888_v47 = vcombine.high %v816_v41, %v820_v42  ;;  %3669 = vmatprep.subr.bf16.mxu1 %v5024_v40  ;;  %v4887_v55 = vcombine.low %v816_v41, %v820_v42  ;;  %v4714_v40 = vcombine.high %v641_v35, %v645_v36  ;;  %v505_v41 = vld [vmem:[%s5653_s24 + $0x188] sm:$0xff] }
 0x104   : > { %v948_v44 = vld [vmem:[%s5653_s24 + $0xf60] sm:$0xff]  ;;  %3670 = vmatpush2.bf16.msra.mxu1 %v5023_v46  ;;  %v509_v42 = vld [vmem:[%s5653_s24 + $0x1a8] sm:$0xff]  ;;  %v5959_v46 = vpack.c.bf16 %v5837_v54, %v5837_v54 }
 0x105   : > { %v5016_v49 = vcombine.high %v944_v43, %v948_v44  ;;  %v808_v50 = vld [vmem:[%s5653_s24 + $0xb00] sm:$0xff]  ;;  %3630 = vmatprep.subr.bf16.mxu0 %v4888_v47  ;;  %v5015_v56 = vcombine.low %v944_v43, %v948_v44  ;;  %v5953_v43 = vpack.c.bf16 %v5829_v48, %v5829_v48  ;;  %v633_v44 = vld [vmem:[%s5653_s24 + $0x588] sm:$0xff]  ;;  %v4585_v47 = vcombine.low %v513_v32, %v517_v33 }
 0x106   : > { %v812_v51 = vld [vmem:[%s5653_s24 + $0xb20] sm:$0xff]  ;;  %3631 = vmatpush2.bf16.msra.mxu0 %v4887_v55  ;;  %v637_v45 = vld [vmem:[%s5653_s24 + $0x5a8] sm:$0xff]  ;;  %v4577_v54 = vcombine.low %v505_v41, %v509_v42 }
 0x107   : > { %v936_v52 = vld [vmem:[%s5653_s24 + $0xf00] sm:$0xff]  ;;  %v4880_v57 = vcombine.high %v808_v50, %v812_v51  ;;  %3671 = vmatprep.subr.bf16.mxu1 %v5016_v49  ;;  %v4879_v0 = vcombine.low %v808_v50, %v812_v51  ;;  %v4713_v49 = vcombine.low %v641_v35, %v645_v36  ;;  %v4578_v50 = vcombine.high %v505_v41, %v509_v42  ;;  %v501_v48 = vld [vmem:[%s5653_s24 + $0x168] sm:$0xff] }
 0x108   : > { %v940_v53 = vld [vmem:[%s5653_s24 + $0xf20] sm:$0xff]  ;;  %3672 = vmatpush2.bf16.msra.mxu1 %v5015_v56  ;;  %v4706_v51 = vcombine.high %v633_v44, %v637_v45  ;;  %v629_v55 = vld [vmem:[%s5653_s24 + $0x568] sm:$0xff]  ;;  %v4705_v56 = vcombine.low %v633_v44, %v637_v45 }
 0x109   : > { %v5008_v58 = vcombine.high %v936_v52, %v940_v53  ;;  %v800_v60 = vld [vmem:[%s5653_s24 + $0xac0] sm:$0xff]  ;;  %3632 = vmatprep.subr.bf16.mxu0 %v4880_v57  ;;  %v5007_v1 = vcombine.low %v936_v52, %v940_v53  ;;  %v497_v52 = vld [vmem:[%s5653_s24 + $0x148] sm:$0xff] }
 0x10a   : > { %v804_v61 = vld [vmem:[%s5653_s24 + $0xae0] sm:$0xff]  ;;  %3633 = vmatpush2.bf16.msra.mxu0 %v4879_v0  ;;  %v625_v53 = vld [vmem:[%s5653_s24 + $0x548] sm:$0xff]  ;;  %v4570_v57 = vcombine.high %v497_v52, %v501_v48  ;;  %v4569_v0 = vcombine.low %v497_v52, %v501_v48 }
 0x10b   : > { %v928_v62 = vld [vmem:[%s5653_s24 + $0xec0] sm:$0xff]  ;;  %v4872_v2 = vcombine.high %v800_v60, %v804_v61  ;;  %3673 = vmatprep.subr.bf16.mxu1 %v5008_v58  ;;  %v4871_v9 = vcombine.low %v800_v60, %v804_v61  ;;  %v4698_v58 = vcombine.high %v625_v53, %v629_v55  ;;  %v489_v60 = vld [vmem:[%s5653_s24 + $0x108] sm:$0xff] }
 0x10c   : > { %v932_v63 = vld [vmem:[%s5653_s24 + $0xee0] sm:$0xff]  ;;  %3674 = vmatpush2.bf16.msra.mxu1 %v5007_v1  ;;  %v493_v61 = vld [vmem:[%s5653_s24 + $0x128] sm:$0xff]  ;;  %v4697_v1 = vcombine.low %v625_v53, %v629_v55 }
 0x10d   : > { %v5000_v3 = vcombine.high %v928_v62, %v932_v63  ;;  %v792_v4 = vld [vmem:[%s5653_s24 + $0xa80] sm:$0xff]  ;;  %3634 = vmatprep.subr.bf16.mxu0 %v4872_v2  ;;  %v4999_v10 = vcombine.low %v928_v62, %v932_v63  ;;  %v617_v62 = vld [vmem:[%s5653_s24 + $0x508] sm:$0xff]  ;;  %v4562_v2 = vcombine.high %v489_v60, %v493_v61 }
 0x10e   : > { %v796_v5 = vld [vmem:[%s5653_s24 + $0xaa0] sm:$0xff]  ;;  %3635 = vmatpush2.bf16.msra.mxu0 %v4871_v9  ;;  %v621_v63 = vld [vmem:[%s5653_s24 + $0x528] sm:$0xff]  ;;  %v4561_v9 = vcombine.low %v489_v60, %v493_v61 }
 0x10f   : > { %v920_v7 = vld [vmem:[%s5653_s24 + $0xe80] sm:$0xff]  ;;  %v4864_v11 = vcombine.high %v792_v4, %v796_v5  ;;  %3675 = vmatprep.subr.bf16.mxu1 %v5000_v3  ;;  %v4863_v17 = vcombine.low %v792_v4, %v796_v5  ;;  %v4690_v3 = vcombine.high %v617_v62, %v621_v63  ;;  %v481_v4 = vld [vmem:[%s5653_s24 + $0xc8] sm:$0xff] }
 0x110   : > { %v924_v8 = vld [vmem:[%s5653_s24 + $0xea0] sm:$0xff]  ;;  %3676 = vmatpush2.bf16.msra.mxu1 %v4999_v10  ;;  %v485_v5 = vld [vmem:[%s5653_s24 + $0xe8] sm:$0xff]  ;;  %v4689_v10 = vcombine.low %v617_v62, %v621_v63 }
 0x111   : > { %v4992_v59 = vcombine.high %v920_v7, %v924_v8  ;;  %v784_v13 = vld [vmem:[%s5653_s24 + $0xa40] sm:$0xff]  ;;  %3636 = vmatprep.subr.bf16.mxu0 %v4864_v11  ;;  %v4991_v18 = vcombine.low %v920_v7, %v924_v8  ;;  %v609_v7 = vld [vmem:[%s5653_s24 + $0x4c8] sm:$0xff]  ;;  %v4554_v11 = vcombine.high %v481_v4, %v485_v5 }
 0x112   : > { %v788_v14 = vld [vmem:[%s5653_s24 + $0xa60] sm:$0xff]  ;;  %3637 = vmatpush2.bf16.msra.mxu0 %v4863_v17  ;;  %v613_v8 = vld [vmem:[%s5653_s24 + $0x4e8] sm:$0xff]  ;;  %v4553_v17 = vcombine.low %v481_v4, %v485_v5 }
 0x113   : > { %v912_v15 = vld [vmem:[%s5653_s24 + $0xe40] sm:$0xff]  ;;  %v4856_v19 = vcombine.high %v784_v13, %v788_v14  ;;  %3677 = vmatprep.subr.bf16.mxu1 %v4992_v59  ;;  %v4855_v27 = vcombine.low %v784_v13, %v788_v14  ;;  %v4682_v59 = vcombine.high %v609_v7, %v613_v8  ;;  %v473_v13 = vld [vmem:[%s5653_s24 + $0x88] sm:$0xff] }
 0x114   : > { %v916_v16 = vld [vmem:[%s5653_s24 + $0xe60] sm:$0xff]  ;;  %3678 = vmatpush2.bf16.msra.mxu1 %v4991_v18  ;;  %v477_v14 = vld [vmem:[%s5653_s24 + $0xa8] sm:$0xff]  ;;  %v4681_v18 = vcombine.low %v609_v7, %v613_v8 }
 0x115   : > { %v4984_v20 = vcombine.high %v912_v15, %v916_v16  ;;  %v776_v22 = vld [vmem:[%s5653_s24 + $0xa00] sm:$0xff]  ;;  %3638 = vmatprep.subr.bf16.mxu0 %v4856_v19  ;;  %v4983_v28 = vcombine.low %v912_v15, %v916_v16  ;;  %v601_v15 = vld [vmem:[%s5653_s24 + $0x488] sm:$0xff]  ;;  %v4546_v19 = vcombine.high %v473_v13, %v477_v14 }
 0x116   : > { %v780_v24 = vld [vmem:[%s5653_s24 + $0xa20] sm:$0xff]  ;;  %3639 = vmatpush2.bf16.msra.mxu0 %v4855_v27  ;;  %v605_v16 = vld [vmem:[%s5653_s24 + $0x4a8] sm:$0xff]  ;;  %v4545_v27 = vcombine.low %v473_v13, %v477_v14 }
 0x117   : > { %v904_v25 = vld [vmem:[%s5653_s24 + $0xe00] sm:$0xff]  ;;  %v4848_v29 = vcombine.high %v776_v22, %v780_v24  ;;  %3679 = vmatprep.subr.bf16.mxu1 %v4984_v20  ;;  %v4847_v37 = vcombine.low %v776_v22, %v780_v24  ;;  %v4674_v20 = vcombine.high %v601_v15, %v605_v16  ;;  %v465_v22 = vld [vmem:[%s5653_s24 + $0x48] sm:$0xff] }
 0x118   : > { %v908_v6 = vld [vmem:[%s5653_s24 + $0xe20] sm:$0xff]  ;;  %3680 = vmatpush2.bf16.msra.mxu1 %v4983_v28  ;;  %v469_v24 = vld [vmem:[%s5653_s24 + $0x68] sm:$0xff]  ;;  %v4673_v28 = vcombine.low %v601_v15, %v605_v16 }
 0x119   : > { %v4976_v30 = vcombine.high %v904_v25, %v908_v6  ;;  %3640 = vmatprep.subr.bf16.mxu0 %v4848_v29  ;;  %v4975_v38 = vcombine.low %v904_v25, %v908_v6  ;;  %v593_v25 = vld [vmem:[%s5653_s24 + $0x448] sm:$0xff]  ;;  %v4538_v29 = vcombine.high %v465_v22, %v469_v24 }
 0x11a   : > { %3641 = vmatpush2.bf16.msra.mxu0 %v4847_v37  ;;  %v597_v6 = vld [vmem:[%s5653_s24 + $0x468] sm:$0xff]  ;;  %v4537_v37 = vcombine.low %v465_v22, %v469_v24 }
 0x11b   : > { %3681 = vmatprep.subr.bf16.mxu1 %v4976_v30  ;;  %3692 = vmatprep.subr.bf16.mxu0 %v4586_v39  ;;  %v4666_v30 = vcombine.high %v593_v25, %v597_v6  ;;  %v457_v32 = vld [vmem:[%s5653_s24 + $0x8] sm:$0xff] }
 0x11c   : > { %3682 = vmatpush2.bf16.msra.mxu1 %v4975_v38  ;;  %v461_v33 = vld [vmem:[%s5653_s24 + $0x28] sm:$0xff]  ;;  %v4665_v38 = vcombine.low %v593_v25, %v597_v6 }
 0x11d   : > { %3733 = vmatprep.subr.bf16.mxu1 %v4714_v40  ;;  %3643 = vmatmul.mubr.bf16.vlgmr.msra.gmra.mxu0 %v5953_v43  ;;  %v585_v35 = vld [vmem:[%s5653_s24 + $0x408] sm:$0xff]  ;;  %v4530_v39 = vcombine.high %v457_v32, %v461_v33 }
 0x11e   : > { %3693 = vmatpush1.bf16.msra.mxu0 %v4585_v47  ;;  %3724 = vmatprep.mubr.bf16.mxu0 %v5759_v23  ;;  %v589_v36 = vld [vmem:[%s5653_s24 + $0x428] sm:$0xff]  ;;  %v4529_v47 = vcombine.low %v457_v32, %v461_v33 }
 0x11f   : > { %3684 = vmatmul.mubr.bf16.vlgmr.msra.gmra.mxu1 %v5959_v46  ;;  %3694 = vmatprep.subr.bf16.mxu0 %v4578_v50  ;;  %v4658_v40 = vcombine.high %v585_v35, %v589_v36  ;;  %v577_v41 = vld [vmem:[%s5653_s24 + $0x3c8] sm:$0xff] }
 0x120   : > { %3734 = vmatpush1.bf16.msra.mxu1 %v4713_v49  ;;  %3765 = vmatprep.mubr.bf16.mxu1 %v5770_v31  ;;  %v581_v42 = vld [vmem:[%s5653_s24 + $0x3e8] sm:$0xff]  ;;  %v4657_v49 = vcombine.low %v585_v35, %v589_v36 }
 0x121   : > { %3735 = vmatprep.subr.bf16.mxu1 %v4706_v51  ;;  %v705_v44 = vld [vmem:[%s5653_s24 + $0x7c8] sm:$0xff]  ;;  %v4650_v50 = vcombine.high %v577_v41, %v581_v42 }
 0x122   : > { %3695 = vmatpush1.bf16.msra.mxu0 %v4577_v54  ;;  %v709_v45 = vld [vmem:[%s5653_s24 + $0x7e8] sm:$0xff]  ;;  %v4649_v54 = vcombine.low %v577_v41, %v581_v42 }
 0x123   : > { %3696 = vmatprep.subr.bf16.mxu0 %v4570_v57  ;;  %v4778_v51 = vcombine.high %v705_v44, %v709_v45  ;;  %v569_v52 = vld [vmem:[%s5653_s24 + $0x388] sm:$0xff] }
 0x124   : > { %3736 = vmatpush1.bf16.msra.mxu1 %v4705_v56  ;;  %v573_v48 = vld [vmem:[%s5653_s24 + $0x3a8] sm:$0xff]  ;;  %v4777_v56 = vcombine.low %v705_v44, %v709_v45 }
 0x125   : > { %3737 = vmatprep.subr.bf16.mxu1 %v4698_v58  ;;  %v697_v53 = vld [vmem:[%s5653_s24 + $0x788] sm:$0xff]  ;;  %v4642_v57 = vcombine.high %v569_v52, %v573_v48 }
 0x126   : > { %3697 = vmatpush1.bf16.msra.mxu0 %v4569_v0  ;;  %v701_v55 = vld [vmem:[%s5653_s24 + $0x7a8] sm:$0xff]  ;;  %v4641_v0 = vcombine.low %v569_v52, %v573_v48 }
 0x127   : > { %3698 = vmatprep.subr.bf16.mxu0 %v4562_v2  ;;  %v4770_v58 = vcombine.high %v697_v53, %v701_v55  ;;  %v561_v60 = vld [vmem:[%s5653_s24 + $0x348] sm:$0xff] }
 0x128   : > { %3738 = vmatpush1.bf16.msra.mxu1 %v4697_v1  ;;  %v565_v61 = vld [vmem:[%s5653_s24 + $0x368] sm:$0xff]  ;;  %v4769_v1 = vcombine.low %v697_v53, %v701_v55 }
 0x129   : > { %3739 = vmatprep.subr.bf16.mxu1 %v4690_v3  ;;  %v689_v62 = vld [vmem:[%s5653_s24 + $0x748] sm:$0xff]  ;;  %v4634_v2 = vcombine.high %v561_v60, %v565_v61 }
 0x12a   : > { %3699 = vmatpush1.bf16.msra.mxu0 %v4561_v9  ;;  %v693_v63 = vld [vmem:[%s5653_s24 + $0x768] sm:$0xff]  ;;  %v4633_v9 = vcombine.low %v561_v60, %v565_v61 }
 0x12b   : > { %3700 = vmatprep.subr.bf16.mxu0 %v4554_v11  ;;  %v4762_v3 = vcombine.high %v689_v62, %v693_v63  ;;  %v553_v4 = vld [vmem:[%s5653_s24 + $0x308] sm:$0xff] }
 0x12c   : > { %3740 = vmatpush1.bf16.msra.mxu1 %v4689_v10  ;;  %v557_v5 = vld [vmem:[%s5653_s24 + $0x328] sm:$0xff]  ;;  %v4761_v10 = vcombine.low %v689_v62, %v693_v63 }
 0x12d   : > { %3741 = vmatprep.subr.bf16.mxu1 %v4682_v59  ;;  %v681_v7 = vld [vmem:[%s5653_s24 + $0x708] sm:$0xff]  ;;  %v4626_v11 = vcombine.high %v553_v4, %v557_v5 }
 0x12e   : > { %3701 = vmatpush1.bf16.msra.mxu0 %v4553_v17  ;;  %v685_v8 = vld [vmem:[%s5653_s24 + $0x728] sm:$0xff]  ;;  %v4625_v17 = vcombine.low %v553_v4, %v557_v5 }
 0x12f   : > { %3702 = vmatprep.subr.bf16.mxu0 %v4546_v19  ;;  %v4754_v59 = vcombine.high %v681_v7, %v685_v8  ;;  %v545_v13 = vld [vmem:[%s5653_s24 + $0x2c8] sm:$0xff] }
 0x130   : > { %3742 = vmatpush1.bf16.msra.mxu1 %v4681_v18  ;;  %v549_v14 = vld [vmem:[%s5653_s24 + $0x2e8] sm:$0xff]  ;;  %v4753_v18 = vcombine.low %v681_v7, %v685_v8 }
 0x131   : > { %3743 = vmatprep.subr.bf16.mxu1 %v4674_v20  ;;  %v673_v15 = vld [vmem:[%s5653_s24 + $0x6c8] sm:$0xff]  ;;  %v4618_v19 = vcombine.high %v545_v13, %v549_v14 }
 0x132   : > { %3703 = vmatpush1.bf16.msra.mxu0 %v4545_v27  ;;  %v677_v16 = vld [vmem:[%s5653_s24 + $0x6e8] sm:$0xff]  ;;  %v4617_v27 = vcombine.low %v545_v13, %v549_v14 }
 0x133   : > { %3704 = vmatprep.subr.bf16.mxu0 %v4538_v29  ;;  %v4746_v20 = vcombine.high %v673_v15, %v677_v16  ;;  %v537_v22 = vld [vmem:[%s5653_s24 + $0x288] sm:$0xff] }
 0x134   : > { %3744 = vmatpush1.bf16.msra.mxu1 %v4673_v28  ;;  %v541_v24 = vld [vmem:[%s5653_s24 + $0x2a8] sm:$0xff]  ;;  %v4745_v28 = vcombine.low %v673_v15, %v677_v16 }
 0x135   : > { %3745 = vmatprep.subr.bf16.mxu1 %v4666_v30  ;;  %v665_v25 = vld [vmem:[%s5653_s24 + $0x688] sm:$0xff]  ;;  %v4610_v29 = vcombine.high %v537_v22, %v541_v24 }
 0x136   : > { %3705 = vmatpush1.bf16.msra.mxu0 %v4537_v37  ;;  %v669_v6 = vld [vmem:[%s5653_s24 + $0x6a8] sm:$0xff]  ;;  %v4609_v37 = vcombine.low %v537_v22, %v541_v24 }
 0x137   : > { %3706 = vmatprep.subr.bf16.mxu0 %v4530_v39  ;;  %v4738_v30 = vcombine.high %v665_v25, %v669_v6  ;;  %v529_v32 = vld [vmem:[%s5653_s24 + $0x248] sm:$0xff] }
 0x138   : > { %3746 = vmatpush1.bf16.msra.mxu1 %v4665_v38  ;;  %v533_v33 = vld [vmem:[%s5653_s24 + $0x268] sm:$0xff]  ;;  %v4737_v38 = vcombine.low %v665_v25, %v669_v6 }
 0x139   : > { %3747 = vmatprep.subr.bf16.mxu1 %v4658_v40  ;;  %v657_v35 = vld [vmem:[%s5653_s24 + $0x648] sm:$0xff]  ;;  %v4602_v39 = vcombine.high %v529_v32, %v533_v33 }
 0x13a   : > { %3707 = vmatpush1.bf16.msra.mxu0 %v4529_v47  ;;  %v661_v36 = vld [vmem:[%s5653_s24 + $0x668] sm:$0xff]  ;;  %v4601_v47 = vcombine.low %v529_v32, %v533_v33 }
 0x13b   : > { %3708 = vmatprep.subr.bf16.mxu0 %v4650_v50  ;;  %v4730_v40 = vcombine.high %v657_v35, %v661_v36  ;;  %v521_v41 = vld [vmem:[%s5653_s24 + $0x208] sm:$0xff] }
 0x13c   : > { %3748 = vmatpush1.bf16.msra.mxu1 %v4657_v49  ;;  %v525_v42 = vld [vmem:[%s5653_s24 + $0x228] sm:$0xff]  ;;  %v4729_v49 = vcombine.low %v657_v35, %v661_v36 }
 0x13d   : > { %3749 = vmatprep.subr.bf16.mxu1 %v4778_v51  ;;  %v649_v44 = vld [vmem:[%s5653_s24 + $0x608] sm:$0xff]  ;;  %v4594_v50 = vcombine.high %v521_v41, %v525_v42 }
 0x13e   : > { %3709 = vmatpush2.bf16.msra.mxu0 %v4649_v54  ;;  %v653_v45 = vld [vmem:[%s5653_s24 + $0x628] sm:$0xff]  ;;  %v4593_v54 = vcombine.low %v521_v41, %v525_v42 }
 0x13f   : > { %3710 = vmatprep.subr.bf16.mxu0 %v4642_v57  ;;  %v4722_v51 = vcombine.high %v649_v44, %v653_v45  ;;  %v769_v52 = vld [vmem:[%s5653_s24 + $0x9c8] sm:$0xff] }
 0x140   : > { %3750 = vmatpush2.bf16.msra.mxu1 %v4777_v56  ;;  %v773_v48 = vld [vmem:[%s5653_s24 + $0x9e8] sm:$0xff]  ;;  %v4721_v56 = vcombine.low %v649_v44, %v653_v45 }
 0x141   : > { %3751 = vmatprep.subr.bf16.mxu1 %v4770_v58  ;;  %v897_v53 = vld [vmem:[%s5653_s24 + $0xdc8] sm:$0xff]  ;;  %v4842_v57 = vcombine.high %v769_v52, %v773_v48 }
 0x142   : > { %3711 = vmatpush2.bf16.msra.mxu0 %v4641_v0  ;;  %v901_v55 = vld [vmem:[%s5653_s24 + $0xde8] sm:$0xff]  ;;  %v4841_v0 = vcombine.low %v769_v52, %v773_v48 }
 0x143   : > { %3712 = vmatprep.subr.bf16.mxu0 %v4634_v2  ;;  %v4970_v58 = vcombine.high %v897_v53, %v901_v55  ;;  %v761_v60 = vld [vmem:[%s5653_s24 + $0x988] sm:$0xff] }
 0x144   : > { %3752 = vmatpush2.bf16.msra.mxu1 %v4769_v1  ;;  %v765_v61 = vld [vmem:[%s5653_s24 + $0x9a8] sm:$0xff]  ;;  %v4969_v1 = vcombine.low %v897_v53, %v901_v55 }
 0x145   : > { %3753 = vmatprep.subr.bf16.mxu1 %v4762_v3  ;;  %v889_v62 = vld [vmem:[%s5653_s24 + $0xd88] sm:$0xff]  ;;  %v4834_v2 = vcombine.high %v761_v60, %v765_v61 }
 0x146   : > { %3713 = vmatpush2.bf16.msra.mxu0 %v4633_v9  ;;  %v893_v63 = vld [vmem:[%s5653_s24 + $0xda8] sm:$0xff]  ;;  %v4833_v9 = vcombine.low %v761_v60, %v765_v61 }
 0x147   : > { %3714 = vmatprep.subr.bf16.mxu0 %v4626_v11  ;;  %v4962_v3 = vcombine.high %v889_v62, %v893_v63  ;;  %v753_v4 = vld [vmem:[%s5653_s24 + $0x948] sm:$0xff] }
 0x148   : > { %3754 = vmatpush2.bf16.msra.mxu1 %v4761_v10  ;;  %v757_v5 = vld [vmem:[%s5653_s24 + $0x968] sm:$0xff]  ;;  %v4961_v10 = vcombine.low %v889_v62, %v893_v63 }
 0x149   : > { %3755 = vmatprep.subr.bf16.mxu1 %v4754_v59  ;;  %v881_v7 = vld [vmem:[%s5653_s24 + $0xd48] sm:$0xff]  ;;  %v4826_v11 = vcombine.high %v753_v4, %v757_v5 }
 0x14a   : > { %3715 = vmatpush2.bf16.msra.mxu0 %v4625_v17  ;;  %v885_v8 = vld [vmem:[%s5653_s24 + $0xd68] sm:$0xff]  ;;  %v4825_v17 = vcombine.low %v753_v4, %v757_v5 }
 0x14b   : > { %3716 = vmatprep.subr.bf16.mxu0 %v4618_v19  ;;  %v4954_v59 = vcombine.high %v881_v7, %v885_v8  ;;  %v745_v13 = vld [vmem:[%s5653_s24 + $0x908] sm:$0xff] }
 0x14c   : > { %3756 = vmatpush2.bf16.msra.mxu1 %v4753_v18  ;;  %v749_v14 = vld [vmem:[%s5653_s24 + $0x928] sm:$0xff]  ;;  %v4953_v18 = vcombine.low %v881_v7, %v885_v8 }
 0x14d   : > { %3757 = vmatprep.subr.bf16.mxu1 %v4746_v20  ;;  %v873_v15 = vld [vmem:[%s5653_s24 + $0xd08] sm:$0xff]  ;;  %v4818_v19 = vcombine.high %v745_v13, %v749_v14 }
 0x14e   : > { %3717 = vmatpush2.bf16.msra.mxu0 %v4617_v27  ;;  %v877_v16 = vld [vmem:[%s5653_s24 + $0xd28] sm:$0xff]  ;;  %v4817_v27 = vcombine.low %v745_v13, %v749_v14 }
 0x14f   : > { %3718 = vmatprep.subr.bf16.mxu0 %v4610_v29  ;;  %v4946_v20 = vcombine.high %v873_v15, %v877_v16  ;;  %v737_v22 = vld [vmem:[%s5653_s24 + $0x8c8] sm:$0xff] }
 0x150   : > { %3758 = vmatpush2.bf16.msra.mxu1 %v4745_v28  ;;  %v741_v24 = vld [vmem:[%s5653_s24 + $0x8e8] sm:$0xff]  ;;  %v4945_v28 = vcombine.low %v873_v15, %v877_v16 }
 0x151   : > { %3759 = vmatprep.subr.bf16.mxu1 %v4738_v30  ;;  %v865_v25 = vld [vmem:[%s5653_s24 + $0xcc8] sm:$0xff]  ;;  %v4810_v29 = vcombine.high %v737_v22, %v741_v24 }
 0x152   : > { %3719 = vmatpush2.bf16.msra.mxu0 %v4609_v37  ;;  %v869_v6 = vld [vmem:[%s5653_s24 + $0xce8] sm:$0xff]  ;;  %v4809_v37 = vcombine.low %v737_v22, %v741_v24 }
 0x153   : > { %3720 = vmatprep.subr.bf16.mxu0 %v4602_v39  ;;  %v4938_v30 = vcombine.high %v865_v25, %v869_v6  ;;  %v729_v32 = vld [vmem:[%s5653_s24 + $0x888] sm:$0xff] }
 0x154   : > { %3760 = vmatpush2.bf16.msra.mxu1 %v4737_v38  ;;  %v733_v33 = vld [vmem:[%s5653_s24 + $0x8a8] sm:$0xff]  ;;  %v4937_v38 = vcombine.low %v865_v25, %v869_v6 }
 0x155   : > { %3761 = vmatprep.subr.bf16.mxu1 %v4730_v40  ;;  %v857_v35 = vld [vmem:[%s5653_s24 + $0xc88] sm:$0xff]  ;;  %v4802_v39 = vcombine.high %v729_v32, %v733_v33 }
 0x156   : > { %3721 = vmatpush2.bf16.msra.mxu0 %v4601_v47  ;;  %v861_v36 = vld [vmem:[%s5653_s24 + $0xca8] sm:$0xff]  ;;  %v4801_v47 = vcombine.low %v729_v32, %v733_v33 }
 0x157   : > { %3722 = vmatprep.subr.bf16.mxu0 %v4594_v50  ;;  %v4930_v40 = vcombine.high %v857_v35, %v861_v36  ;;  %v721_v41 = vld [vmem:[%s5653_s24 + $0x848] sm:$0xff] }
 0x158   : > { %3762 = vmatpush2.bf16.msra.mxu1 %v4729_v49  ;;  %v725_v42 = vld [vmem:[%s5653_s24 + $0x868] sm:$0xff]  ;;  %v4929_v49 = vcombine.low %v857_v35, %v861_v36 }
 0x159   : > { %3763 = vmatprep.subr.bf16.mxu1 %v4722_v51  ;;  %v849_v44 = vld [vmem:[%s5653_s24 + $0xc48] sm:$0xff]  ;;  %v4794_v50 = vcombine.high %v721_v41, %v725_v42 }
 0x15a   : > { %3723 = vmatpush2.bf16.msra.mxu0 %v4593_v54  ;;  %v853_v45 = vld [vmem:[%s5653_s24 + $0xc68] sm:$0xff]  ;;  %v4793_v54 = vcombine.low %v721_v41, %v725_v42 }
 0x15b   : > { %3774 = vmatprep.subr.bf16.mxu0 %v4842_v57  ;;  %v4922_v51 = vcombine.high %v849_v44, %v853_v45  ;;  %v713_v52 = vld [vmem:[%s5653_s24 + $0x808] sm:$0xff] }
 0x15c   : > { %3764 = vmatpush2.bf16.msra.mxu1 %v4721_v56  ;;  %v717_v48 = vld [vmem:[%s5653_s24 + $0x828] sm:$0xff]  ;;  %v4921_v56 = vcombine.low %v849_v44, %v853_v45 }
 0x15d   : > { %3815 = vmatprep.subr.bf16.mxu1 %v4970_v58  ;;  %3725 = vmatmul.mubr.bf16.vlgmr.msra.gmra.mxu0 %v5871_v21  ;;  %v841_v53 = vld [vmem:[%s5653_s24 + $0xc08] sm:$0xff]  ;;  %v4786_v57 = vcombine.high %v713_v52, %v717_v48 }
 0x15e   : > { %3775 = vmatpush1.bf16.msra.mxu0 %v4841_v0  ;;  %3806 = vmatprep.mubr.bf16.mxu0 %v5883_v34  ;;  %v845_v55 = vld [vmem:[%s5653_s24 + $0xc28] sm:$0xff]  ;;  %v4785_v0 = vcombine.low %v713_v52, %v717_v48 }
 0x15f   : > { %3766 = vmatmul.mubr.bf16.vlgmr.msra.gmra.mxu1 %v5877_v26  ;;  %3776 = vmatprep.subr.bf16.mxu0 %v4834_v2  ;;  %v4914_v58 = vcombine.high %v841_v53, %v845_v55  ;;  %v833_v60 = vld [vmem:[%s5653_s24 + $0xbc8] sm:$0xff] }
 0x160   : > { %3816 = vmatpush1.bf16.msra.mxu1 %v4969_v1  ;;  %3847 = vmatprep.mubr.bf16.mxu1 %v5888_v12  ;;  %v837_v61 = vld [vmem:[%s5653_s24 + $0xbe8] sm:$0xff]  ;;  %v4913_v1 = vcombine.low %v841_v53, %v845_v55 }
 0x161   : > { %3817 = vmatprep.subr.bf16.mxu1 %v4962_v3  ;;  %v961_v62 = vld [vmem:[%s5653_s24 + $0xfc8] sm:$0xff]  ;;  %v4906_v2 = vcombine.high %v833_v60, %v837_v61 }
 0x162   : > { %3777 = vmatpush1.bf16.msra.mxu0 %v4833_v9  ;;  %v965_v63 = vld [vmem:[%s5653_s24 + $0xfe8] sm:$0xff]  ;;  %v4905_v9 = vcombine.low %v833_v60, %v837_v61 }
 0x163   : > { %3778 = vmatprep.subr.bf16.mxu0 %v4826_v11  ;;  %v5034_v3 = vcombine.high %v961_v62, %v965_v63  ;;  %v825_v4 = vld [vmem:[%s5653_s24 + $0xb88] sm:$0xff] }
 0x164   : > { %3818 = vmatpush1.bf16.msra.mxu1 %v4961_v10  ;;  %v829_v5 = vld [vmem:[%s5653_s24 + $0xba8] sm:$0xff]  ;;  %v5033_v10 = vcombine.low %v961_v62, %v965_v63 }
 0x165   : > { %3819 = vmatprep.subr.bf16.mxu1 %v4954_v59  ;;  %v953_v7 = vld [vmem:[%s5653_s24 + $0xf88] sm:$0xff]  ;;  %v4898_v11 = vcombine.high %v825_v4, %v829_v5 }
 0x166   : > { %3779 = vmatpush1.bf16.msra.mxu0 %v4825_v17  ;;  %v957_v8 = vld [vmem:[%s5653_s24 + $0xfa8] sm:$0xff]  ;;  %v4897_v17 = vcombine.low %v825_v4, %v829_v5  ;;  %v514_v4 = vld [vmem:[%s5653_s24 + $0x1d0] sm:$0xff] }
 0x167   : > { %3780 = vmatprep.subr.bf16.mxu0 %v4818_v19  ;;  %v5026_v59 = vcombine.high %v953_v7, %v957_v8  ;;  %v817_v13 = vld [vmem:[%s5653_s24 + $0xb48] sm:$0xff]  ;;  %v518_v5 = vld [vmem:[%s5653_s24 + $0x1f0] sm:$0xff] }
 0x168   : > { %3820 = vmatpush1.bf16.msra.mxu1 %v4953_v18  ;;  %v821_v14 = vld [vmem:[%s5653_s24 + $0xb68] sm:$0xff]  ;;  %v5025_v18 = vcombine.low %v953_v7, %v957_v8  ;;  %v642_v7 = vld [vmem:[%s5653_s24 + $0x5d0] sm:$0xff] }
 0x169   : > { %3821 = vmatprep.subr.bf16.mxu1 %v4946_v20  ;;  %v945_v15 = vld [vmem:[%s5653_s24 + $0xf48] sm:$0xff]  ;;  %v4890_v19 = vcombine.high %v817_v13, %v821_v14  ;;  %v646_v8 = vld [vmem:[%s5653_s24 + $0x5f0] sm:$0xff] }
 0x16a   : > { %3781 = vmatpush1.bf16.msra.mxu0 %v4817_v27  ;;  %v949_v16 = vld [vmem:[%s5653_s24 + $0xf68] sm:$0xff]  ;;  %v4889_v27 = vcombine.low %v817_v13, %v821_v14  ;;  %v506_v13 = vld [vmem:[%s5653_s24 + $0x190] sm:$0xff] }
 0x16b   : > { %3782 = vmatprep.subr.bf16.mxu0 %v4810_v29  ;;  %v5018_v20 = vcombine.high %v945_v15, %v949_v16  ;;  %v809_v22 = vld [vmem:[%s5653_s24 + $0xb08] sm:$0xff]  ;;  %v510_v14 = vld [vmem:[%s5653_s24 + $0x1b0] sm:$0xff] }
 0x16c   : > { %3822 = vmatpush1.bf16.msra.mxu1 %v4945_v28  ;;  %v813_v24 = vld [vmem:[%s5653_s24 + $0xb28] sm:$0xff]  ;;  %v5017_v28 = vcombine.low %v945_v15, %v949_v16  ;;  %v634_v15 = vld [vmem:[%s5653_s24 + $0x590] sm:$0xff] }
 0x16d   : > { %3823 = vmatprep.subr.bf16.mxu1 %v4938_v30  ;;  %v937_v25 = vld [vmem:[%s5653_s24 + $0xf08] sm:$0xff]  ;;  %v4882_v29 = vcombine.high %v809_v22, %v813_v24  ;;  %v638_v16 = vld [vmem:[%s5653_s24 + $0x5b0] sm:$0xff] }
 0x16e   : > { %3783 = vmatpush1.bf16.msra.mxu0 %v4809_v37  ;;  %v941_v6 = vld [vmem:[%s5653_s24 + $0xf28] sm:$0xff]  ;;  %v4881_v37 = vcombine.low %v809_v22, %v813_v24  ;;  %v498_v22 = vld [vmem:[%s5653_s24 + $0x150] sm:$0xff] }
 0x16f   : > { %3784 = vmatprep.subr.bf16.mxu0 %v4802_v39  ;;  %v5010_v30 = vcombine.high %v937_v25, %v941_v6  ;;  %v801_v32 = vld [vmem:[%s5653_s24 + $0xac8] sm:$0xff]  ;;  %v502_v24 = vld [vmem:[%s5653_s24 + $0x170] sm:$0xff] }
 0x170   : > { %3824 = vmatpush1.bf16.msra.mxu1 %v4937_v38  ;;  %v805_v33 = vld [vmem:[%s5653_s24 + $0xae8] sm:$0xff]  ;;  %v5009_v38 = vcombine.low %v937_v25, %v941_v6  ;;  %v626_v6 = vld [vmem:[%s5653_s24 + $0x550] sm:$0xff] }
 0x171   : > { %3825 = vmatprep.subr.bf16.mxu1 %v4930_v40  ;;  %v929_v35 = vld [vmem:[%s5653_s24 + $0xec8] sm:$0xff]  ;;  %v4874_v39 = vcombine.high %v801_v32, %v805_v33 }
 0x172   : > { %3785 = vmatpush1.bf16.msra.mxu0 %v4801_v47  ;;  %v933_v36 = vld [vmem:[%s5653_s24 + $0xee8] sm:$0xff]  ;;  %v4873_v47 = vcombine.low %v801_v32, %v805_v33  ;;  %v4707_v33 = vcombine.low %v634_v15, %v638_v16 }
 0x173   : > { %3786 = vmatprep.subr.bf16.mxu0 %v4794_v50  ;;  %v5002_v40 = vcombine.high %v929_v35, %v933_v36  ;;  %v793_v41 = vld [vmem:[%s5653_s24 + $0xa88] sm:$0xff] }
 0x174   : > { %3826 = vmatpush1.bf16.msra.mxu1 %v4929_v49  ;;  %v797_v42 = vld [vmem:[%s5653_s24 + $0xaa8] sm:$0xff]  ;;  %v5001_v49 = vcombine.low %v929_v35, %v933_v36  ;;  %v4572_v35 = vcombine.high %v498_v22, %v502_v24 }
 0x175   : > { %3827 = vmatprep.subr.bf16.mxu1 %v4922_v51  ;;  %v921_v44 = vld [vmem:[%s5653_s24 + $0xe88] sm:$0xff]  ;;  %v4866_v50 = vcombine.high %v793_v41, %v797_v42 }
 0x176   : > { %3787 = vmatpush1.bf16.msra.mxu0 %v4793_v54  ;;  %v925_v45 = vld [vmem:[%s5653_s24 + $0xea8] sm:$0xff]  ;;  %v4865_v54 = vcombine.low %v793_v41, %v797_v42  ;;  %v618_v42 = vld [vmem:[%s5653_s24 + $0x510] sm:$0xff] }
 0x177   : > { %3788 = vmatprep.subr.bf16.mxu0 %v4786_v57  ;;  %v4994_v51 = vcombine.high %v921_v44, %v925_v45  ;;  %v785_v52 = vld [vmem:[%s5653_s24 + $0xa48] sm:$0xff] }
 0x178   : > { %3828 = vmatpush1.bf16.msra.mxu1 %v4921_v56  ;;  %v789_v48 = vld [vmem:[%s5653_s24 + $0xa68] sm:$0xff]  ;;  %v4993_v56 = vcombine.low %v921_v44, %v925_v45  ;;  %v622_v44 = vld [vmem:[%s5653_s24 + $0x530] sm:$0xff] }
 0x179   : > { %3829 = vmatprep.subr.bf16.mxu1 %v4914_v58  ;;  %v913_v53 = vld [vmem:[%s5653_s24 + $0xe48] sm:$0xff]  ;;  %v4858_v57 = vcombine.high %v785_v52, %v789_v48 }
 0x17a   : > { %3789 = vmatpush1.bf16.msra.mxu0 %v4785_v0  ;;  %v917_v55 = vld [vmem:[%s5653_s24 + $0xe68] sm:$0xff]  ;;  %v4857_v0 = vcombine.low %v785_v52, %v789_v48  ;;  %v4692_v48 = vcombine.high %v618_v42, %v622_v44 }
 0x17b   : > { %3790 = vmatprep.subr.bf16.mxu0 %v4906_v2  ;;  %v4986_v58 = vcombine.high %v913_v53, %v917_v55  ;;  %v777_v60 = vld [vmem:[%s5653_s24 + $0xa08] sm:$0xff] }
 0x17c   : > { %3830 = vmatpush1.bf16.msra.mxu1 %v4913_v1  ;;  %v781_v61 = vld [vmem:[%s5653_s24 + $0xa28] sm:$0xff]  ;;  %v4985_v1 = vcombine.low %v913_v53, %v917_v55  ;;  %v482_v53 = vld [vmem:[%s5653_s24 + $0xd0] sm:$0xff] }
 0x17d   : > { %3831 = vmatprep.subr.bf16.mxu1 %v5034_v3  ;;  %v905_v62 = vld [vmem:[%s5653_s24 + $0xe08] sm:$0xff]  ;;  %v4850_v2 = vcombine.high %v777_v60, %v781_v61  ;;  %v486_v55 = vld [vmem:[%s5653_s24 + $0xf0] sm:$0xff] }
 0x17e   : > { %3791 = vmatpush2.bf16.msra.mxu0 %v4905_v9  ;;  %v909_v63 = vld [vmem:[%s5653_s24 + $0xe28] sm:$0xff]  ;;  %v4849_v9 = vcombine.low %v777_v60, %v781_v61  ;;  %v4556_v60 = vcombine.high %v482_v53, %v486_v55 }
 0x17f   : > { %3792 = vmatprep.subr.bf16.mxu0 %v4898_v11  ;;  %v4978_v3 = vcombine.high %v905_v62, %v909_v63  ;;  %v4588_v11 = vcombine.high %v514_v4, %v518_v5 }
 0x180   : > { %3832 = vmatpush2.bf16.msra.mxu1 %v5033_v10  ;;  %v4977_v10 = vcombine.low %v905_v62, %v909_v63  ;;  %v474_v62 = vld [vmem:[%s5653_s24 + $0x90] sm:$0xff] }
 0x181   : > { %3833 = vmatprep.subr.bf16.mxu1 %v5026_v59  ;;  %v4716_v59 = vcombine.high %v642_v7, %v646_v8  ;;  %v478_v63 = vld [vmem:[%s5653_s24 + $0xb0] sm:$0xff] }
 0x182   : > { %3793 = vmatpush2.bf16.msra.mxu0 %v4897_v17  ;;  %v4587_v17 = vcombine.low %v514_v4, %v518_v5  ;;  %v4548_v4 = vcombine.high %v474_v62, %v478_v63 }
 0x183   : > { %3794 = vmatprep.subr.bf16.mxu0 %v4890_v19  ;;  %v4580_v19 = vcombine.high %v506_v13, %v510_v14 }
 0x184   : > { %3834 = vmatpush2.bf16.msra.mxu1 %v5025_v18  ;;  %v4715_v18 = vcombine.low %v642_v7, %v646_v8  ;;  %v466_v7 = vld [vmem:[%s5653_s24 + $0x50] sm:$0xff] }
 0x185   : > { %3835 = vmatprep.subr.bf16.mxu1 %v5018_v20  ;;  %v4708_v20 = vcombine.high %v634_v15, %v638_v16  ;;  %v470_v8 = vld [vmem:[%s5653_s24 + $0x70] sm:$0xff] }
 0x186   : > { %3795 = vmatpush2.bf16.msra.mxu0 %v4889_v27  ;;  %v630_v27 = vld [vmem:[%s5653_s24 + $0x570] sm:$0xff] }
 0x187   : > { %3796 = vmatprep.subr.bf16.mxu0 %v4882_v29  ;;  %v4579_v29 = vcombine.low %v506_v13, %v510_v14  ;;  %v4540_v13 = vcombine.high %v466_v7, %v470_v8  ;;  %v458_v15 = vld [vmem:[%s5653_s24 + $0x10] sm:$0xff] }
 0x188   : > { %3836 = vmatpush2.bf16.msra.mxu1 %v5017_v28  ;;  %v462_v16 = vld [vmem:[%s5653_s24 + $0x30] sm:$0xff] }
 0x189   : > { %3837 = vmatprep.subr.bf16.mxu1 %v5010_v30 }
 0x18a   : > { %3797 = vmatpush2.bf16.msra.mxu0 %v4881_v37  ;;  %v4700_v37 = vcombine.high %v626_v6, %v630_v27 }
 0x18b   : > { %3798 = vmatprep.subr.bf16.mxu0 %v4874_v39  ;;  %v494_v39 = vld [vmem:[%s5653_s24 + $0x130] sm:$0xff] }
 0x18c   : > { %3838 = vmatpush2.bf16.msra.mxu1 %v5009_v38  ;;  %v490_v38 = vld [vmem:[%s5653_s24 + $0x110] sm:$0xff] }
 0x18d   : > { %3839 = vmatprep.subr.bf16.mxu1 %v5002_v40 }
 0x18e   : > { %3799 = vmatpush2.bf16.msra.mxu0 %v4873_v47  ;;  %v4571_v47 = vcombine.low %v498_v22, %v502_v24  ;;  %v4532_v22 = vcombine.high %v458_v15, %v462_v16 }
 0x18f   : > { %3800 = vmatprep.subr.bf16.mxu0 %v4866_v50  ;;  %v4699_v50 = vcombine.low %v626_v6, %v630_v27  ;;  %v582_v6 = vld [vmem:[%s5653_s24 + $0x3f0] sm:$0xff] }
 0x190   : > { %3840 = vmatpush2.bf16.msra.mxu1 %v5001_v49  ;;  %v706_v27 = vld [vmem:[%s5653_s24 + $0x7d0] sm:$0xff] }
 0x191   : > { %3841 = vmatprep.subr.bf16.mxu1 %v4994_v51  ;;  %v4564_v51 = vcombine.high %v490_v38, %v494_v39 }
 0x192   : > { %3801 = vmatpush2.bf16.msra.mxu0 %v4865_v54  ;;  %v610_v54 = vld [vmem:[%s5653_s24 + $0x4d0] sm:$0xff] }
 0x193   : > { %3802 = vmatprep.subr.bf16.mxu0 %v4858_v57  ;;  %v4563_v57 = vcombine.low %v490_v38, %v494_v39  ;;  %v698_v38 = vld [vmem:[%s5653_s24 + $0x790] sm:$0xff] }
 0x194   : > { %3842 = vmatpush2.bf16.msra.mxu1 %v4993_v56  ;;  %v614_v56 = vld [vmem:[%s5653_s24 + $0x4f0] sm:$0xff] }
 0x195   : > { %3843 = vmatprep.subr.bf16.mxu1 %v4986_v58  ;;  %v4691_v58 = vcombine.low %v618_v42, %v622_v44  ;;  %v4684_v61 = vcombine.high %v610_v54, %v614_v56  ;;  %v702_v39 = vld [vmem:[%s5653_s24 + $0x7b0] sm:$0xff] }
 0x196   : > { %3803 = vmatpush2.bf16.msra.mxu0 %v4857_v0  ;;  %v602_v0 = vld [vmem:[%s5653_s24 + $0x490] sm:$0xff] }
 0x197   : > { %3804 = vmatprep.subr.bf16.mxu0 %v4850_v2  ;;  %v4555_v2 = vcombine.low %v482_v53, %v486_v55 }
 0x198   : > { %3844 = vmatpush2.bf16.msra.mxu1 %v4985_v1  ;;  %v606_v1 = vld [vmem:[%s5653_s24 + $0x4b0] sm:$0xff] }
 0x199   : > { %3845 = vmatprep.subr.bf16.mxu1 %v4978_v3  ;;  %v4683_v3 = vcombine.low %v610_v54, %v614_v56  ;;  %v4676_v5 = vcombine.high %v602_v0, %v606_v1  ;;  %v554_v54 = vld [vmem:[%s5653_s24 + $0x310] sm:$0xff] }
 0x19a   : > { %3805 = vmatpush2.bf16.msra.mxu0 %v4849_v9  ;;  %v3562_v25 = vpop.f32.mrf.mxu0  ;;  %v594_v9 = vld [vmem:[%s5653_s24 + $0x450] sm:$0xff] }
 0x19b   : > { %3856 = vmatprep.subr.bf16.mxu0 %v4588_v11  ;;  %v4547_v11 = vcombine.low %v474_v62, %v478_v63  ;;  %v558_v56 = vld [vmem:[%s5653_s24 + $0x330] sm:$0xff] }
 0x19c   : > { %3846 = vmatpush2.bf16.msra.mxu1 %v4977_v10  ;;  %v3603_v28 = vpop.f32.mrf.mxu1  ;;  %v3564_v32 = vpop.f32.mrf.mxu0  ;;  %v598_v10 = vld [vmem:[%s5653_s24 + $0x470] sm:$0xff]  ;;  %v4628_v62 = vcombine.high %v554_v54, %v558_v56 }
 0x19d   : > { %3897 = vmatprep.subr.bf16.mxu1 %v4716_v59  ;;  %3807 = vmatmul.mubr.bf16.vlgmr.msra.gmra.mxu0 %v5953_v43  ;;  %v6103_v30 = vadd.f32 %v3603_v28, %v3562_v25  ;;  %v4675_v59 = vcombine.low %v602_v0, %v606_v1  ;;  %v4668_v14 = vcombine.high %v594_v9, %v598_v10  ;;  %v578_v25 = vld [vmem:[%s5653_s24 + $0x3d0] sm:$0xff] }
 0x19e   : > { %3857 = vmatpush1.bf16.msra.mxu0 %v4587_v17  ;;  %v3605_v36 = vpop.f32.mrf.mxu1  ;;  %3888 = vmatprep.mubr.bf16.mxu0 %v5759_v23  ;;  %v3566_v41 = vpop.f32.mrf.mxu0  ;;  %v586_v17 = vld [vmem:[%s5653_s24 + $0x410] sm:$0xff] }
 0x19f   : > { %3848 = vmatmul.mubr.bf16.vlgmr.msra.gmra.mxu1 %v5959_v46  ;;  %3858 = vmatprep.subr.bf16.mxu0 %v4580_v19  ;;  %v6108_v40 = vadd.f32 %v3605_v36, %v3564_v32  ;;  %v4539_v19 = vcombine.low %v466_v7, %v470_v8  ;;  %v710_v28 = vld [vmem:[%s5653_s24 + $0x7f0] sm:$0xff]  ;;  %v4651_v41 = vcombine.low %v578_v25, %v582_v6 }
 0x1a0   : > { %3898 = vmatpush1.bf16.msra.mxu1 %v4715_v18  ;;  %3929 = vmatprep.mubr.bf16.mxu1 %v5770_v31  ;;  %v3607_v45 = vpop.f32.mrf.mxu1  ;;  %v3567_v49 = vpop.f32.mrf.mxu0  ;;  %v590_v18 = vld [vmem:[%s5653_s24 + $0x430] sm:$0xff]  ;;  %v4779_v42 = vcombine.low %v706_v27, %v710_v28 }
 0x1a1   : > { %3899 = vmatprep.subr.bf16.mxu1 %v4708_v20  ;;  %v4667_v20 = vcombine.low %v594_v9, %v598_v10  ;;  %v4660_v24 = vcombine.high %v586_v17, %v590_v18  ;;  %v4659_v32 = vcombine.low %v586_v17, %v590_v18  ;;  %v570_v36 = vld [vmem:[%s5653_s24 + $0x390] sm:$0xff]  ;;  %v4772_v45 = vcombine.high %v698_v38, %v702_v39 }
 0x1a2   : > { %3859 = vmatpush1.bf16.msra.mxu0 %v4579_v29  ;;  %v3608_v52 = vpop.f32.mrf.mxu1  ;;  %v4531_v29 = vcombine.low %v458_v15, %v462_v16  ;;  %v566_v49 = vld [vmem:[%s5653_s24 + $0x370] sm:$0xff] }
 0x1a3   : > { %3860 = vmatprep.subr.bf16.mxu0 %v4572_v35  ;;  %v4780_v35 = vcombine.high %v706_v27, %v710_v28  ;;  %v546_v0 = vld [vmem:[%s5653_s24 + $0x2d0] sm:$0xff] }
 0x1a4   : > { %3900 = vmatpush1.bf16.msra.mxu1 %v4707_v33  ;;  %v4652_v33 = vcombine.high %v578_v25, %v582_v6  ;;  %v550_v1 = vld [vmem:[%s5653_s24 + $0x2f0] sm:$0xff] }
 0x1a5   : > { %3901 = vmatprep.subr.bf16.mxu1 %v4700_v37  ;;  %v574_v37 = vld [vmem:[%s5653_s24 + $0x3b0] sm:$0xff]  ;;  %v4620_v7 = vcombine.high %v546_v0, %v550_v1 }
 0x1a6   : > { %3861 = vmatpush1.bf16.msra.mxu0 %v4571_v47  ;;  %v4644_v44 = vcombine.high %v570_v36, %v574_v37  ;;  %v562_v47 = vld [vmem:[%s5653_s24 + $0x350] sm:$0xff]  ;;  %v4643_v52 = vcombine.low %v570_v36, %v574_v37 }
 0x1a7   : > { %3862 = vmatprep.subr.bf16.mxu0 %v4564_v51  ;;  %v694_v51 = vld [vmem:[%s5653_s24 + $0x770] sm:$0xff]  ;;  %v4636_v53 = vcombine.high %v562_v47, %v566_v49 }
 0x1a8   : > { %3902 = vmatpush1.bf16.msra.mxu1 %v4699_v50  ;;  %v690_v50 = vld [vmem:[%s5653_s24 + $0x750] sm:$0xff] }
 0x1a9   : > { %3903 = vmatprep.subr.bf16.mxu1 %v4692_v48  ;;  %v4771_v48 = vcombine.low %v698_v38, %v702_v39  ;;  %v4764_v55 = vcombine.high %v690_v50, %v694_v51  ;;  %v538_v9 = vld [vmem:[%s5653_s24 + $0x290] sm:$0xff] }
 0x1aa   : > { %3863 = vmatpush1.bf16.msra.mxu0 %v4563_v57  ;;  %v682_v57 = vld [vmem:[%s5653_s24 + $0x710] sm:$0xff] }
 0x1ab   : > { %3864 = vmatprep.subr.bf16.mxu0 %v4556_v60  ;;  %v4635_v60 = vcombine.low %v562_v47, %v566_v49  ;;  %v542_v10 = vld [vmem:[%s5653_s24 + $0x2b0] sm:$0xff] }
 0x1ac   : > { %3904 = vmatpush1.bf16.msra.mxu1 %v4691_v58  ;;  %v686_v58 = vld [vmem:[%s5653_s24 + $0x730] sm:$0xff]  ;;  %v4612_v15 = vcombine.high %v538_v9, %v542_v10 }
 0x1ad   : > { %3905 = vmatprep.subr.bf16.mxu1 %v4684_v61  ;;  %v4763_v61 = vcombine.low %v690_v50, %v694_v51  ;;  %v4756_v63 = vcombine.high %v682_v57, %v686_v58  ;;  %v530_v17 = vld [vmem:[%s5653_s24 + $0x250] sm:$0xff] }
 0x1ae   : > { %3865 = vmatpush1.bf16.msra.mxu0 %v4555_v2  ;;  %v674_v2 = vld [vmem:[%s5653_s24 + $0x6d0] sm:$0xff] }
 0x1af   : > { %3866 = vmatprep.subr.bf16.mxu0 %v4548_v4  ;;  %v4627_v4 = vcombine.low %v554_v54, %v558_v56  ;;  %v534_v18 = vld [vmem:[%s5653_s24 + $0x270] sm:$0xff] }
 0x1b0   : > { %3906 = vmatpush1.bf16.msra.mxu1 %v4683_v3  ;;  %v678_v3 = vld [vmem:[%s5653_s24 + $0x6f0] sm:$0xff]  ;;  %v4604_v25 = vcombine.high %v530_v17, %v534_v18 }
 0x1b1   : > { %3907 = vmatprep.subr.bf16.mxu1 %v4676_v5  ;;  %v4755_v5 = vcombine.low %v682_v57, %v686_v58  ;;  %v4748_v8 = vcombine.high %v674_v2, %v678_v3  ;;  %v522_v27 = vld [vmem:[%s5653_s24 + $0x210] sm:$0xff] }
 0x1b2   : > { %3867 = vmatpush1.bf16.msra.mxu0 %v4547_v11  ;;  %v666_v11 = vld [vmem:[%s5653_s24 + $0x690] sm:$0xff] }
 0x1b3   : > { %3868 = vmatprep.subr.bf16.mxu0 %v4540_v13  ;;  %v4619_v13 = vcombine.low %v546_v0, %v550_v1  ;;  %v526_v28 = vld [vmem:[%s5653_s24 + $0x230] sm:$0xff] }
 0x1b4   : > { %3908 = vmatpush1.bf16.msra.mxu1 %v4675_v59  ;;  %v670_v59 = vld [vmem:[%s5653_s24 + $0x6b0] sm:$0xff]  ;;  %v4596_v36 = vcombine.high %v522_v27, %v526_v28 }
 0x1b5   : > { %3909 = vmatprep.subr.bf16.mxu1 %v4668_v14  ;;  %v4747_v14 = vcombine.low %v674_v2, %v678_v3  ;;  %v4740_v16 = vcombine.high %v666_v11, %v670_v59  ;;  %v770_v38 = vld [vmem:[%s5653_s24 + $0x9d0] sm:$0xff] }
 0x1b6   : > { %3869 = vmatpush1.bf16.msra.mxu0 %v4539_v19  ;;  %v658_v19 = vld [vmem:[%s5653_s24 + $0x650] sm:$0xff] }
 0x1b7   : > { %3870 = vmatprep.subr.bf16.mxu0 %v4532_v22  ;;  %v4611_v22 = vcombine.low %v538_v9, %v542_v10  ;;  %v774_v39 = vld [vmem:[%s5653_s24 + $0x9f0] sm:$0xff] }
 0x1b8   : > { %3910 = vmatpush1.bf16.msra.mxu1 %v4667_v20  ;;  %v662_v20 = vld [vmem:[%s5653_s24 + $0x670] sm:$0xff]  ;;  %v4844_v47 = vcombine.high %v770_v38, %v774_v39 }
 0x1b9   : > { %3911 = vmatprep.subr.bf16.mxu1 %v4660_v24  ;;  %v4739_v24 = vcombine.low %v666_v11, %v670_v59  ;;  %v4732_v6 = vcombine.high %v658_v19, %v662_v20  ;;  %v762_v50 = vld [vmem:[%s5653_s24 + $0x990] sm:$0xff] }
 0x1ba   : > { %3871 = vmatpush1.bf16.msra.mxu0 %v4531_v29  ;;  %v650_v29 = vld [vmem:[%s5653_s24 + $0x610] sm:$0xff] }
 0x1bb   : > { %3872 = vmatprep.subr.bf16.mxu0 %v4652_v33  ;;  %v4603_v33 = vcombine.low %v530_v17, %v534_v18  ;;  %v766_v51 = vld [vmem:[%s5653_s24 + $0x9b0] sm:$0xff] }
 0x1bc   : > { %3912 = vmatpush1.bf16.msra.mxu1 %v4659_v32  ;;  %v654_v32 = vld [vmem:[%s5653_s24 + $0x630] sm:$0xff]  ;;  %v4836_v54 = vcombine.high %v762_v50, %v766_v51  ;;  %v4835_v1 = vcombine.low %v762_v50, %v766_v51 }
 0x1bd   : > { %3913 = vmatprep.subr.bf16.mxu1 %v4780_v35  ;;  %v4731_v35 = vcombine.low %v658_v19, %v662_v20  ;;  %v4724_v37 = vcombine.high %v650_v29, %v654_v32  ;;  %v754_v57 = vld [vmem:[%s5653_s24 + $0x950] sm:$0xff] }
 0x1be   : > { %3873 = vmatpush2.bf16.msra.mxu0 %v4651_v41  ;;  %v898_v41 = vld [vmem:[%s5653_s24 + $0xdd0] sm:$0xff] }
 0x1bf   : > { %3874 = vmatprep.subr.bf16.mxu0 %v4644_v44  ;;  %v4595_v44 = vcombine.low %v522_v27, %v526_v28  ;;  %v758_v58 = vld [vmem:[%s5653_s24 + $0x970] sm:$0xff] }
 0x1c0   : > { %3914 = vmatpush2.bf16.msra.mxu1 %v4779_v42  ;;  %v902_v42 = vld [vmem:[%s5653_s24 + $0xdf0] sm:$0xff] }
 0x1c1   : > { %3915 = vmatprep.subr.bf16.mxu1 %v4772_v45  ;;  %v4723_v45 = vcombine.low %v650_v29, %v654_v32  ;;  %v4972_v49 = vcombine.high %v898_v41, %v902_v42  ;;  %v746_v9 = vld [vmem:[%s5653_s24 + $0x910] sm:$0xff] }
 0x1c2   : > { %3875 = vmatpush2.bf16.msra.mxu0 %v4643_v52  ;;  %v890_v52 = vld [vmem:[%s5653_s24 + $0xd90] sm:$0xff] }
 0x1c3   : > { %3876 = vmatprep.subr.bf16.mxu0 %v4636_v53  ;;  %v4843_v53 = vcombine.low %v770_v38, %v774_v39  ;;  %v750_v10 = vld [vmem:[%s5653_s24 + $0x930] sm:$0xff] }
 0x1c4   : > { %3916 = vmatpush2.bf16.msra.mxu1 %v4771_v48  ;;  %v894_v48 = vld [vmem:[%s5653_s24 + $0xdb0] sm:$0xff]  ;;  %v4820_v18 = vcombine.high %v746_v9, %v750_v10  ;;  %v4819_v27 = vcombine.low %v746_v9, %v750_v10 }
 0x1c5   : > { %3917 = vmatprep.subr.bf16.mxu1 %v4764_v55  ;;  %v4971_v55 = vcombine.low %v898_v41, %v902_v42  ;;  %v4964_v56 = vcombine.high %v890_v52, %v894_v48  ;;  %v4963_v3 = vcombine.low %v890_v52, %v894_v48  ;;  %v874_v59 = vld [vmem:[%s5653_s24 + $0xd10] sm:$0xff] }
 0x1c6   : > { %3877 = vmatpush2.bf16.msra.mxu0 %v4635_v60  ;;  %v954_v9 = vld [vmem:[%s5653_s24 + $0xf90] sm:$0xff] }
 0x1c7   : > { %3878 = vmatprep.subr.bf16.mxu0 %v4628_v62  ;;  %v886_v62 = vld [vmem:[%s5653_s24 + $0xd70] sm:$0xff] }
 0x1c8   : > { %3918 = vmatpush2.bf16.msra.mxu1 %v4763_v61  ;;  %v882_v61 = vld [vmem:[%s5653_s24 + $0xd50] sm:$0xff] }
 0x1c9   : > { %3919 = vmatprep.subr.bf16.mxu1 %v4756_v63  ;;  %v4955_v17 = vcombine.low %v882_v61, %v886_v62  ;;  %v958_v10 = vld [vmem:[%s5653_s24 + $0xfb0] sm:$0xff] }
 0x1ca   : > { %3879 = vmatpush2.bf16.msra.mxu0 %v4627_v4  ;;  %v4828_v4 = vcombine.high %v754_v57, %v758_v58 }
 0x1cb   : > { %3880 = vmatprep.subr.bf16.mxu0 %v4620_v7 }
 0x1cc   : > { %3920 = vmatpush2.bf16.msra.mxu1 %v4755_v5 }
 0x1cd   : > { %3921 = vmatprep.subr.bf16.mxu1 %v4748_v8 }
 0x1ce   : > { %3881 = vmatpush2.bf16.msra.mxu0 %v4619_v13  ;;  %v878_v13 = vld [vmem:[%s5653_s24 + $0xd30] sm:$0xff] }
 0x1cf   : > { %3882 = vmatprep.subr.bf16.mxu0 %v4612_v15  ;;  %v4948_v20 = vcombine.high %v874_v59, %v878_v13  ;;  %v4947_v28 = vcombine.low %v874_v59, %v878_v13 }
 0x1d0   : > { %3922 = vmatpush2.bf16.msra.mxu1 %v4747_v14 }
 0x1d1   : > { %3923 = vmatprep.subr.bf16.mxu1 %v4740_v16 }
 0x1d2   : > { %3883 = vmatpush2.bf16.msra.mxu0 %v4611_v22  ;;  %v738_v22 = vld [vmem:[%s5653_s24 + $0x8d0] sm:$0xff] }
 0x1d3   : > { %3884 = vmatprep.subr.bf16.mxu0 %v4604_v25  ;;  %v866_v25 = vld [vmem:[%s5653_s24 + $0xcd0] sm:$0xff] }
 0x1d4   : > { %3924 = vmatpush2.bf16.msra.mxu1 %v4739_v24  ;;  %v742_v24 = vld [vmem:[%s5653_s24 + $0x8f0] sm:$0xff] }
 0x1d5   : > { %3925 = vmatprep.subr.bf16.mxu1 %v4732_v6  ;;  %v870_v6 = vld [vmem:[%s5653_s24 + $0xcf0] sm:$0xff]  ;;  %v4812_v29 = vcombine.high %v738_v22, %v742_v24  ;;  %v4811_v38 = vcombine.low %v738_v22, %v742_v24 }
 0x1d6   : > { %3885 = vmatpush2.bf16.msra.mxu0 %v4603_v33  ;;  %v4940_v32 = vcombine.high %v866_v25, %v870_v6  ;;  %v730_v33 = vld [vmem:[%s5653_s24 + $0x890] sm:$0xff]  ;;  %v4939_v39 = vcombine.low %v866_v25, %v870_v6 }
 0x1d7   : > { %3886 = vmatprep.subr.bf16.mxu0 %v4596_v36  ;;  %v858_v36 = vld [vmem:[%s5653_s24 + $0xc90] sm:$0xff] }
 0x1d8   : > { %3926 = vmatpush2.bf16.msra.mxu1 %v4731_v35  ;;  %v734_v35 = vld [vmem:[%s5653_s24 + $0x8b0] sm:$0xff] }
 0x1d9   : > { %3927 = vmatprep.subr.bf16.mxu1 %v4724_v37  ;;  %v862_v37 = vld [vmem:[%s5653_s24 + $0xcb0] sm:$0xff]  ;;  %v4804_v41 = vcombine.high %v730_v33, %v734_v35  ;;  %v4803_v50 = vcombine.low %v730_v33, %v734_v35 }
 0x1da   : > { %3887 = vmatpush2.bf16.msra.mxu0 %v4595_v44  ;;  %v4932_v42 = vcombine.high %v858_v36, %v862_v37  ;;  %v722_v44 = vld [vmem:[%s5653_s24 + $0x850] sm:$0xff]  ;;  %v4931_v51 = vcombine.low %v858_v36, %v862_v37 }
 0x1db   : > { %3938 = vmatprep.subr.bf16.mxu0 %v4844_v47  ;;  %v850_v47 = vld [vmem:[%s5653_s24 + $0xc50] sm:$0xff] }
 0x1dc   : > { %3928 = vmatpush2.bf16.msra.mxu1 %v4723_v45  ;;  %v726_v45 = vld [vmem:[%s5653_s24 + $0x870] sm:$0xff] }
 0x1dd   : > { %3979 = vmatprep.subr.bf16.mxu1 %v4972_v49  ;;  %v3644_v60 = vpop.f32.mrf.mxu0  ;;  %3889 = vmatmul.mubr.bf16.vlgmr.msra.gmra.mxu0 %v5871_v21  ;;  %v854_v49 = vld [vmem:[%s5653_s24 + $0xc70] sm:$0xff]  ;;  %v4796_v52 = vcombine.high %v722_v44, %v726_v45 }
 0x1de   : > { %v3645_v63 = vadd.f32 %v3644_v60, %v6103_v30  ;;  %3939 = vmatpush1.bf16.msra.mxu0 %v4843_v53  ;;  %v4956_v30 = vcombine.high %v882_v61, %v886_v62  ;;  %3970 = vmatprep.mubr.bf16.mxu0 %v5883_v34  ;;  %v4924_v48 = vcombine.high %v850_v47, %v854_v49  ;;  %v714_v53 = vld [vmem:[%s5653_s24 + $0x810] sm:$0xff] }
 0x1df   : > { %v3685_v0 = vpop.f32.mrf.mxu1  ;;  %3930 = vmatmul.mubr.bf16.vlgmr.msra.gmra.mxu1 %v5877_v26  ;;  %v3646_v2 = vpop.f32.mrf.mxu0  ;;  %3940 = vmatprep.subr.bf16.mxu0 %v4836_v54  ;;  %v842_v54 = vld [vmem:[%s5653_s24 + $0xc10] sm:$0xff] }
 0x1e0   : > { %3980 = vmatpush1.bf16.msra.mxu1 %v4971_v55  ;;  %v6176_v5 = vadd.f32 %v3685_v0, %v3645_v63  ;;  %v3647_v7 = vadd.f32 %v3646_v2, %v6108_v40  ;;  %4011 = vmatprep.mubr.bf16.mxu1 %v5888_v12  ;;  %v4827_v40 = vcombine.low %v754_v57, %v758_v58  ;;  %v718_v55 = vld [vmem:[%s5653_s24 + $0x830] sm:$0xff] }
 0x1e1   : > { %v3687_v8 = vpop.f32.mrf.mxu1  ;;  %3981 = vmatprep.subr.bf16.mxu1 %v4964_v56  ;;  %v3648_v11 = vpop.f32.mrf.mxu0  ;;  %v846_v56 = vld [vmem:[%s5653_s24 + $0xc30] sm:$0xff]  ;;  %v4795_v57 = vcombine.low %v722_v44, %v726_v45  ;;  %v4923_v58 = vcombine.low %v850_v47, %v854_v49  ;;  %v4788_v60 = vcombine.high %v714_v53, %v718_v55  ;;  %v4787_v2 = vcombine.low %v714_v53, %v718_v55 }
 0x1e2   : > { %v6185_v14 = vadd.f32 %v3687_v8, %v3647_v7  ;;  %3941 = vmatpush1.bf16.msra.mxu0 %v4835_v1  ;;  %v4916_v61 = vcombine.high %v842_v54, %v846_v56  ;;  %v834_v62 = vld [vmem:[%s5653_s24 + $0xbd0] sm:$0xff] }
 0x1e3   : > { %v3689_v15 = vpop.f32.mrf.mxu1  ;;  %v3649_v16 = vpop.f32.mrf.mxu0  ;;  %3942 = vmatprep.subr.bf16.mxu0 %v4828_v4  ;;  %v838_v63 = vld [vmem:[%s5653_s24 + $0xbf0] sm:$0xff] }
 0x1e4   : > { %3982 = vmatpush1.bf16.msra.mxu1 %v4963_v3  ;;  %v962_v0 = vld [vmem:[%s5653_s24 + $0xfd0] sm:$0xff]  ;;  %v4915_v3 = vcombine.low %v842_v54, %v846_v56  ;;  %v4908_v4 = vcombine.high %v834_v62, %v838_v63  ;;  %v4907_v11 = vcombine.low %v834_v62, %v838_v63  ;;  %v5028_v15 = vcombine.high %v954_v9, %v958_v10 }
 0x1e5   : > { %v3690_v19 = vpop.f32.mrf.mxu1  ;;  %3983 = vmatprep.subr.bf16.mxu1 %v4956_v30  ;;  %v966_v1 = vld [vmem:[%s5653_s24 + $0xff0] sm:$0xff] }
 0x1e6   : > { %3943 = vmatpush1.bf16.msra.mxu0 %v4827_v40  ;;  %v5036_v7 = vcombine.high %v962_v0, %v966_v1  ;;  %v826_v8 = vld [vmem:[%s5653_s24 + $0xb90] sm:$0xff]  ;;  %v5035_v59 = vcombine.low %v962_v0, %v966_v1 }
 0x1e7   : > { %3944 = vmatprep.subr.bf16.mxu0 %v4820_v18  ;;  %v830_v30 = vld [vmem:[%s5653_s24 + $0xbb0] sm:$0xff] }
 0x1e8   : > { %3984 = vmatpush1.bf16.msra.mxu1 %v4955_v17  ;;  %v4900_v13 = vcombine.high %v826_v8, %v830_v30  ;;  %v818_v40 = vld [vmem:[%s5653_s24 + $0xb50] sm:$0xff]  ;;  %v4899_v19 = vcombine.low %v826_v8, %v830_v30 }
 0x1e9   : > { %3985 = vmatprep.subr.bf16.mxu1 %v4948_v20  ;;  %v822_v16 = vld [vmem:[%s5653_s24 + $0xb70] sm:$0xff]  ;;  %v5027_v20 = vcombine.low %v954_v9, %v958_v10  ;;  %v515_v9 = vld [vmem:[%s5653_s24 + $0x1d8] sm:$0xff] }
 0x1ea   : > { %3945 = vmatpush1.bf16.msra.mxu0 %v4819_v27  ;;  %v946_v17 = vld [vmem:[%s5653_s24 + $0xf50] sm:$0xff]  ;;  %v4892_v22 = vcombine.high %v818_v40, %v822_v16  ;;  %v519_v10 = vld [vmem:[%s5653_s24 + $0x1f8] sm:$0xff] }
 0x1eb   : > { %3946 = vmatprep.subr.bf16.mxu0 %v4812_v29  ;;  %v950_v18 = vld [vmem:[%s5653_s24 + $0xf70] sm:$0xff]  ;;  %v4891_v29 = vcombine.low %v818_v40, %v822_v16  ;;  %v4590_v40 = vcombine.high %v515_v9, %v519_v10 }
 0x1ec   : > { %3986 = vmatpush1.bf16.msra.mxu1 %v4947_v28  ;;  %v5020_v24 = vcombine.high %v946_v17, %v950_v18  ;;  %v810_v25 = vld [vmem:[%s5653_s24 + $0xb10] sm:$0xff] }
 0x1ed   : > { %3987 = vmatprep.subr.bf16.mxu1 %v4940_v32  ;;  %v814_v6 = vld [vmem:[%s5653_s24 + $0xb30] sm:$0xff]  ;;  %v5019_v32 = vcombine.low %v946_v17, %v950_v18  ;;  %v507_v17 = vld [vmem:[%s5653_s24 + $0x198] sm:$0xff] }
 0x1ee   : > { %3947 = vmatpush1.bf16.msra.mxu0 %v4811_v38  ;;  %v938_v27 = vld [vmem:[%s5653_s24 + $0xf10] sm:$0xff]  ;;  %v4884_v33 = vcombine.high %v810_v25, %v814_v6  ;;  %v511_v18 = vld [vmem:[%s5653_s24 + $0x1b8] sm:$0xff] }
 0x1ef   : > { %3948 = vmatprep.subr.bf16.mxu0 %v4804_v41  ;;  %v942_v28 = vld [vmem:[%s5653_s24 + $0xf30] sm:$0xff]  ;;  %v4883_v41 = vcombine.low %v810_v25, %v814_v6  ;;  %v4582_v25 = vcombine.high %v507_v17, %v511_v18 }
 0x1f0   : > { %3988 = vmatpush1.bf16.msra.mxu1 %v4939_v39  ;;  %v5012_v35 = vcombine.high %v938_v27, %v942_v28  ;;  %v802_v36 = vld [vmem:[%s5653_s24 + $0xad0] sm:$0xff] }
 0x1f1   : > { %3989 = vmatprep.subr.bf16.mxu1 %v4932_v42  ;;  %v806_v37 = vld [vmem:[%s5653_s24 + $0xaf0] sm:$0xff]  ;;  %v5011_v42 = vcombine.low %v938_v27, %v942_v28  ;;  %v499_v27 = vld [vmem:[%s5653_s24 + $0x158] sm:$0xff] }
 0x1f2   : > { %3949 = vmatpush1.bf16.msra.mxu0 %v4803_v50  ;;  %v930_v38 = vld [vmem:[%s5653_s24 + $0xed0] sm:$0xff]  ;;  %v4876_v44 = vcombine.high %v802_v36, %v806_v37  ;;  %v503_v28 = vld [vmem:[%s5653_s24 + $0x178] sm:$0xff] }
 0x1f3   : > { %3950 = vmatprep.subr.bf16.mxu0 %v4796_v52  ;;  %v934_v39 = vld [vmem:[%s5653_s24 + $0xef0] sm:$0xff]  ;;  %v4875_v52 = vcombine.low %v802_v36, %v806_v37  ;;  %v4581_v36 = vcombine.low %v507_v17, %v511_v18 }
 0x1f4   : > { %3990 = vmatpush1.bf16.msra.mxu1 %v4931_v51  ;;  %v5004_v45 = vcombine.high %v930_v38, %v934_v39  ;;  %v794_v47 = vld [vmem:[%s5653_s24 + $0xa90] sm:$0xff] }
 0x1f5   : > { %3991 = vmatprep.subr.bf16.mxu1 %v4924_v48  ;;  %v798_v49 = vld [vmem:[%s5653_s24 + $0xab0] sm:$0xff]  ;;  %v5003_v48 = vcombine.low %v930_v38, %v934_v39 }
 0x1f6   : > { %3951 = vmatpush1.bf16.msra.mxu0 %v4795_v57  ;;  %v922_v50 = vld [vmem:[%s5653_s24 + $0xe90] sm:$0xff]  ;;  %v4868_v53 = vcombine.high %v794_v47, %v798_v49 }
 0x1f7   : > { %3952 = vmatprep.subr.bf16.mxu0 %v4788_v60  ;;  %v926_v51 = vld [vmem:[%s5653_s24 + $0xeb0] sm:$0xff]  ;;  %v4867_v60 = vcombine.low %v794_v47, %v798_v49  ;;  %v495_v47 = vld [vmem:[%s5653_s24 + $0x138] sm:$0xff] }
 0x1f8   : > { %3992 = vmatpush1.bf16.msra.mxu1 %v4923_v58  ;;  %v4996_v55 = vcombine.high %v922_v50, %v926_v51  ;;  %v786_v54 = vld [vmem:[%s5653_s24 + $0xa50] sm:$0xff] }
 0x1f9   : > { %3993 = vmatprep.subr.bf16.mxu1 %v4916_v61  ;;  %v790_v56 = vld [vmem:[%s5653_s24 + $0xa70] sm:$0xff]  ;;  %v4995_v61 = vcombine.low %v922_v50, %v926_v51  ;;  %v619_v51 = vld [vmem:[%s5653_s24 + $0x518] sm:$0xff] }
 0x1fa   : > { %3953 = vmatpush1.bf16.msra.mxu0 %v4787_v2  ;;  %v914_v57 = vld [vmem:[%s5653_s24 + $0xe50] sm:$0xff]  ;;  %v4860_v62 = vcombine.high %v786_v54, %v790_v56 }
 0x1fb   : > { %3954 = vmatprep.subr.bf16.mxu0 %v4908_v4  ;;  %v918_v58 = vld [vmem:[%s5653_s24 + $0xe70] sm:$0xff]  ;;  %v4859_v4 = vcombine.low %v786_v54, %v790_v56 }
 0x1fc   : > { %3994 = vmatpush1.bf16.msra.mxu1 %v4915_v3  ;;  %v4988_v63 = vcombine.high %v914_v57, %v918_v58  ;;  %v778_v0 = vld [vmem:[%s5653_s24 + $0xa10] sm:$0xff] }
 0x1fd   : > { %3995 = vmatprep.subr.bf16.mxu1 %v5036_v7  ;;  %v782_v1 = vld [vmem:[%s5653_s24 + $0xa30] sm:$0xff]  ;;  %v4987_v7 = vcombine.low %v914_v57, %v918_v58  ;;  %v483_v58 = vld [vmem:[%s5653_s24 + $0xd8] sm:$0xff] }
 0x1fe   : > { %3955 = vmatpush2.bf16.msra.mxu0 %v4907_v11  ;;  %v906_v2 = vld [vmem:[%s5653_s24 + $0xe10] sm:$0xff]  ;;  %v4852_v8 = vcombine.high %v778_v0, %v782_v1  ;;  %v643_v11 = vld [vmem:[%s5653_s24 + $0x5d8] sm:$0xff] }
 0x1ff   : > { %3956 = vmatprep.subr.bf16.mxu0 %v4900_v13  ;;  %v910_v3 = vld [vmem:[%s5653_s24 + $0xe30] sm:$0xff]  ;;  %v4851_v13 = vcombine.low %v778_v0, %v782_v1 }
 0x200   : > { %3996 = vmatpush2.bf16.msra.mxu1 %v5035_v59  ;;  %v4980_v30 = vcombine.high %v906_v2, %v910_v3  ;;  %v647_v59 = vld [vmem:[%s5653_s24 + $0x5f8] sm:$0xff] }
 0x201   : > { %3997 = vmatprep.subr.bf16.mxu1 %v5028_v15  ;;  %v4979_v15 = vcombine.low %v906_v2, %v910_v3  ;;  %v4718_v16 = vcombine.high %v643_v11, %v647_v59  ;;  %v475_v2 = vld [vmem:[%s5653_s24 + $0x98] sm:$0xff] }
 0x202   : > { %3957 = vmatpush2.bf16.msra.mxu0 %v4899_v19  ;;  %v635_v19 = vld [vmem:[%s5653_s24 + $0x598] sm:$0xff] }
 0x203   : > { %3958 = vmatprep.subr.bf16.mxu0 %v4892_v22  ;;  %v4589_v22 = vcombine.low %v515_v9, %v519_v10  ;;  %v479_v3 = vld [vmem:[%s5653_s24 + $0xb8] sm:$0xff] }
 0x204   : > { %3998 = vmatpush2.bf16.msra.mxu1 %v5027_v20  ;;  %v639_v20 = vld [vmem:[%s5653_s24 + $0x5b8] sm:$0xff]  ;;  %v4550_v9 = vcombine.high %v475_v2, %v479_v3 }
 0x205   : > { %3999 = vmatprep.subr.bf16.mxu1 %v5020_v24  ;;  %v4717_v24 = vcombine.low %v643_v11, %v647_v59  ;;  %v4710_v6 = vcombine.high %v635_v19, %v639_v20  ;;  %v4709_v39 = vcombine.low %v635_v19, %v639_v20  ;;  %v467_v11 = vld [vmem:[%s5653_s24 + $0x58] sm:$0xff] }
 0x206   : > { %3959 = vmatpush2.bf16.msra.mxu0 %v4891_v29  ;;  %v471_v59 = vld [vmem:[%s5653_s24 + $0x78] sm:$0xff] }
 0x207   : > { %3960 = vmatprep.subr.bf16.mxu0 %v4884_v33  ;;  %v631_v33 = vld [vmem:[%s5653_s24 + $0x578] sm:$0xff]  ;;  %v4542_v17 = vcombine.high %v467_v11, %v471_v59 }
 0x208   : > { %4000 = vmatpush2.bf16.msra.mxu1 %v5019_v32  ;;  %v627_v32 = vld [vmem:[%s5653_s24 + $0x558] sm:$0xff] }
 0x209   : > { %4001 = vmatprep.subr.bf16.mxu1 %v5012_v35  ;;  %v4701_v54 = vcombine.low %v627_v32, %v631_v33  ;;  %v459_v19 = vld [vmem:[%s5653_s24 + $0x18] sm:$0xff] }
 0x20a   : > { %3961 = vmatpush2.bf16.msra.mxu0 %v4883_v41  ;;  %v4574_v41 = vcombine.high %v499_v27, %v503_v28  ;;  %v463_v20 = vld [vmem:[%s5653_s24 + $0x38] sm:$0xff] }
 0x20b   : > { %3962 = vmatprep.subr.bf16.mxu0 %v4876_v44  ;;  %v4702_v44 = vcombine.high %v627_v32, %v631_v33  ;;  %v583_v32 = vld [vmem:[%s5653_s24 + $0x3f8] sm:$0xff] }
 0x20c   : > { %4002 = vmatpush2.bf16.msra.mxu1 %v5011_v42  ;;  %v707_v33 = vld [vmem:[%s5653_s24 + $0x7d8] sm:$0xff] }
 0x20d   : > { %4003 = vmatprep.subr.bf16.mxu1 %v5004_v45  ;;  %v491_v45 = vld [vmem:[%s5653_s24 + $0x118] sm:$0xff] }
 0x20e   : > { %3963 = vmatpush2.bf16.msra.mxu0 %v4875_v52  ;;  %v623_v52 = vld [vmem:[%s5653_s24 + $0x538] sm:$0xff]  ;;  %v4566_v56 = vcombine.high %v491_v45, %v495_v47 }
 0x20f   : > { %3964 = vmatprep.subr.bf16.mxu0 %v4868_v53  ;;  %v4573_v53 = vcombine.low %v499_v27, %v503_v28  ;;  %v4694_v57 = vcombine.high %v619_v51, %v623_v52  ;;  %v4534_v27 = vcombine.high %v459_v19, %v463_v20 }
 0x210   : > { %4004 = vmatpush2.bf16.msra.mxu1 %v5003_v48 }
 0x211   : > { %4005 = vmatprep.subr.bf16.mxu1 %v4996_v55 }
 0x212   : > { %3965 = vmatpush2.bf16.msra.mxu0 %v4867_v60  ;;  %v487_v60 = vld [vmem:[%s5653_s24 + $0xf8] sm:$0xff] }
 0x213   : > { %3966 = vmatprep.subr.bf16.mxu0 %v4860_v62  ;;  %v615_v62 = vld [vmem:[%s5653_s24 + $0x4f8] sm:$0xff]  ;;  %v4558_v0 = vcombine.high %v483_v58, %v487_v60 }
 0x214   : > { %4006 = vmatpush2.bf16.msra.mxu1 %v4995_v61  ;;  %v611_v61 = vld [vmem:[%s5653_s24 + $0x4d8] sm:$0xff] }
 0x215   : > { %4007 = vmatprep.subr.bf16.mxu1 %v4988_v63  ;;  %v4693_v63 = vcombine.low %v619_v51, %v623_v52  ;;  %v4686_v1 = vcombine.high %v611_v61, %v615_v62 }
 0x216   : > { %3967 = vmatpush2.bf16.msra.mxu0 %v4859_v4  ;;  %v603_v4 = vld [vmem:[%s5653_s24 + $0x498] sm:$0xff] }
 0x217   : > { %3968 = vmatprep.subr.bf16.mxu0 %v4852_v8  ;;  %v4557_v8 = vcombine.low %v483_v58, %v487_v60 }
 0x218   : > { %4008 = vmatpush2.bf16.msra.mxu1 %v4987_v7  ;;  %v607_v7 = vld [vmem:[%s5653_s24 + $0x4b8] sm:$0xff] }
 0x219   : > { %4009 = vmatprep.subr.bf16.mxu1 %v4980_v30  ;;  %v4685_v30 = vcombine.low %v611_v61, %v615_v62  ;;  %v4678_v10 = vcombine.high %v603_v4, %v607_v7  ;;  %v555_v61 = vld [vmem:[%s5653_s24 + $0x318] sm:$0xff] }
 0x21a   : > { %3969 = vmatpush2.bf16.msra.mxu0 %v4851_v13  ;;  %v595_v13 = vld [vmem:[%s5653_s24 + $0x458] sm:$0xff] }
 0x21b   : > { %4020 = vmatprep.subr.bf16.mxu0 %v4590_v40  ;;  %v4549_v40 = vcombine.low %v475_v2, %v479_v3  ;;  %v559_v62 = vld [vmem:[%s5653_s24 + $0x338] sm:$0xff] }
 0x21c   : > { %4010 = vmatpush2.bf16.msra.mxu1 %v4979_v15  ;;  %v599_v15 = vld [vmem:[%s5653_s24 + $0x478] sm:$0xff]  ;;  %v4630_v2 = vcombine.high %v555_v61, %v559_v62 }
 0x21d   : > { %4061 = vmatprep.subr.bf16.mxu1 %v4718_v16  ;;  %v3726_v29 = vpop.f32.mrf.mxu0  ;;  %3971 = vmatmul.mubr.bf16.vlgmr.msra.gmra.mxu0 %v5953_v43  ;;  %v4677_v16 = vcombine.low %v603_v4, %v607_v7  ;;  %v4670_v18 = vcombine.high %v595_v13, %v599_v15  ;;  %v547_v4 = vld [vmem:[%s5653_s24 + $0x2d8] sm:$0xff] }
 0x21e   : > { %4021 = vmatpush1.bf16.msra.mxu0 %v4589_v22  ;;  %4052 = vmatprep.mubr.bf16.mxu0 %v5759_v23  ;;  %v587_v22 = vld [vmem:[%s5653_s24 + $0x418] sm:$0xff] }
 0x21f   : > { %v3767_v35 = vpop.f32.mrf.mxu1  ;;  %4012 = vmatmul.mubr.bf16.vlgmr.msra.gmra.mxu1 %v5959_v46  ;;  %v3728_v38 = vpop.f32.mrf.mxu0  ;;  %4022 = vmatprep.subr.bf16.mxu0 %v4582_v25  ;;  %v4541_v25 = vcombine.low %v467_v11, %v471_v59  ;;  %v551_v7 = vld [vmem:[%s5653_s24 + $0x2f8] sm:$0xff] }
 0x220   : > { %v6249_v37 = vadd.f32 %v3767_v35, %v3726_v29  ;;  %4062 = vmatpush1.bf16.msra.mxu1 %v4717_v24  ;;  %4093 = vmatprep.mubr.bf16.mxu1 %v5770_v31  ;;  %v4565_v31 = vcombine.low %v491_v45, %v495_v47  ;;  %v591_v24 = vld [vmem:[%s5653_s24 + $0x438] sm:$0xff]  ;;  %v4622_v11 = vcombine.high %v547_v4, %v551_v7 }
 0x221   : > { %v3769_v42 = vpop.f32.mrf.mxu1  ;;  %4063 = vmatprep.subr.bf16.mxu1 %v4710_v6  ;;  %v3730_v50 = vpop.f32.mrf.mxu0  ;;  %v4669_v6 = vcombine.low %v595_v13, %v599_v15  ;;  %v4662_v28 = vcombine.high %v587_v22, %v591_v24  ;;  %v579_v29 = vld [vmem:[%s5653_s24 + $0x3d8] sm:$0xff] }
 0x222   : > { %v6254_v49 = vadd.f32 %v3769_v42, %v3728_v38  ;;  %4023 = vmatpush1.bf16.msra.mxu0 %v4581_v36  ;;  %v711_v35 = vld [vmem:[%s5653_s24 + $0x7f8] sm:$0xff]  ;;  %v4533_v36 = vcombine.low %v459_v19, %v463_v20  ;;  %v4661_v38 = vcombine.low %v587_v22, %v591_v24  ;;  %v4653_v50 = vcombine.low %v579_v29, %v583_v32 }
 0x223   : > { %v3771_v48 = vpop.f32.mrf.mxu1  ;;  %v3731_v55 = vpop.f32.mrf.mxu0  ;;  %4024 = vmatprep.subr.bf16.mxu0 %v4574_v41  ;;  %v4782_v41 = vcombine.high %v707_v33, %v711_v35  ;;  %v571_v42 = vld [vmem:[%s5653_s24 + $0x398] sm:$0xff]  ;;  %v4781_v51 = vcombine.low %v707_v33, %v711_v35 }
 0x224   : > { %4064 = vmatpush1.bf16.msra.mxu1 %v4709_v39  ;;  %v4654_v39 = vcombine.high %v579_v29, %v583_v32  ;;  %v699_v45 = vld [vmem:[%s5653_s24 + $0x798] sm:$0xff] }
 0x225   : > { %v3772_v23 = vpop.f32.mrf.mxu1  ;;  %4065 = vmatprep.subr.bf16.mxu1 %v4702_v44  ;;  %v575_v44 = vld [vmem:[%s5653_s24 + $0x3b8] sm:$0xff] }
 0x226   : > { %4025 = vmatpush1.bf16.msra.mxu0 %v4573_v53  ;;  %v703_v47 = vld [vmem:[%s5653_s24 + $0x7b8] sm:$0xff]  ;;  %v4646_v52 = vcombine.high %v571_v42, %v575_v44  ;;  %v4645_v23 = vcombine.low %v571_v42, %v575_v44 }
 0x227   : > { %4026 = vmatprep.subr.bf16.mxu0 %v4566_v56  ;;  %v4774_v48 = vcombine.high %v699_v45, %v703_v47  ;;  %v563_v53 = vld [vmem:[%s5653_s24 + $0x358] sm:$0xff] }
 0x228   : > { %4066 = vmatpush1.bf16.msra.mxu1 %v4701_v54  ;;  %v567_v55 = vld [vmem:[%s5653_s24 + $0x378] sm:$0xff] }
 0x229   : > { %4067 = vmatprep.subr.bf16.mxu1 %v4694_v57  ;;  %v691_v54 = vld [vmem:[%s5653_s24 + $0x758] sm:$0xff]  ;;  %v4773_v57 = vcombine.low %v699_v45, %v703_v47  ;;  %v4638_v58 = vcombine.high %v563_v53, %v567_v55 }
 0x22a   : > { %4027 = vmatpush1.bf16.msra.mxu0 %v4565_v31  ;;  %v695_v56 = vld [vmem:[%s5653_s24 + $0x778] sm:$0xff] }
 0x22b   : > { %4028 = vmatprep.subr.bf16.mxu0 %v4558_v0  ;;  %v4766_v60 = vcombine.high %v691_v54, %v695_v56  ;;  %v683_v31 = vld [vmem:[%s5653_s24 + $0x718] sm:$0xff]  ;;  %v4637_v0 = vcombine.low %v563_v53, %v567_v55 }
 0x22c   : > { %4068 = vmatpush1.bf16.msra.mxu1 %v4693_v63  ;;  %v687_v63 = vld [vmem:[%s5653_s24 + $0x738] sm:$0xff] }
 0x22d   : > { %4069 = vmatprep.subr.bf16.mxu1 %v4686_v1  ;;  %v4765_v1 = vcombine.low %v691_v54, %v695_v56  ;;  %v4758_v3 = vcombine.high %v683_v31, %v687_v63  ;;  %v539_v13 = vld [vmem:[%s5653_s24 + $0x298] sm:$0xff] }
 0x22e   : > { %4029 = vmatpush1.bf16.msra.mxu0 %v4557_v8  ;;  %v675_v8 = vld [vmem:[%s5653_s24 + $0x6d8] sm:$0xff] }
 0x22f   : > { %4030 = vmatprep.subr.bf16.mxu0 %v4550_v9  ;;  %v4629_v9 = vcombine.low %v555_v61, %v559_v62  ;;  %v543_v15 = vld [vmem:[%s5653_s24 + $0x2b8] sm:$0xff] }
 0x230   : > { %4070 = vmatpush1.bf16.msra.mxu1 %v4685_v30  ;;  %v679_v30 = vld [vmem:[%s5653_s24 + $0x6f8] sm:$0xff]  ;;  %v4614_v19 = vcombine.high %v539_v13, %v543_v15 }
 0x231   : > { %4071 = vmatprep.subr.bf16.mxu1 %v4678_v10  ;;  %v4757_v10 = vcombine.low %v683_v31, %v687_v63  ;;  %v4750_v59 = vcombine.high %v675_v8, %v679_v30  ;;  %v531_v22 = vld [vmem:[%s5653_s24 + $0x258] sm:$0xff] }
 0x232   : > { %4031 = vmatpush1.bf16.msra.mxu0 %v4549_v40  ;;  %v667_v40 = vld [vmem:[%s5653_s24 + $0x698] sm:$0xff] }
 0x233   : > { %4032 = vmatprep.subr.bf16.mxu0 %v4542_v17  ;;  %v4621_v17 = vcombine.low %v547_v4, %v551_v7  ;;  %v535_v24 = vld [vmem:[%s5653_s24 + $0x278] sm:$0xff] }
 0x234   : > { %4072 = vmatpush1.bf16.msra.mxu1 %v4677_v16  ;;  %v671_v16 = vld [vmem:[%s5653_s24 + $0x6b8] sm:$0xff]  ;;  %v4606_v29 = vcombine.high %v531_v22, %v535_v24 }
 0x235   : > { %4073 = vmatprep.subr.bf16.mxu1 %v4670_v18  ;;  %v4749_v18 = vcombine.low %v675_v8, %v679_v30  ;;  %v4742_v20 = vcombine.high %v667_v40, %v671_v16  ;;  %v523_v33 = vld [vmem:[%s5653_s24 + $0x218] sm:$0xff] }
 0x236   : > { %4033 = vmatpush1.bf16.msra.mxu0 %v4541_v25  ;;  %v659_v25 = vld [vmem:[%s5653_s24 + $0x658] sm:$0xff] }
 0x237   : > { %4034 = vmatprep.subr.bf16.mxu0 %v4534_v27  ;;  %v4613_v27 = vcombine.low %v539_v13, %v543_v15  ;;  %v527_v35 = vld [vmem:[%s5653_s24 + $0x238] sm:$0xff] }
 0x238   : > { %4074 = vmatpush1.bf16.msra.mxu1 %v4669_v6  ;;  %v663_v6 = vld [vmem:[%s5653_s24 + $0x678] sm:$0xff]  ;;  %v4598_v42 = vcombine.high %v523_v33, %v527_v35 }
 0x239   : > { %4075 = vmatprep.subr.bf16.mxu1 %v4662_v28  ;;  %v4741_v28 = vcombine.low %v667_v40, %v671_v16  ;;  %v4734_v32 = vcombine.high %v659_v25, %v663_v6  ;;  %v771_v45 = vld [vmem:[%s5653_s24 + $0x9d8] sm:$0xff] }
 0x23a   : > { %4035 = vmatpush1.bf16.msra.mxu0 %v4533_v36  ;;  %v651_v36 = vld [vmem:[%s5653_s24 + $0x618] sm:$0xff] }
 0x23b   : > { %4036 = vmatprep.subr.bf16.mxu0 %v4654_v39  ;;  %v4605_v39 = vcombine.low %v531_v22, %v535_v24  ;;  %v775_v47 = vld [vmem:[%s5653_s24 + $0x9f8] sm:$0xff] }
 0x23c   : > { %4076 = vmatpush1.bf16.msra.mxu1 %v4661_v38  ;;  %v655_v38 = vld [vmem:[%s5653_s24 + $0x638] sm:$0xff]  ;;  %v4846_v53 = vcombine.high %v771_v45, %v775_v47 }
 0x23d   : > { %4077 = vmatprep.subr.bf16.mxu1 %v4782_v41  ;;  %v4733_v41 = vcombine.low %v659_v25, %v663_v6  ;;  %v4726_v44 = vcombine.high %v651_v36, %v655_v38  ;;  %v763_v54 = vld [vmem:[%s5653_s24 + $0x998] sm:$0xff] }
 0x23e   : > { %4037 = vmatpush2.bf16.msra.mxu0 %v4653_v50  ;;  %v899_v50 = vld [vmem:[%s5653_s24 + $0xdd8] sm:$0xff] }
 0x23f   : > { %4038 = vmatprep.subr.bf16.mxu0 %v4646_v52  ;;  %v4597_v52 = vcombine.low %v523_v33, %v527_v35  ;;  %v767_v56 = vld [vmem:[%s5653_s24 + $0x9b8] sm:$0xff] }
 0x240   : > { %4078 = vmatpush2.bf16.msra.mxu1 %v4781_v51  ;;  %v903_v51 = vld [vmem:[%s5653_s24 + $0xdf8] sm:$0xff]  ;;  %v4838_v61 = vcombine.high %v763_v54, %v767_v56  ;;  %v4837_v7 = vcombine.low %v763_v54, %v767_v56 }
 0x241   : > { %4079 = vmatprep.subr.bf16.mxu1 %v4774_v48  ;;  %v4725_v48 = vcombine.low %v651_v36, %v655_v38  ;;  %v4974_v55 = vcombine.high %v899_v50, %v903_v51  ;;  %v755_v31 = vld [vmem:[%s5653_s24 + $0x958] sm:$0xff] }
 0x242   : > { %4039 = vmatpush2.bf16.msra.mxu0 %v4645_v23  ;;  %v891_v23 = vld [vmem:[%s5653_s24 + $0xd98] sm:$0xff] }
 0x243   : > { %4040 = vmatprep.subr.bf16.mxu0 %v4638_v58  ;;  %v4845_v58 = vcombine.low %v771_v45, %v775_v47  ;;  %v759_v63 = vld [vmem:[%s5653_s24 + $0x978] sm:$0xff] }
 0x244   : > { %4080 = vmatpush2.bf16.msra.mxu1 %v4773_v57  ;;  %v895_v57 = vld [vmem:[%s5653_s24 + $0xdb8] sm:$0xff] }
 0x245   : > { %4081 = vmatprep.subr.bf16.mxu1 %v4766_v60  ;;  %v4973_v60 = vcombine.low %v899_v50, %v903_v51  ;;  %v4966_v62 = vcombine.high %v891_v23, %v895_v57  ;;  %v4965_v30 = vcombine.low %v891_v23, %v895_v57  ;;  %v751_v13 = vld [vmem:[%s5653_s24 + $0x938] sm:$0xff] }
 0x246   : > { %4041 = vmatpush2.bf16.msra.mxu0 %v4637_v0  ;;  %v875_v15 = vld [vmem:[%s5653_s24 + $0xd18] sm:$0xff] }
 0x247   : > { %4042 = vmatprep.subr.bf16.mxu0 %v4630_v2  ;;  %v887_v2 = vld [vmem:[%s5653_s24 + $0xd78] sm:$0xff] }
 0x248   : > { %4082 = vmatpush2.bf16.msra.mxu1 %v4765_v1  ;;  %v883_v1 = vld [vmem:[%s5653_s24 + $0xd58] sm:$0xff] }
 0x249   : > { %4083 = vmatprep.subr.bf16.mxu1 %v4758_v3  ;;  %v879_v40 = vld [vmem:[%s5653_s24 + $0xd38] sm:$0xff] }
 0x24a   : > { %4043 = vmatpush2.bf16.msra.mxu0 %v4629_v9  ;;  %v4830_v9 = vcombine.high %v755_v31, %v759_v63  ;;  %v4950_v22 = vcombine.high %v875_v15, %v879_v40  ;;  %v739_v24 = vld [vmem:[%s5653_s24 + $0x8d8] sm:$0xff] }
 0x24b   : > { %4044 = vmatprep.subr.bf16.mxu0 %v4622_v11  ;;  %v867_v25 = vld [vmem:[%s5653_s24 + $0xcd8] sm:$0xff] }
 0x24c   : > { %4084 = vmatpush2.bf16.msra.mxu1 %v4757_v10  ;;  %v871_v6 = vld [vmem:[%s5653_s24 + $0xcf8] sm:$0xff] }
 0x24d   : > { %4085 = vmatprep.subr.bf16.mxu1 %v4750_v59  ;;  %v747_v59 = vld [vmem:[%s5653_s24 + $0x918] sm:$0xff] }
 0x24e   : > { %4045 = vmatpush2.bf16.msra.mxu0 %v4621_v17  ;;  %v731_v33 = vld [vmem:[%s5653_s24 + $0x898] sm:$0xff] }
 0x24f   : > { %4046 = vmatprep.subr.bf16.mxu0 %v4614_v19  ;;  %v4957_v19 = vcombine.low %v883_v1, %v887_v2  ;;  %v735_v35 = vld [vmem:[%s5653_s24 + $0x8b8] sm:$0xff] }
 0x250   : > { %4086 = vmatpush2.bf16.msra.mxu1 %v4749_v18  ;;  %v859_v36 = vld [vmem:[%s5653_s24 + $0xc98] sm:$0xff] }
 0x251   : > { %4087 = vmatprep.subr.bf16.mxu1 %v4742_v20  ;;  %v4822_v20 = vcombine.high %v747_v59, %v751_v13  ;;  %v863_v38 = vld [vmem:[%s5653_s24 + $0xcb8] sm:$0xff] }
 0x252   : > { %4047 = vmatpush2.bf16.msra.mxu0 %v4613_v27  ;;  %v4821_v27 = vcombine.low %v747_v59, %v751_v13  ;;  %v723_v45 = vld [vmem:[%s5653_s24 + $0x858] sm:$0xff] }
 0x253   : > { %4048 = vmatprep.subr.bf16.mxu0 %v4606_v29  ;;  %v727_v47 = vld [vmem:[%s5653_s24 + $0x878] sm:$0xff] }
 0x254   : > { %4088 = vmatpush2.bf16.msra.mxu1 %v4741_v28  ;;  %v4949_v28 = vcombine.low %v875_v15, %v879_v40  ;;  %v851_v50 = vld [vmem:[%s5653_s24 + $0xc58] sm:$0xff] }
 0x255   : > { %4089 = vmatprep.subr.bf16.mxu1 %v4734_v32  ;;  %v4942_v32 = vcombine.high %v867_v25, %v871_v6  ;;  %v855_v51 = vld [vmem:[%s5653_s24 + $0xc78] sm:$0xff] }
 0x256   : > { %4049 = vmatpush2.bf16.msra.mxu0 %v4605_v39  ;;  %v715_v54 = vld [vmem:[%s5653_s24 + $0x818] sm:$0xff] }
 0x257   : > { %4050 = vmatprep.subr.bf16.mxu0 %v4598_v42  ;;  %v4806_v42 = vcombine.high %v731_v33, %v735_v35  ;;  %v719_v56 = vld [vmem:[%s5653_s24 + $0x838] sm:$0xff] }
 0x258   : > { %4090 = vmatpush2.bf16.msra.mxu1 %v4733_v41  ;;  %v4941_v41 = vcombine.low %v867_v25, %v871_v6  ;;  %v843_v23 = vld [vmem:[%s5653_s24 + $0xc18] sm:$0xff] }
 0x259   : > { %4091 = vmatprep.subr.bf16.mxu1 %v4726_v44  ;;  %v4934_v44 = vcombine.high %v859_v36, %v863_v38  ;;  %v847_v57 = vld [vmem:[%s5653_s24 + $0xc38] sm:$0xff] }
 0x25a   : > { %4051 = vmatpush2.bf16.msra.mxu0 %v4597_v52  ;;  %v4805_v52 = vcombine.low %v731_v33, %v735_v35  ;;  %v823_v15 = vld [vmem:[%s5653_s24 + $0xb78] sm:$0xff] }
 0x25b   : > { %4102 = vmatprep.subr.bf16.mxu0 %v4846_v53  ;;  %v4798_v53 = vcombine.high %v723_v45, %v727_v47  ;;  %v947_v40 = vld [vmem:[%s5653_s24 + $0xf58] sm:$0xff] }
 0x25c   : > { %4092 = vmatpush2.bf16.msra.mxu1 %v4725_v48  ;;  %v4933_v48 = vcombine.low %v859_v36, %v863_v38  ;;  %v931_v33 = vld [vmem:[%s5653_s24 + $0xed8] sm:$0xff] }
 0x25d   : > { %4143 = vmatprep.subr.bf16.mxu1 %v4974_v55  ;;  %v3808_v0 = vpop.f32.mrf.mxu0  ;;  %4053 = vmatmul.mubr.bf16.vlgmr.msra.gmra.mxu0 %v5871_v21  ;;  %v4926_v55 = vcombine.high %v851_v50, %v855_v51  ;;  %v935_v35 = vld [vmem:[%s5653_s24 + $0xef8] sm:$0xff] }
 0x25e   : > { %v3809_v3 = vadd.f32 %v3808_v0, %v6249_v37  ;;  %4103 = vmatpush1.bf16.msra.mxu0 %v4845_v58  ;;  %v4958_v37 = vcombine.high %v883_v1, %v887_v2  ;;  %4134 = vmatprep.mubr.bf16.mxu0 %v5883_v34  ;;  %v4797_v58 = vcombine.low %v723_v45, %v727_v47  ;;  %v963_v0 = vld [vmem:[%s5653_s24 + $0xfd8] sm:$0xff] }
 0x25f   : > { %v3849_v4 = vpop.f32.mrf.mxu1  ;;  %4094 = vmatmul.mubr.bf16.vlgmr.msra.gmra.mxu1 %v5877_v26  ;;  %v3810_v8 = vpop.f32.mrf.mxu0  ;;  %4104 = vmatprep.subr.bf16.mxu0 %v4838_v61  ;;  %v4790_v61 = vcombine.high %v715_v54, %v719_v56  ;;  %v967_v1 = vld [vmem:[%s5653_s24 + $0xff8] sm:$0xff]  ;;  %v4789_v2 = vcombine.low %v715_v54, %v719_v56 }
 0x260   : > { %4144 = vmatpush1.bf16.msra.mxu1 %v4973_v60  ;;  %v6322_v10 = vadd.f32 %v3849_v4, %v3809_v3  ;;  %v3811_v21 = vadd.f32 %v3810_v8, %v6254_v49  ;;  %4175 = vmatprep.mubr.bf16.mxu1 %v5888_v12  ;;  %v4829_v49 = vcombine.low %v755_v31, %v759_v63  ;;  %v743_v12 = vld [vmem:[%s5653_s24 + $0x8f8] sm:$0xff] }
 0x261   : > { %v3851_v11 = vpop.f32.mrf.mxu1  ;;  %4145 = vmatprep.subr.bf16.mxu1 %v4966_v62  ;;  %v3812_v26 = vpop.f32.mrf.mxu0  ;;  %v4814_v29 = vcombine.high %v739_v24, %v743_v12  ;;  %v4813_v39 = vcombine.low %v739_v24, %v743_v12  ;;  %v4925_v60 = vcombine.low %v851_v50, %v855_v51  ;;  %v4918_v62 = vcombine.high %v843_v23, %v847_v57  ;;  %v835_v31 = vld [vmem:[%s5653_s24 + $0xbd8] sm:$0xff] }
 0x262   : > { %v6331_v16 = vadd.f32 %v3851_v11, %v3811_v21  ;;  %4105 = vmatpush1.bf16.msra.mxu0 %v4837_v7  ;;  %v839_v63 = vld [vmem:[%s5653_s24 + $0xbf8] sm:$0xff]  ;;  %v4917_v3 = vcombine.low %v843_v23, %v847_v57  ;;  %v5038_v7 = vcombine.high %v963_v0, %v967_v1  ;;  %v5005_v51 = vcombine.low %v931_v33, %v935_v35 }
 0x263   : > { %v3853_v17 = vpop.f32.mrf.mxu1  ;;  %v3813_v18 = vpop.f32.mrf.mxu0  ;;  %4106 = vmatprep.subr.bf16.mxu0 %v4830_v9  ;;  %v4910_v4 = vcombine.high %v835_v31, %v839_v63  ;;  %v827_v8 = vld [vmem:[%s5653_s24 + $0xb98] sm:$0xff]  ;;  %v4909_v11 = vcombine.low %v835_v31, %v839_v63 }
 0x264   : > { %4146 = vmatpush1.bf16.msra.mxu1 %v4965_v30  ;;  %v831_v30 = vld [vmem:[%s5653_s24 + $0xbb8] sm:$0xff] }
 0x265   : > { %v3854_v34 = vpop.f32.mrf.mxu1  ;;  %4147 = vmatprep.subr.bf16.mxu1 %v4958_v37  ;;  %v955_v9 = vld [vmem:[%s5653_s24 + $0xf98] sm:$0xff]  ;;  %v5037_v37 = vcombine.low %v963_v0, %v967_v1  ;;  %v4902_v59 = vcombine.high %v827_v8, %v831_v30 }
 0x266   : > { %4107 = vmatpush1.bf16.msra.mxu0 %v4829_v49  ;;  %v959_v21 = vld [vmem:[%s5653_s24 + $0xfb8] sm:$0xff]  ;;  %v4901_v49 = vcombine.low %v827_v8, %v831_v30 }
 0x267   : > { %4108 = vmatprep.subr.bf16.mxu0 %v4822_v20  ;;  %v5030_v13 = vcombine.high %v955_v9, %v959_v21  ;;  %v819_v26 = vld [vmem:[%s5653_s24 + $0xb58] sm:$0xff]  ;;  %v5029_v18 = vcombine.low %v955_v9, %v959_v21 }
 0x268   : > { %4148 = vmatpush1.bf16.msra.mxu1 %v4957_v19  ;;  %v951_v17 = vld [vmem:[%s5653_s24 + $0xf78] sm:$0xff]  ;;  %v4894_v19 = vcombine.high %v819_v26, %v823_v15  ;;  %v4893_v25 = vcombine.low %v819_v26, %v823_v15 }
 0x269   : > { %4149 = vmatprep.subr.bf16.mxu1 %v4950_v22  ;;  %v5022_v20 = vcombine.high %v947_v40, %v951_v17  ;;  %v811_v34 = vld [vmem:[%s5653_s24 + $0xb18] sm:$0xff]  ;;  %v5021_v6 = vcombine.low %v947_v40, %v951_v17 }
 0x26a   : > { %4109 = vmatpush1.bf16.msra.mxu0 %v4821_v27  ;;  %v815_v22 = vld [vmem:[%s5653_s24 + $0xb38] sm:$0xff] }
 0x26b   : > { %4110 = vmatprep.subr.bf16.mxu0 %v4814_v29  ;;  %v939_v24 = vld [vmem:[%s5653_s24 + $0xf18] sm:$0xff]  ;;  %v4886_v27 = vcombine.high %v811_v34, %v815_v22  ;;  %v4885_v36 = vcombine.low %v811_v34, %v815_v22 }
 0x26c   : > { %4150 = vmatpush1.bf16.msra.mxu1 %v4949_v28  ;;  %v943_v12 = vld [vmem:[%s5653_s24 + $0xf38] sm:$0xff] }
 0x26d   : > { %4151 = vmatprep.subr.bf16.mxu1 %v4942_v32  ;;  %v5014_v28 = vcombine.high %v939_v24, %v943_v12  ;;  %v803_v29 = vld [vmem:[%s5653_s24 + $0xad8] sm:$0xff]  ;;  %v5013_v38 = vcombine.low %v939_v24, %v943_v12 }
 0x26e   : > { %4111 = vmatpush1.bf16.msra.mxu0 %v4813_v39  ;;  %v807_v32 = vld [vmem:[%s5653_s24 + $0xaf8] sm:$0xff] }
 0x26f   : > { %4112 = vmatprep.subr.bf16.mxu0 %v4806_v42  ;;  %v4878_v39 = vcombine.high %v803_v29, %v807_v32  ;;  %v795_v42 = vld [vmem:[%s5653_s24 + $0xa98] sm:$0xff]  ;;  %v4877_v50 = vcombine.low %v803_v29, %v807_v32 }
 0x270   : > { %4152 = vmatpush1.bf16.msra.mxu1 %v4941_v41  ;;  %v5006_v41 = vcombine.high %v931_v33, %v935_v35  ;;  %v923_v45 = vld [vmem:[%s5653_s24 + $0xe98] sm:$0xff] }
 0x271   : > { %4153 = vmatprep.subr.bf16.mxu1 %v4934_v44  ;;  %v799_v44 = vld [vmem:[%s5653_s24 + $0xab8] sm:$0xff] }
 0x272   : > { %4113 = vmatpush1.bf16.msra.mxu0 %v4805_v52  ;;  %v927_v47 = vld [vmem:[%s5653_s24 + $0xeb8] sm:$0xff]  ;;  %v4870_v52 = vcombine.high %v795_v42, %v799_v44  ;;  %v4869_v23 = vcombine.low %v795_v42, %v799_v44 }
 0x273   : > { %4114 = vmatprep.subr.bf16.mxu0 %v4798_v53  ;;  %v787_v53 = vld [vmem:[%s5653_s24 + $0xa58] sm:$0xff]  ;;  %v4997_v57 = vcombine.low %v923_v45, %v927_v47 }
 0x274   : > { %4154 = vmatpush1.bf16.msra.mxu1 %v4933_v48  ;;  %v4998_v48 = vcombine.high %v923_v45, %v927_v47  ;;  %v915_v54 = vld [vmem:[%s5653_s24 + $0xe58] sm:$0xff] }
 0x275   : > { %4155 = vmatprep.subr.bf16.mxu1 %v4926_v55  ;;  %v791_v55 = vld [vmem:[%s5653_s24 + $0xa78] sm:$0xff] }
 0x276   : > { %4115 = vmatpush1.bf16.msra.mxu0 %v4797_v58  ;;  %v919_v56 = vld [vmem:[%s5653_s24 + $0xe78] sm:$0xff]  ;;  %v4862_v58 = vcombine.high %v787_v53, %v791_v55  ;;  %v4861_v0 = vcombine.low %v787_v53, %v791_v55 }
 0x277   : > { %4116 = vmatprep.subr.bf16.mxu0 %v4790_v61  ;;  %v779_v61 = vld [vmem:[%s5653_s24 + $0xa18] sm:$0xff]  ;;  %v4989_v1 = vcombine.low %v915_v54, %v919_v56 }
 0x278   : > { %4156 = vmatpush1.bf16.msra.mxu1 %v4925_v60  ;;  %v4990_v60 = vcombine.high %v915_v54, %v919_v56  ;;  %v907_v31 = vld [vmem:[%s5653_s24 + $0xe18] sm:$0xff] }
 0x279   : > { %4157 = vmatprep.subr.bf16.mxu1 %v4918_v62  ;;  %v783_v62 = vld [vmem:[%s5653_s24 + $0xa38] sm:$0xff] }
 0x27a   : > { %4117 = vmatpush1.bf16.msra.mxu0 %v4789_v2  ;;  %v911_v63 = vld [vmem:[%s5653_s24 + $0xe38] sm:$0xff]  ;;  %v4854_v2 = vcombine.high %v779_v61, %v783_v62 }
 0x27b   : > { %4118 = vmatprep.subr.bf16.mxu0 %v4910_v4  ;;  %v4853_v4 = vcombine.low %v779_v61, %v783_v62 }
 0x27c   : > { %4158 = vmatpush1.bf16.msra.mxu1 %v4917_v3  ;;  %v4982_v3 = vcombine.high %v907_v31, %v911_v63 }
 0x27d   : > { %4159 = vmatprep.subr.bf16.mxu1 %v5038_v7  ;;  %v4981_v7 = vcombine.low %v907_v31, %v911_v63 }
 0x27e   : > { %4119 = vmatpush2.bf16.msra.mxu0 %v4909_v11 }
 0x27f   : > { %4120 = vmatprep.subr.bf16.mxu0 %v4902_v59 }
 0x280   : > { %4160 = vmatpush2.bf16.msra.mxu1 %v5037_v37 }
 0x281   : > { %4161 = vmatprep.subr.bf16.mxu1 %v5030_v13 }
 0x282   : > { %4121 = vmatpush2.bf16.msra.mxu0 %v4901_v49 }
 0x283   : > { %4122 = vmatprep.subr.bf16.mxu0 %v4894_v19 }
 0x284   : > { %4162 = vmatpush2.bf16.msra.mxu1 %v5029_v18 }
 0x285   : > { %4163 = vmatprep.subr.bf16.mxu1 %v5022_v20 }
 0x286   : > { %4123 = vmatpush2.bf16.msra.mxu0 %v4893_v25 }
 0x287   : > { %4124 = vmatprep.subr.bf16.mxu0 %v4886_v27 }
 0x288   : > { %4164 = vmatpush2.bf16.msra.mxu1 %v5021_v6 }
 0x289   : > { %4165 = vmatprep.subr.bf16.mxu1 %v5014_v28 }
 0x28a   : > { %4125 = vmatpush2.bf16.msra.mxu0 %v4885_v36 }
 0x28b   : > { %4126 = vmatprep.subr.bf16.mxu0 %v4878_v39 }
 0x28c   : > { %4166 = vmatpush2.bf16.msra.mxu1 %v5013_v38 }
 0x28d   : > { %4167 = vmatprep.subr.bf16.mxu1 %v5006_v41 }
 0x28e   : > { %4127 = vmatpush2.bf16.msra.mxu0 %v4877_v50 }
 0x28f   : > { %4128 = vmatprep.subr.bf16.mxu0 %v4870_v52 }
 0x290   : > { %4168 = vmatpush2.bf16.msra.mxu1 %v5005_v51 }
 0x291   : > { %4169 = vmatprep.subr.bf16.mxu1 %v4998_v48 }
 0x292   : > { %4129 = vmatpush2.bf16.msra.mxu0 %v4869_v23 }
 0x293   : > { %4130 = vmatprep.subr.bf16.mxu0 %v4862_v58 }
 0x294   : > { %4170 = vmatpush2.bf16.msra.mxu1 %v4997_v57 }
 0x295   : > { %4171 = vmatprep.subr.bf16.mxu1 %v4990_v60 }
 0x296   : > { %4131 = vmatpush2.bf16.msra.mxu0 %v4861_v0 }
 0x297   : > { %4132 = vmatprep.subr.bf16.mxu0 %v4854_v2 }
 0x298   : > { %4172 = vmatpush2.bf16.msra.mxu1 %v4989_v1 }
 0x299   : > { %4173 = vmatprep.subr.bf16.mxu1 %v4982_v3 }
 0x29a   : > { %4133 = vmatpush2.bf16.msra.mxu0 %v4853_v4 }
 0x29c   : > { %4174 = vmatpush2.bf16.msra.mxu1 %v4981_v7 }
 0x29d   : > { %v3890_v8 = vpop.f32.mrf.mxu0  ;;  %4135 = vmatmul.mubr.bf16.vlgmr.msra.gmra.mxu0 %v5953_v43 }
 0x29f   : > { %v3931_v30 = vpop.f32.mrf.mxu1  ;;  %4176 = vmatmul.mubr.bf16.vlgmr.msra.gmra.mxu1 %v5959_v46  ;;  %v3892_v21 = vpop.f32.mrf.mxu0 }
 0x2a0   : > { %v3932_v9 = vadd.f32 %v3931_v30, %v3890_v8 }
 0x2a1   : > { %v3933_v11 = vpop.f32.mrf.mxu1  ;;  %v3894_v59 = vpop.f32.mrf.mxu0 }
 0x2a2   : > { %v3934_v37 = vadd.f32 %v3933_v11, %v3892_v21 }
 0x2a3   : > { %v3935_v13 = vpop.f32.mrf.mxu1  ;;  %v3895_v26 = vpop.f32.mrf.mxu0 }
 0x2a5   : > { %v3936_v15 = vpop.f32.mrf.mxu1 }
 0x2dd   : > { %v3972_v40 = vpop.f32.mrf.mxu0 }
 0x2de   : > { %v3973_v17 = vadd.f32 %v3972_v40, %v3932_v9 }
 0x2df   : > { %v4013_v49 = vpop.f32.mrf.mxu1  ;;  %v3974_v18 = vpop.f32.mrf.mxu0 }
 0x2e0   : > { %v4014_v19 = vadd.f32 %v4013_v49, %v3973_v17  ;;  %v3975_v20 = vadd.f32 %v3974_v18, %v3934_v37 }
 0x2e1   : > { %v4015_v34 = vpop.f32.mrf.mxu1  ;;  %v3976_v22 = vpop.f32.mrf.mxu0 }
 0x2e2   : > { %v4016_v43 = vadd.f32 %v4015_v34, %v3975_v20 }
 0x2e3   : > { %v4017_v24 = vpop.f32.mrf.mxu1  ;;  %v3977_v12 = vpop.f32.mrf.mxu0 }
 0x2e5   : > { %v4018_v46 = vpop.f32.mrf.mxu1 }
 0x31d   : > { %v4054_v25 = vpop.f32.mrf.mxu0 }
 0x31f   : > { %v4095_v6 = vpop.f32.mrf.mxu1  ;;  %v4056_v28 = vpop.f32.mrf.mxu0 }
 0x320   : > { %v4096_v27 = vadd.f32 %v4095_v6, %v4054_v25 }
 0x321   : > { %v4097_v29 = vpop.f32.mrf.mxu1  ;;  %v4058_v32 = vpop.f32.mrf.mxu0 }
 0x322   : > { %v4098_v39 = vadd.f32 %v4097_v29, %v4056_v28 }
 0x323   : > { %v4099_v33 = vpop.f32.mrf.mxu1  ;;  %v4059_v35 = vpop.f32.mrf.mxu0 }
 0x325   : > { %v4100_v36 = vpop.f32.mrf.mxu1 }
 0x35d   : > { %v4136_v38 = vpop.f32.mrf.mxu0 }
 0x35e   : > { %v4137_v41 = vadd.f32 %v4136_v38, %v4096_v27 }
 0x35f   : > { %v4177_v42 = vpop.f32.mrf.mxu1  ;;  %v4138_v44 = vpop.f32.mrf.mxu0 }
 0x360   : > { %v4178_v45 = vadd.f32 %v4177_v42, %v4137_v41  ;;  %v4139_v47 = vadd.f32 %v4138_v44, %v4098_v39 }
 0x361   : > { %v4179_v50 = vpop.f32.mrf.mxu1  ;;  %v4140_v51 = vpop.f32.mrf.mxu0  ;;  %4186 = sbr.rel (%p5039_p10) target bundleno = 874 (0x36a), region = 48 }
 0x362   : > { %v4180_v52 = vadd.f32 %v4179_v50, %v4139_v47 }
 0x363   : > { %v4181_v48 = vpop.f32.mrf.mxu1  ;;  %v4141_v53 = vpop.f32.mrf.mxu0 }
 0x365   : > { %v4182_v55 = vpop.f32.mrf.mxu1 }
 0x366   : > { %4187 = vst [vmem:[#allocation3] sm:$0xff] %v6176_v5  ;;  %4188 = vst [vmem:[#allocation3 + $0x8] sm:$0xff] %v6185_v14 }
 0x367   : > { %4189 = vst [vmem:[#allocation3 + $0x28] sm:$0xff] %v6322_v10  ;;  %4190 = vst [vmem:[#allocation3 + $0x38] sm:$0xff] %v6331_v16 }
 0x368   : > { %4191 = vst [vmem:[#allocation3 + $0x10] sm:$0xff] %v4014_v19  ;;  %4192 = vst [vmem:[#allocation3 + $0x30] sm:$0xff] %v4016_v43 }
 0x369   : > { %4193 = vst [vmem:[#allocation3 + $0x18] sm:$0xff] %v4178_v45  ;;  %4194 = vst [vmem:[#allocation3 + $0x20] sm:$0xff] %v4180_v52 }
 0x36a PF: > { %p5040_p13 = scmp.ne.s32.totalorder %s370_s27, 0 }
 0x36c   : > { %4198 = sbr.rel (%p5040_p13) target bundleno = 888 (0x378), region = 52 }
 0x371   : > { %v4199_v54 = vld [vmem:[#allocation3] sm:$0xff]  ;;  %v4200_v56 = vld [vmem:[#allocation3 + $0x8] sm:$0xff]  ;;  %v4202_v61 = vld [vmem:[#allocation3 + $0x38] sm:$0xff] }
 0x372   : > { %v4201_v23 = vld [vmem:[#allocation3 + $0x28] sm:$0xff]  ;;  %v4207_v57 = vadd.f32 %v4199_v54, %v6176_v5  ;;  %v4208_v58 = vadd.f32 %v4200_v56, %v6185_v14  ;;  %v4203_v62 = vld [vmem:[#allocation3 + $0x10] sm:$0xff]  ;;  %v4210_v63 = vadd.f32 %v4202_v61, %v6331_v16  ;;  %v4205_v2 = vld [vmem:[#allocation3 + $0x18] sm:$0xff] }
 0x373   : > { %v4209_v60 = vadd.f32 %v4201_v23, %v6322_v10  ;;  %v4204_v31 = vld [vmem:[#allocation3 + $0x30] sm:$0xff]  ;;  %v4211_v0 = vadd.f32 %v4203_v62, %v4014_v19  ;;  %v4206_v3 = vld [vmem:[#allocation3 + $0x20] sm:$0xff]  ;;  %v4213_v4 = vadd.f32 %v4205_v2, %v4178_v45 }
 0x374   : > { %v4212_v1 = vadd.f32 %v4204_v31, %v4016_v43  ;;  %4215 = vst [vmem:[#allocation3] sm:$0xff] %v4207_v57  ;;  %4216 = vst [vmem:[#allocation3 + $0x8] sm:$0xff] %v4208_v58  ;;  %v4214_v7 = vadd.f32 %v4206_v3, %v4180_v52 }
 0x375   : > { %4217 = vst [vmem:[#allocation3 + $0x28] sm:$0xff] %v4209_v60  ;;  %4218 = vst [vmem:[#allocation3 + $0x38] sm:$0xff] %v4210_v63 }
 0x376   : > { %4219 = vst [vmem:[#allocation3 + $0x10] sm:$0xff] %v4211_v0  ;;  %4220 = vst [vmem:[#allocation3 + $0x30] sm:$0xff] %v4212_v1 }
 0x377   : > { %4221 = vst [vmem:[#allocation3 + $0x18] sm:$0xff] %v4213_v4  ;;  %4222 = vst [vmem:[#allocation3 + $0x20] sm:$0xff] %v4214_v7 }
 0x378 PF: > { %v4233_v5 = vlaneseq  ;;  %s6396_s24 = sld [smem:[#allocation8 + %s5693_s4]]  ;;  %p4322_p1 = scmp.eq.s32.totalorder %s374_s12, 0  ;;  %v4231_v10 = vld [vmem:[%s283_s30] sm:$0xff] }
 0x37a   : > { %v4234_v14 = vshrl.u32 %v4233_v5, 7  ;;  %p4323_p4 = pnand %p4322_p1, %p5711_p12 }
 0x37b   : > { %v4223_v16 = vld [vmem:[#allocation3] sm:$0xff]  ;;  %v4224_v11 = vld [vmem:[#allocation3 + $0x8] sm:$0xff] }
 0x37c   : > { %v4235_v8 = vsub.s32 0, %v4234_v14  ;;  %v4239_v30 = vsub.s32 1, %v4234_v14  ;;  %v4243_v9 = vsub.s32 2, %v4234_v14  ;;  %v4247_v21 = vsub.s32 3, %v4234_v14  ;;  %p6404_p11 = pneg %p4323_p4  ;;  %v4225_v37 = vld [vmem:[#allocation3 + $0x28] sm:$0xff]  ;;  %v4226_v40 = vld [vmem:[#allocation3 + $0x38] sm:$0xff] }
 0x37d   : > { %v4251_v59 = vsub.s32 4, %v4234_v14  ;;  %v4255_v13 = vsub.s32 5, %v4234_v14  ;;  %v4259_v26 = vsub.s32 6, %v4234_v14  ;;  %v4263_v15 = vsub.s32 7, %v4234_v14  ;;  %v4227_v20 = vld [vmem:[#allocation3 + $0x10] sm:$0xff] }
 0x37e   : > { %v4236_v17 = vrot.slane %v4231_v10, %v4235_v8  ;;  %v4240_v49 = vrot.slane %v4231_v10, %v4239_v30  ;;  %v4244_v18 = vrot.slane %v4231_v10, %v4243_v9  ;;  %v4248_v19 = vrot.slane %v4231_v10, %v4247_v21  ;;  %p4325_p3 = scmp.eq.s32.totalorder %s6396_s24, 0  ;;  %v4228_v43 = vld [vmem:[#allocation3 + $0x30] sm:$0xff]  ;;  %v4229_v6 = vld [vmem:[#allocation3 + $0x18] sm:$0xff]  ;;  %v4230_v29 = vld [vmem:[#allocation3 + $0x20] sm:$0xff] }
 0x37f   : > { %v4252_v34 = vrot.slane %v4231_v10, %v4251_v59  ;;  %v4256_v22 = vrot.slane %v4231_v10, %v4255_v13  ;;  %v4260_v24 = vrot.slane %v4231_v10, %v4259_v26  ;;  %v4264_v27 = vrot.slane %v4231_v10, %v4263_v15 }
 0x380   : > { %v4273_v12 = vadd.f32 %v4236_v17, %v4223_v16  ;;  %v4274_v46 = vadd.f32 %v4240_v49, %v4224_v11  ;;  %v4275_v25 = vadd.f32 %v4244_v18, %v4225_v37  ;;  %p6411_p6 = pnand %p4325_p3, %p6404_p11  ;;  %v4276_v28 = vadd.f32 %v4248_v19, %v4226_v40 }
 0x381   : > { %v4277_v32 = vadd.f32 %v4252_v34, %v4227_v20  ;;  %v4278_v33 = vadd.f32 %v4256_v22, %v4228_v43  ;;  %v4279_v35 = vadd.f32 %v4260_v24, %v4229_v6  ;;  %v4280_v41 = vadd.f32 %v4264_v27, %v4230_v29 }
 0x382   : > { %v4289_v36 = vmul.f32 0.70710677, %v4273_v12  ;;  %v4290_v38 = vmul.f32 0.70710677, %v4274_v46  ;;  %v4291_v39 = vmul.f32 0.70710677, %v4275_v25 }
 0x383   : > { %v4292_v42 = vmul.f32 0.70710677, %v4276_v28  ;;  %v4293_v44 = vmul.f32 0.70710677, %v4277_v32  ;;  %v4294_v45 = vmul.f32 0.70710677, %v4278_v33 }
 0x384   : > { %5162 = verf.f32 %v4289_v36  ;;  %v4295_v47 = vmul.f32 0.70710677, %v4279_v35  ;;  %v4296_v50 = vmul.f32 0.70710677, %v4280_v41  ;;  %v4281_v51 = vmul.f32 0.5, %v4273_v12 }
 0x385   : > { %5164 = verf.f32 %v4290_v38  ;;  %v4282_v48 = vmul.f32 0.5, %v4274_v46  ;;  %v4283_v55 = vmul.f32 0.5, %v4275_v25  ;;  %v4284_v23 = vmul.f32 0.5, %v4276_v28 }
 0x386   : > { %5166 = verf.f32 %v4291_v39  ;;  %v4285_v60 = vmul.f32 0.5, %v4277_v32  ;;  %v4286_v63 = vmul.f32 0.5, %v4278_v33  ;;  %v4287_v3 = vmul.f32 0.5, %v4279_v35 }
 0x387   : > { %5168 = verf.f32 %v4292_v42  ;;  %v4288_v14 = vmul.f32 0.5, %v4280_v41 }
 0x388   : > { %5170 = verf.f32 %v4293_v44 }
 0x389   : > { %5172 = verf.f32 %v4294_v45 }
 0x38a   : > { %5174 = verf.f32 %v4295_v47 }
 0x38b   : > { %5176 = verf.f32 %v4296_v50 }
 0x391   : > { %v5163_v52 = vpop.eup %5162 }
 0x392   : > { %v5165_v53 = vpop.eup %5164  ;;  %v4305_v54 = vadd.f32 1.0, %v5163_v52 }
 0x393   : > { %v5167_v56 = vpop.eup %5166  ;;  %v4306_v57 = vadd.f32 1.0, %v5165_v53 }
 0x394   : > { %v5169_v58 = vpop.eup %5168  ;;  %v4307_v61 = vadd.f32 1.0, %v5167_v56  ;;  %v6415_v62 = vmul.f32 %v4305_v54, %v4281_v51 }
 0x395   : > { %v5171_v31 = vpop.eup %5170  ;;  %v4308_v0 = vadd.f32 1.0, %v5169_v58  ;;  %v6417_v1 = vmul.f32 %v4306_v57, %v4282_v48 }
 0x396   : > { %v5173_v2 = vpop.eup %5172  ;;  %v4309_v4 = vadd.f32 1.0, %v5171_v31  ;;  %v4315_v7 = vmul.f32 %v4307_v61, %v4283_v55 }
 0x397   : > { %v5175_v5 = vpop.eup %5174  ;;  %v4310_v10 = vadd.f32 1.0, %v5173_v2  ;;  %v4316_v16 = vmul.f32 %v4308_v0, %v4284_v23  ;;  %4329 = sbr.rel (%p6411_p6) target bundleno = 928 (0x3a0), region = 56 }
 0x398   : > { %v5177_v8 = vpop.eup %5176  ;;  %v4311_v30 = vadd.f32 1.0, %v5175_v5  ;;  %v4317_v9 = vmul.f32 %v4309_v4, %v4285_v60 }
 0x399   : > { %v4312_v21 = vadd.f32 1.0, %v5177_v8  ;;  %v4318_v11 = vmul.f32 %v4310_v10, %v4286_v63 }
 0x39a   : > { %v4319_v37 = vmul.f32 %v4311_v30, %v4287_v3 }
 0x39b   : > { %v4320_v59 = vmul.f32 %v4312_v21, %v4288_v14 }
 0x39c   : > { %4330 = vst [vmem:[#allocation2 + $0xb0] sm:$0xff] %v6415_v62  ;;  %4331 = vst [vmem:[#allocation2] sm:$0xff] %v6417_v1 }
 0x39d   : > { %4332 = vst [vmem:[#allocation2 + $0xd8] sm:$0xff] %v4315_v7  ;;  %4333 = vst [vmem:[#allocation2 + $0x18] sm:$0xff] %v4316_v16 }
 0x39e   : > { %4334 = vst [vmem:[#allocation2 + $0x50] sm:$0xff] %v4317_v9  ;;  %4335 = vst [vmem:[#allocation2 + $0x68] sm:$0xff] %v4318_v11 }
 0x39f   : > { %4336 = vst [vmem:[#allocation2 + $0x30] sm:$0xff] %v4319_v37  ;;  %4337 = vst [vmem:[#allocation2 + $0x48] sm:$0xff] %v4320_v59 }
 0x3a0 PF: > { %p4338_p8 = scmp.eq.s32.totalorder %s6396_s24, 1 }
 0x3a2   : > { %p4339_p9 = pnand %p4338_p8, %p6404_p11 }
 0x3a4   : > { %4342 = sbr.rel (%p4339_p9) target bundleno = 941 (0x3ad), region = 60 }
 0x3a9   : > { %4343 = vst [vmem:[#allocation2 + $0x80] sm:$0xff] %v6415_v62  ;;  %4344 = vst [vmem:[#allocation2 + $0x88] sm:$0xff] %v6417_v1 }
 0x3aa   : > { %4345 = vst [vmem:[#allocation2 + $0xe8] sm:$0xff] %v4315_v7  ;;  %4346 = vst [vmem:[#allocation2 + $0xb8] sm:$0xff] %v4316_v16 }
 0x3ab   : > { %4347 = vst [vmem:[#allocation2 + $0x60] sm:$0xff] %v4317_v9  ;;  %4348 = vst [vmem:[#allocation2 + $0xf0] sm:$0xff] %v4318_v11 }
 0x3ac   : > { %4349 = vst [vmem:[#allocation2 + $0x8] sm:$0xff] %v4319_v37  ;;  %4350 = vst [vmem:[#allocation2 + $0x78] sm:$0xff] %v4320_v59 }
 0x3ad PF: > { %p4351_p2 = scmp.eq.s32.totalorder %s6396_s24, 2 }
 0x3af   : > { %p4352_p5 = pnand %p4351_p2, %p6404_p11 }
 0x3b1   : > { %4355 = sbr.rel (%p4352_p5) target bundleno = 954 (0x3ba), region = 64 }
 0x3b6   : > { %4356 = vst [vmem:[#allocation2 + $0x38] sm:$0xff] %v6415_v62  ;;  %4357 = vst [vmem:[#allocation2 + $0x58] sm:$0xff] %v6417_v1 }
 0x3b7   : > { %4358 = vst [vmem:[#allocation2 + $0x40] sm:$0xff] %v4315_v7  ;;  %4359 = vst [vmem:[#allocation2 + $0xc8] sm:$0xff] %v4316_v16 }
 0x3b8   : > { %4360 = vst [vmem:[#allocation2 + $0xe0] sm:$0xff] %v4317_v9  ;;  %4361 = vst [vmem:[#allocation2 + $0x90] sm:$0xff] %v4318_v11 }
 0x3b9   : > { %4362 = vst [vmem:[#allocation2 + $0x70] sm:$0xff] %v4319_v37  ;;  %4363 = vst [vmem:[#allocation2 + $0xc0] sm:$0xff] %v4320_v59 }
 0x3ba PF: > { %p4364_p7 = scmp.eq.s32.totalorder %s6396_s24, 3 }
 0x3bc   : > { %p4365_p10 = pnand %p4364_p7, %p6404_p11 }
 0x3be   : > { %4368 = sbr.rel (%p4365_p10) target bundleno = 967 (0x3c7), region = 68 }
 0x3c3   : > { %4369 = vst [vmem:[#allocation2 + $0xa8] sm:$0xff] %v6415_v62  ;;  %4370 = vst [vmem:[#allocation2 + $0xd0] sm:$0xff] %v6417_v1 }
 0x3c4   : > { %4371 = vst [vmem:[#allocation2 + $0x10] sm:$0xff] %v4315_v7  ;;  %4372 = vst [vmem:[#allocation2 + $0x28] sm:$0xff] %v4316_v16 }
 0x3c5   : > { %4373 = vst [vmem:[#allocation2 + $0xa0] sm:$0xff] %v4317_v9  ;;  %4374 = vst [vmem:[#allocation2 + $0xf8] sm:$0xff] %v4318_v11 }
 0x3c6   : > { %4375 = vst [vmem:[#allocation2 + $0x20] sm:$0xff] %v4319_v37  ;;  %4376 = vst [vmem:[#allocation2 + $0x98] sm:$0xff] %v4320_v59 }
 0x3c7 PF: > { %p4377_p13 = pnand %p5718_p0, %p5711_p12 }
 0x3c9   : > { %4380 = sbr.rel (%p4377_p13) target bundleno = 978 (0x3d2), region = 72 }
 0x3ce   : > { %4381 = vst [vmem:[%s5675_s19] sm:$0xff] %v6415_v62  ;;  %4382 = vst [vmem:[%s5675_s19 + $0x8] sm:$0xff] %v6417_v1 }
 0x3cf   : > { %4383 = vst [vmem:[%s5675_s19 + $0x10] sm:$0xff] %v4315_v7  ;;  %4384 = vst [vmem:[%s5675_s19 + $0x18] sm:$0xff] %v4316_v16 }
 0x3d0   : > { %4385 = vst [vmem:[%s5675_s19 + $0x20] sm:$0xff] %v4317_v9  ;;  %4386 = vst [vmem:[%s5675_s19 + $0x28] sm:$0xff] %v4318_v11 }
 0x3d1   : > { %4387 = vst [vmem:[%s5675_s19 + $0x30] sm:$0xff] %v4319_v37  ;;  %4388 = vst [vmem:[%s5675_s19 + $0x38] sm:$0xff] %v4320_v59 }
 0x3d2 PF: > { %s36_s25 = sadd.s32 1, %s5370_s25   ;;  %s6536_s30 = sld [smem:[#allocation21_spill]] }
 0x3d3   : > { %p33_p12 = scmp.ge.s32.totalorder %s36_s25, 44   ;;  %s6537_s21 = sld [smem:[#allocation26_spill]] }
 0x3d4   : > { %s6538_s4 = sld [smem:[#allocation22_spill]]  ;;  %s6542_s0 = smov %s5334_s1 }
 0x3d5   : > { %s6539_s22 = sld [smem:[#allocation23_spill]]  ;;  %s6543_s1 = smov %s5338_s2 }
 0x3d6   : > { %s6540_s14 = sld [smem:[#allocation24_spill]]  ;;  %s6544_s2 = smov %s5618_s23 }
 0x3d7   : > { %s6541_s24 = sld [smem:[#allocation25_spill]]  ;;  %s6545_s20 = smov %s5346_s3 }
 0x3d8   : > { %s6546_s3 = smov %s6536_s30  ;;  %35 = sbr.rel (!%p33_p12) target bundleno = 20 (0x14), region = 123 }
 0x3dc   : > { %s6547_s23 = smov %s6540_s14 }
 0x3dd   :  { %4410 = vsyncpa [#allocation11], 1 }
 0x3de   :  { %4412 = vsyncpa [#allocation11 + $0x1], 1 }
 0x3df   :  { %4413 = vsyncpa [#allocation13], 1 }
 0x3e0   :  { %4415 = vsyncpa [#allocation13 + $0x1], 1 }

</bundles_post_ra>
